<compile_context>
chip_gen: v7x
topology: tpu7x:2x2x1
jax: 0.10.0
libtpu: 0.0.40
codegen_flags: <defaults>
</compile_context>

<pallas_src>
import functools
import math

import jax
import jax.numpy as jnp
from jax.experimental import pallas as pl
from jax.experimental.pallas import tpu as pltpu  # noqa: F401  (TPU backend)

# ---- model hyper-parameters --------------------------------------------------
VOCAB_SIZE = 64
FEATURE_DIMENSION = 32
LAYER_COUNT = 2
NUM_HEADS = 4
FFN_DIM = 64
MAX_LEN = 64

D = FEATURE_DIMENSION
F = FFN_DIM
HEAD_DIM = D // NUM_HEADS
W_ROWS = max(D, F)            # row count of the packed weight slab
OUT_PAD = 128                 # lane-padded width of the output projection
MATMUL_DTYPE = jnp.bfloat16   # MXU-native operand dtype; accumulation is fp32
NEG_INF = -1e9


# ======================= packed-parameter slab layout ========================
def _align128(n):
    return -(-n // 128) * 128


def _layer_entries(kind):
    """Canonical (name, din, dout) / (name, n) lists for one layer."""
    ws = [("wqkv", D, 3 * D), ("wo", D, D)]
    bs = [("bqkv", 3 * D), ("bo", D)]
    if kind == "dec":
        ws += [("wq", D, D), ("wkv", D, 2 * D), ("wco", D, D)]
        bs += [("bq", D), ("bkv", 2 * D), ("bco", D)]
    ws += [("w1", D, F), ("w2", F, D)]
    bs += [("b1", F), ("b2", D)]
    n_ln = 3 if kind == "dec" else 2
    for i in range(1, n_ln + 1):
        bs += [(f"ln{i}_g", D), (f"ln{i}_b", D)]
    return ws, bs


def _build_layout():
    wmap, bmap = {}, {}
    woff, boff = 0, 0

    def add(prefix, kind):
        nonlocal woff, boff
        ws, bs = _layer_entries(kind)
        for name, din, dout in ws:
            wmap[prefix + name] = (din, woff, dout)
            woff += _align128(dout)          # 128-lane aligned slots
        for name, n in bs:
            bmap[prefix + name] = (boff, n)
            boff += _align128(n)

    for l in range(LAYER_COUNT):
        add(f"enc{l}.", "enc")
    for l in range(LAYER_COUNT):
        add(f"dec{l}.", "dec")
    wmap["out_w"] = (D, woff, OUT_PAD); woff += OUT_PAD
    bmap["out_b"] = (boff, OUT_PAD);    boff += OUT_PAD
    return wmap, bmap, _align128(woff), _align128(boff)


W_MAP, B_MAP, W_TOTAL, B_TOTAL = _build_layout()


def pack_params(params):
    """Pack every weight into one bf16 slab and every bias/LN param into one
    fp32 slab.  The 1/sqrt(dh) attention scale is folded into the Q weights."""
    scale = 1.0 / math.sqrt(HEAD_DIM)
    w_slab = jnp.zeros((W_ROWS, W_TOTAL), jnp.float32)
    b_slab = jnp.zeros((1, B_TOTAL), jnp.float32)

    def put_w(slab, key, w):
        w = jnp.asarray(w, jnp.float32)
        _, off, _ = W_MAP[key]
        return slab.at[:w.shape[0], off:off + w.shape[1]].set(w)

    def put_b(slab, key, b):
        b = jnp.asarray(b, jnp.float32).reshape(-1)
        off, _ = B_MAP[key]
        return slab.at[0, off:off + b.shape[0]].set(b)

    def put_layer(w_slab, b_slab, prefix, layer, kind):
        ws, bs = _layer_entries(kind)
        lp = dict(layer)
        # fold the attention scale into the Q projection (weights + bias)
        lp["wqkv"] = jnp.asarray(lp["wqkv"], jnp.float32).at[:, :D].multiply(scale)
        lp["bqkv"] = jnp.asarray(lp["bqkv"], jnp.float32).at[:D].multiply(scale)
        if kind == "dec":
            lp["wq"] = jnp.asarray(lp["wq"], jnp.float32) * scale
            lp["bq"] = jnp.asarray(lp["bq"], jnp.float32) * scale
        for name, _, _ in ws:
            w_slab = put_w(w_slab, prefix + name, lp[name])
        for name, _ in bs:
            b_slab = put_b(b_slab, prefix + name, lp[name])
        return w_slab, b_slab

    for l, layer in enumerate(params["encoder_layers"]):
        w_slab, b_slab = put_layer(w_slab, b_slab, f"enc{l}.", layer, "enc")
    for l, layer in enumerate(params["decoder_layers"]):
        w_slab, b_slab = put_layer(w_slab, b_slab, f"dec{l}.", layer, "dec")
    w_slab = put_w(w_slab, "out_w", params["out_w"])
    b_slab = put_b(b_slab, "out_b", params["out_b"])
    return w_slab.astype(MATMUL_DTYPE), b_slab


# ============================ fused forward kernel ============================
def _build_kernel(use_encoder):
    H, dh = NUM_HEADS, HEAD_DIM

    def kernel(*refs):
        it = iter(refs)
        xs_ref = next(it)                               # (Ms, D)  fp32
        xt_ref = next(it)                               # (Mt, D)  fp32
        enc_mask_ref = next(it) if use_encoder else None  # (Ms, Ms) additive
        self_mask_ref = next(it)                        # (Mt, Mt) additive
        mem_mask_ref = next(it)                         # (Mt, Mm) additive
        w_ref = next(it)                                # (W_ROWS, W_TOTAL) bf16
        b_ref = next(it)                                # (1, B_TOTAL) fp32
        out_ref = next(it)                              # (Mt, OUT_PAD) fp32

        def W(name):
            din, off, n = W_MAP[name]
            return w_ref[:din, off:off + n]             # bf16 (din, n)

        def Bv(name):
            off, n = B_MAP[name]
            return b_ref[:, off:off + n]                # fp32 (1, n)

        def mm(x, wname, bname, relu=False):
            y = jnp.dot(x.astype(MATMUL_DTYPE), W(wname),
                        preferred_element_type=jnp.float32) + Bv(bname)
            return jnp.maximum(y, 0.0) if relu else y

        def layernorm(x, gname, bname):
            mu = jnp.mean(x, axis=-1, keepdims=True)
            var = jnp.mean(x * x, axis=-1, keepdims=True) - mu * mu
            return (x - mu) * jax.lax.rsqrt(var + 1e-5) * Bv(gname) + Bv(bname)

        def attention(q, k, v, wo_name, bo_name, mask):
            # q: (Mq, D), k/v: (Mk, D) fp32; mask: (Mq, Mk) additive fp32.
            qb = q.astype(MATMUL_DTYPE)
            kb = k.astype(MATMUL_DTYPE)
            vb = v.astype(MATMUL_DTYPE)
            dn = (((1,), (1,)), ((), ()))               # q @ k^T, no transpose
            # per-head MXU score matmuls, stacked for ONE softmax chain
            s = jnp.stack(
                [jax.lax.dot_general(qb[:, h * dh:(h + 1) * dh],
                                     kb[:, h * dh:(h + 1) * dh], dn,
                                     preferred_element_type=jnp.float32)
                 for h in range(H)], axis=0)            # (H, Mq, Mk)
            s = s + mask[None]
            s = s - jnp.max(s, axis=-1, keepdims=True)
            e = jnp.exp(s)
            denom = jnp.sum(e, axis=-1, keepdims=True) + 1e-30
            p = (e * pl.reciprocal(denom, approx=True)).astype(MATMUL_DTYPE)
            # fold output projection per head: concat_h(head_h) @ Wo
            _, wo_off, wo_n = W_MAP[wo_name]
            o = Bv(bo_name)                             # (1, D) -> broadcasts
            for h in range(H):
                head = jnp.dot(p[h], vb[:, h * dh:(h + 1) * dh],
                               preferred_element_type=jnp.float32)
                o = o + jnp.dot(head.astype(MATMUL_DTYPE),
                                w_ref[h * dh:(h + 1) * dh, wo_off:wo_off + wo_n],
                                preferred_element_type=jnp.float32)
            return o

        def self_attn(x, prefix, mask):
            qkv = mm(x, prefix + "wqkv", prefix + "bqkv")   # fused QKV matmul
            return attention(qkv[:, :D], qkv[:, D:2 * D], qkv[:, 2 * D:],
                             prefix + "wo", prefix + "bo", mask)

        def cross_attn(xq, xkv, prefix, mask):
            q = mm(xq, prefix + "wq", prefix + "bq")
            kv = mm(xkv, prefix + "wkv", prefix + "bkv")    # fused K/V matmul
            return attention(q, kv[:, :D], kv[:, D:],
                             prefix + "wco", prefix + "bco", mask)

        def ffn(x, prefix):
            h = mm(x, prefix + "w1", prefix + "b1", relu=True)
            return mm(h, prefix + "w2", prefix + "b2")

        def encoder_layer(x, prefix, mask):
            x = layernorm(x + self_attn(x, prefix, mask),
                          prefix + "ln1_g", prefix + "ln1_b")
            return layernorm(x + ffn(x, prefix),
                             prefix + "ln2_g", prefix + "ln2_b")

        def decoder_layer(x, mem, prefix, tgt_mask, mem_mask):
            x = layernorm(x + self_attn(x, prefix, tgt_mask),
                          prefix + "ln1_g", prefix + "ln1_b")
            x = layernorm(x + cross_attn(x, mem, prefix, mem_mask),
                          prefix + "ln2_g", prefix + "ln2_b")
            return layernorm(x + ffn(x, prefix),
                             prefix + "ln3_g", prefix + "ln3_b")

        x_src = xs_ref[...]
        x_tgt = xt_ref[...]

        mem = x_src
        if use_encoder:
            enc_mask = enc_mask_ref[...]
            for l in range(LAYER_COUNT):
                mem = encoder_layer(mem, f"enc{l}.", enc_mask)

        self_mask = self_mask_ref[...]
        mem_mask = mem_mask_ref[...]
        x = x_tgt
        for l in range(LAYER_COUNT):
            kv = mem if use_encoder else x        # reference-module semantics
            x = decoder_layer(x, kv, f"dec{l}.", self_mask, mem_mask)

        # lane-dense (128-wide) output projection; real vocab is cols [:64]
        out_ref[...] = (jnp.dot(x.astype(MATMUL_DTYPE), W("out_w"),
                                preferred_element_type=jnp.float32)
                        + Bv("out_b"))

    return kernel


# ============================== host-side glue ================================
def _folded_mask(mask, B, Sq, Sk):
    """(B*Sq, B*Sk) additive mask: block-diagonal batch isolation plus the
    optional user mask (bool True == masked, PyTorch semantics) per block."""
    if mask is None:
        per_b = jnp.zeros((B, Sq, Sk), jnp.float32)
    else:
        m = jnp.asarray(mask)
        if m.dtype == jnp.bool_:
            m = jnp.where(m, NEG_INF, 0.0)
        m = m.astype(jnp.float32)
        per_b = jnp.broadcast_to(m, (B, Sq, Sk))
    full = jnp.full((B * Sq, B * Sk), NEG_INF, jnp.float32)
    for b in range(B):
        full = full.at[b * Sq:(b + 1) * Sq, b * Sk:(b + 1) * Sk].set(per_b[b])
    return full


def model_forward(params, input_token, target_token=None,
                  input_mask=None, target_mask=None, use_encoder=True):
    emb, pe = params["embedding"], params["pe"]

    B, Ss = input_token.shape
    x_src = (jnp.take(emb, input_token, axis=0) + pe[None, :Ss, :]).astype(jnp.float32)
    if target_token is not None:
        St = target_token.shape[1]
        tgt = target_token
    else:
        St = 1
        tgt = jnp.zeros_like(input_token[:, :1])
    x_tgt = (jnp.take(emb, tgt, axis=0) + pe[None, :St, :]).astype(jnp.float32)

    # fold batch into the sublane/row axis: one kernel invocation, grid=()
    x_src = x_src.reshape(B * Ss, D)
    x_tgt = x_tgt.reshape(B * St, D)

    Sm = Ss if use_encoder else St
    w_slab, b_slab = pack_params(params)

    args = [x_src, x_tgt]
    if use_encoder:
        args.append(_folded_mask(input_mask, B, Ss, Ss))       # encoder self-attn
    args.append(_folded_mask(target_mask, B, St, St))          # decoder self-attn
    args.append(_folded_mask(input_mask, B, St, Sm))           # decoder cross-attn
    args += [w_slab, b_slab]

    out = pl.pallas_call(
        _build_kernel(use_encoder),
        out_shape=jax.ShapeDtypeStruct((B * St, OUT_PAD), jnp.float32),
    )(*args)
    return out.reshape(B, St, OUT_PAD)[:, :, :VOCAB_SIZE]


# ================================== init ======================================
def positional_encoding_table(max_len, d):
    pos = jnp.arange(max_len, dtype=jnp.float32)[:, None]
    i = jnp.arange(0, d, 2, dtype=jnp.float32)
    div = jnp.exp(-jnp.log(10000.0) * i / d)
    pe = jnp.zeros((max_len, d), jnp.float32)
    pe = pe.at[:, 0::2].set(jnp.sin(pos * div))
    pe = pe.at[:, 1::2].set(jnp.cos(pos * div))
    return pe


def _dense(key, din, dout):
    return 0.02 * jax.random.normal(key, (din, dout), jnp.float32)


def _layer_params(key, kind):
    ws, bs = _layer_entries(kind)
    keys = jax.random.split(key, len(ws))
    p = {}
    for (name, din, dout), k in zip(ws, keys):
        p[name] = _dense(k, din, dout)
    for name, n in bs:
        p[name] = (jnp.ones((n,), jnp.float32) if name.endswith("_g")
                   else jnp.zeros((n,), jnp.float32))
    return p


def init_params(key):
    keys = jax.random.split(key, 2 + 2 * LAYER_COUNT)
    return {
        "embedding": 0.02 * jax.random.normal(keys[0], (VOCAB_SIZE, D), jnp.float32),
        "pe": positional_encoding_table(MAX_LEN, D),
        "out_w": _dense(keys[1], D, VOCAB_SIZE),
        "out_b": jnp.zeros((VOCAB_SIZE,), jnp.float32),
        "encoder_layers": [_layer_params(keys[2 + l], "enc")
                           for l in range(LAYER_COUNT)],
        "decoder_layers": [_layer_params(keys[2 + LAYER_COUNT + l], "dec")
                           for l in range(LAYER_COUNT)],
    }


# ================================== main ======================================
if __name__ == "__main__":
    # TODO(synk): dropout inside the (undefined) reference sub-layers is omitted
    # (eval-mode semantics).
    B, S = 2, 8
    root = jax.random.PRNGKey(0)
    k_params, k_in, k_tgt = jax.random.split(root, 3)

    params = init_params(k_params)
    input_token = jax.random.randint(k_in, (B, S), 0, VOCAB_SIZE, dtype=jnp.int32)
    target_token = jax.random.randint(k_tgt, (B, S), 0, VOCAB_SIZE, dtype=jnp.int32)

    fwd = jax.jit(functools.partial(model_forward, use_encoder=True))

    # No-mask run.
    out = fwd(params, input_token, target_token)
    jax.block_until_ready(out)
    assert out.shape == (B, S, VOCAB_SIZE), out.shape
    assert bool(jnp.all(jnp.isfinite(out)))

    # Causal-target-mask run (bool mask, True == masked).
    causal = jnp.triu(jnp.ones((S, S), dtype=jnp.bool_), k=1)
    out_m = fwd(params, input_token, target_token, None, causal)
    jax.block_until_ready(out_m)
    assert out_m.shape == (B, S, VOCAB_SIZE), out_m.shape
    assert bool(jnp.all(jnp.isfinite(out_m)))

    print("KERNEL_OK")
</pallas_src>

<mosaic_0001>
module attributes {stable_mosaic.version = 11 : i64} {
  func.func @kernel(%arg0: memref<16x32xf32, #tpu.memory_space<vmem>>, %arg1: memref<16x32xf32, #tpu.memory_space<vmem>>, %arg2: memref<16x16xf32, #tpu.memory_space<vmem>>, %arg3: memref<16x16xf32, #tpu.memory_space<vmem>>, %arg4: memref<16x16xf32, #tpu.memory_space<vmem>>, %arg5: memref<64x2944xbf16, #tpu.memory_space<vmem>>, %arg6: memref<1x5504xf32, #tpu.memory_space<vmem>>, %arg7: memref<16x128xf32, #tpu.memory_space<vmem>>) attributes {dimension_semantics = [], scalar_prefetch = 0 : i64, scratch_operands = 0 : i64, tpu.core_type = #tpu.core_type<tc>} {
    %c0 = arith.constant 0 : index
    %c0_0 = arith.constant 0 : index
    %0 = vector.load %arg0[%c0, %c0_0] : memref<16x32xf32, #tpu.memory_space<vmem>>, vector<16x32xf32>
    %c0_1 = arith.constant 0 : index
    %c0_2 = arith.constant 0 : index
    %1 = vector.load %arg1[%c0_1, %c0_2] : memref<16x32xf32, #tpu.memory_space<vmem>>, vector<16x32xf32>
    %c0_3 = arith.constant 0 : index
    %c0_4 = arith.constant 0 : index
    %2 = vector.load %arg2[%c0_3, %c0_4] : memref<16x16xf32, #tpu.memory_space<vmem>>, vector<16x16xf32>
    %3 = arith.truncf %0 : vector<16x32xf32> to vector<16x32xbf16>
    %c0_5 = arith.constant 0 : index
    %c0_6 = arith.constant 0 : index
    %4 = vector.load %arg5[%c0_5, %c0_6] : memref<64x2944xbf16, #tpu.memory_space<vmem>>, vector<32x96xbf16>
    %cst = arith.constant dense<0.000000e+00> : vector<16x96xf32>
    %5 = tpu.matmul %3, %4, %cst {dimension_numbers = #tpu.dot_dimension_numbers<[1], [0], [0], [1], [0, 0, 1, 1], [], []>} : vector<16x32xbf16>, vector<32x96xbf16>, vector<16x96xf32> -> vector<16x96xf32>
    %c0_7 = arith.constant 0 : index
    %c0_8 = arith.constant 0 : index
    %6 = vector.load %arg6[%c0_7, %c0_8] : memref<1x5504xf32, #tpu.memory_space<vmem>>, vector<1x96xf32>
    %7 = vector.broadcast %6 : vector<1x96xf32> to vector<16x96xf32>
    %8 = arith.addf %5, %7 : vector<16x96xf32>
    %9 = vector.extract_strided_slice %8 {offsets = [0, 0], sizes = [16, 32], strides = [1, 1]} : vector<16x96xf32> to vector<16x32xf32>
    %10 = vector.extract_strided_slice %8 {offsets = [0, 32], sizes = [16, 32], strides = [1, 1]} : vector<16x96xf32> to vector<16x32xf32>
    %11 = vector.extract_strided_slice %8 {offsets = [0, 64], sizes = [16, 32], strides = [1, 1]} : vector<16x96xf32> to vector<16x32xf32>
    %12 = arith.truncf %9 : vector<16x32xf32> to vector<16x32xbf16>
    %13 = arith.truncf %10 : vector<16x32xf32> to vector<16x32xbf16>
    %14 = arith.truncf %11 : vector<16x32xf32> to vector<16x32xbf16>
    %15 = vector.extract_strided_slice %12 {offsets = [0, 0], sizes = [16, 8], strides = [1, 1]} : vector<16x32xbf16> to vector<16x8xbf16>
    %16 = vector.extract_strided_slice %13 {offsets = [0, 0], sizes = [16, 8], strides = [1, 1]} : vector<16x32xbf16> to vector<16x8xbf16>
    %cst_9 = arith.constant dense<0.000000e+00> : vector<16x16xf32>
    %17 = tpu.matmul %15, %16, %cst_9 {dimension_numbers = #tpu.dot_dimension_numbers<[1], [1], [0], [0], [0, 0, 1, 0], [], []>} : vector<16x8xbf16>, vector<16x8xbf16>, vector<16x16xf32> -> vector<16x16xf32>
    %18 = vector.extract_strided_slice %12 {offsets = [0, 8], sizes = [16, 8], strides = [1, 1]} : vector<16x32xbf16> to vector<16x8xbf16>
    %19 = vector.extract_strided_slice %13 {offsets = [0, 8], sizes = [16, 8], strides = [1, 1]} : vector<16x32xbf16> to vector<16x8xbf16>
    %cst_10 = arith.constant dense<0.000000e+00> : vector<16x16xf32>
    %20 = tpu.matmul %18, %19, %cst_10 {dimension_numbers = #tpu.dot_dimension_numbers<[1], [1], [0], [0], [0, 0, 1, 0], [], []>} : vector<16x8xbf16>, vector<16x8xbf16>, vector<16x16xf32> -> vector<16x16xf32>
    %21 = vector.extract_strided_slice %12 {offsets = [0, 16], sizes = [16, 8], strides = [1, 1]} : vector<16x32xbf16> to vector<16x8xbf16>
    %22 = vector.extract_strided_slice %13 {offsets = [0, 16], sizes = [16, 8], strides = [1, 1]} : vector<16x32xbf16> to vector<16x8xbf16>
    %cst_11 = arith.constant dense<0.000000e+00> : vector<16x16xf32>
    %23 = tpu.matmul %21, %22, %cst_11 {dimension_numbers = #tpu.dot_dimension_numbers<[1], [1], [0], [0], [0, 0, 1, 0], [], []>} : vector<16x8xbf16>, vector<16x8xbf16>, vector<16x16xf32> -> vector<16x16xf32>
    %24 = vector.extract_strided_slice %12 {offsets = [0, 24], sizes = [16, 8], strides = [1, 1]} : vector<16x32xbf16> to vector<16x8xbf16>
    %25 = vector.extract_strided_slice %13 {offsets = [0, 24], sizes = [16, 8], strides = [1, 1]} : vector<16x32xbf16> to vector<16x8xbf16>
    %cst_12 = arith.constant dense<0.000000e+00> : vector<16x16xf32>
    %26 = tpu.matmul %24, %25, %cst_12 {dimension_numbers = #tpu.dot_dimension_numbers<[1], [1], [0], [0], [0, 0, 1, 0], [], []>} : vector<16x8xbf16>, vector<16x8xbf16>, vector<16x16xf32> -> vector<16x16xf32>
    %27 = vector.shape_cast %17 : vector<16x16xf32> to vector<1x16x16xf32>
    %28 = vector.shape_cast %20 : vector<16x16xf32> to vector<1x16x16xf32>
    %29 = vector.shape_cast %23 : vector<16x16xf32> to vector<1x16x16xf32>
    %30 = vector.shape_cast %26 : vector<16x16xf32> to vector<1x16x16xf32>
    %31 = tpu.concatenate %27, %28, %29, %30 in 0 : vector<1x16x16xf32>, vector<1x16x16xf32>, vector<1x16x16xf32>, vector<1x16x16xf32> -> vector<4x16x16xf32>
    %32 = vector.shape_cast %2 : vector<16x16xf32> to vector<1x16x16xf32>
    %33 = vector.broadcast %32 : vector<1x16x16xf32> to vector<4x16x16xf32>
    %34 = arith.addf %31, %33 : vector<4x16x16xf32>
    %cst_13 = arith.constant dense<0xFF800000> : vector<4x16xf32>
    %35 = vector.multi_reduction <maximumf>, %34, %cst_13 [2] : vector<4x16x16xf32> to vector<4x16xf32>
    %36 = vector.shape_cast %35 : vector<4x16xf32> to vector<4x16x1xf32>
    %37 = vector.broadcast %36 : vector<4x16x1xf32> to vector<4x16x16xf32>
    %38 = arith.subf %34, %37 : vector<4x16x16xf32>
    %39 = math.exp %38 : vector<4x16x16xf32>
    %cst_14 = arith.constant dense<0.000000e+00> : vector<4x16xf32>
    %40 = vector.multi_reduction <add>, %39, %cst_14 [2] : vector<4x16x16xf32> to vector<4x16xf32>
    %41 = vector.shape_cast %40 : vector<4x16xf32> to vector<4x16x1xf32>
    %cst_15 = arith.constant 1.000000e-30 : f32
    %42 = vector.broadcast %cst_15 : f32 to vector<4x16x1xf32>
    %43 = arith.addf %41, %42 : vector<4x16x1xf32>
    %44 = tpu.reciprocal %43 {approx = true} : vector<4x16x1xf32> -> vector<4x16x1xf32>
    %45 = vector.broadcast %44 : vector<4x16x1xf32> to vector<4x16x16xf32>
    %46 = arith.mulf %39, %45 : vector<4x16x16xf32>
    %47 = arith.truncf %46 : vector<4x16x16xf32> to vector<4x16x16xbf16>
    %c0_16 = arith.constant 0 : index
    %c128 = arith.constant 128 : index
    %48 = vector.load %arg6[%c0_16, %c128] : memref<1x5504xf32, #tpu.memory_space<vmem>>, vector<1x32xf32>
    %49 = vector.extract_strided_slice %47 {offsets = [0, 0, 0], sizes = [1, 16, 16], strides = [1, 1, 1]} : vector<4x16x16xbf16> to vector<1x16x16xbf16>
    %50 = vector.shape_cast %49 : vector<1x16x16xbf16> to vector<16x16xbf16>
    %51 = vector.extract_strided_slice %14 {offsets = [0, 0], sizes = [16, 8], strides = [1, 1]} : vector<16x32xbf16> to vector<16x8xbf16>
    %cst_17 = arith.constant dense<0.000000e+00> : vector<16x8xf32>
    %52 = tpu.matmul %50, %51, %cst_17 {dimension_numbers = #tpu.dot_dimension_numbers<[1], [0], [0], [1], [0, 0, 1, 1], [], []>} : vector<16x16xbf16>, vector<16x8xbf16>, vector<16x8xf32> -> vector<16x8xf32>
    %53 = arith.truncf %52 : vector<16x8xf32> to vector<16x8xbf16>
    %c0_18 = arith.constant 0 : index
    %c128_19 = arith.constant 128 : index
    %54 = vector.load %arg5[%c0_18, %c128_19] : memref<64x2944xbf16, #tpu.memory_space<vmem>>, vector<8x32xbf16>
    %cst_20 = arith.constant dense<0.000000e+00> : vector<16x32xf32>
    %55 = tpu.matmul %53, %54, %cst_20 {dimension_numbers = #tpu.dot_dimension_numbers<[1], [0], [0], [1], [0, 0, 1, 1], [], []>} : vector<16x8xbf16>, vector<8x32xbf16>, vector<16x32xf32> -> vector<16x32xf32>
    %56 = vector.broadcast %48 : vector<1x32xf32> to vector<16x32xf32>
    %57 = arith.addf %56, %55 : vector<16x32xf32>
    %58 = vector.extract_strided_slice %47 {offsets = [1, 0, 0], sizes = [1, 16, 16], strides = [1, 1, 1]} : vector<4x16x16xbf16> to vector<1x16x16xbf16>
    %59 = vector.shape_cast %58 : vector<1x16x16xbf16> to vector<16x16xbf16>
    %60 = vector.extract_strided_slice %14 {offsets = [0, 8], sizes = [16, 8], strides = [1, 1]} : vector<16x32xbf16> to vector<16x8xbf16>
    %cst_21 = arith.constant dense<0.000000e+00> : vector<16x8xf32>
    %61 = tpu.matmul %59, %60, %cst_21 {dimension_numbers = #tpu.dot_dimension_numbers<[1], [0], [0], [1], [0, 0, 1, 1], [], []>} : vector<16x16xbf16>, vector<16x8xbf16>, vector<16x8xf32> -> vector<16x8xf32>
    %62 = arith.truncf %61 : vector<16x8xf32> to vector<16x8xbf16>
    %c8 = arith.constant 8 : index
    %c128_22 = arith.constant 128 : index
    %63 = vector.load %arg5[%c8, %c128_22] : memref<64x2944xbf16, #tpu.memory_space<vmem>>, vector<8x32xbf16>
    %cst_23 = arith.constant dense<0.000000e+00> : vector<16x32xf32>
    %64 = tpu.matmul %62, %63, %cst_23 {dimension_numbers = #tpu.dot_dimension_numbers<[1], [0], [0], [1], [0, 0, 1, 1], [], []>} : vector<16x8xbf16>, vector<8x32xbf16>, vector<16x32xf32> -> vector<16x32xf32>
    %65 = arith.addf %57, %64 : vector<16x32xf32>
    %66 = vector.extract_strided_slice %47 {offsets = [2, 0, 0], sizes = [1, 16, 16], strides = [1, 1, 1]} : vector<4x16x16xbf16> to vector<1x16x16xbf16>
    %67 = vector.shape_cast %66 : vector<1x16x16xbf16> to vector<16x16xbf16>
    %68 = vector.extract_strided_slice %14 {offsets = [0, 16], sizes = [16, 8], strides = [1, 1]} : vector<16x32xbf16> to vector<16x8xbf16>
    %cst_24 = arith.constant dense<0.000000e+00> : vector<16x8xf32>
    %69 = tpu.matmul %67, %68, %cst_24 {dimension_numbers = #tpu.dot_dimension_numbers<[1], [0], [0], [1], [0, 0, 1, 1], [], []>} : vector<16x16xbf16>, vector<16x8xbf16>, vector<16x8xf32> -> vector<16x8xf32>
    %70 = arith.truncf %69 : vector<16x8xf32> to vector<16x8xbf16>
    %c16 = arith.constant 16 : index
    %c128_25 = arith.constant 128 : index
    %71 = vector.load %arg5[%c16, %c128_25] : memref<64x2944xbf16, #tpu.memory_space<vmem>>, vector<8x32xbf16>
    %cst_26 = arith.constant dense<0.000000e+00> : vector<16x32xf32>
    %72 = tpu.matmul %70, %71, %cst_26 {dimension_numbers = #tpu.dot_dimension_numbers<[1], [0], [0], [1], [0, 0, 1, 1], [], []>} : vector<16x8xbf16>, vector<8x32xbf16>, vector<16x32xf32> -> vector<16x32xf32>
    %73 = arith.addf %65, %72 : vector<16x32xf32>
    %74 = vector.extract_strided_slice %47 {offsets = [3, 0, 0], sizes = [1, 16, 16], strides = [1, 1, 1]} : vector<4x16x16xbf16> to vector<1x16x16xbf16>
    %75 = vector.shape_cast %74 : vector<1x16x16xbf16> to vector<16x16xbf16>
    %76 = vector.extract_strided_slice %14 {offsets = [0, 24], sizes = [16, 8], strides = [1, 1]} : vector<16x32xbf16> to vector<16x8xbf16>
    %cst_27 = arith.constant dense<0.000000e+00> : vector<16x8xf32>
    %77 = tpu.matmul %75, %76, %cst_27 {dimension_numbers = #tpu.dot_dimension_numbers<[1], [0], [0], [1], [0, 0, 1, 1], [], []>} : vector<16x16xbf16>, vector<16x8xbf16>, vector<16x8xf32> -> vector<16x8xf32>
    %78 = arith.truncf %77 : vector<16x8xf32> to vector<16x8xbf16>
    %c24 = arith.constant 24 : index
    %c128_28 = arith.constant 128 : index
    %79 = vector.load %arg5[%c24, %c128_28] : memref<64x2944xbf16, #tpu.memory_space<vmem>>, vector<8x32xbf16>
    %cst_29 = arith.constant dense<0.000000e+00> : vector<16x32xf32>
    %80 = tpu.matmul %78, %79, %cst_29 {dimension_numbers = #tpu.dot_dimension_numbers<[1], [0], [0], [1], [0, 0, 1, 1], [], []>} : vector<16x8xbf16>, vector<8x32xbf16>, vector<16x32xf32> -> vector<16x32xf32>
    %81 = arith.addf %73, %80 : vector<16x32xf32>
    %82 = arith.addf %0, %81 : vector<16x32xf32>
    %cst_30 = arith.constant dense<0.000000e+00> : vector<16xf32>
    %83 = vector.multi_reduction <add>, %82, %cst_30 [1] : vector<16x32xf32> to vector<16xf32>
    %84 = vector.shape_cast %83 : vector<16xf32> to vector<16x1xf32>
    %cst_31 = arith.constant 3.200000e+01 : f32
    %85 = vector.broadcast %cst_31 : f32 to vector<16x1xf32>
    %86 = arith.divf %84, %85 : vector<16x1xf32>
    %87 = arith.mulf %82, %82 : vector<16x32xf32>
    %cst_32 = arith.constant dense<0.000000e+00> : vector<16xf32>
    %88 = vector.multi_reduction <add>, %87, %cst_32 [1] : vector<16x32xf32> to vector<16xf32>
    %89 = vector.shape_cast %88 : vector<16xf32> to vector<16x1xf32>
    %cst_33 = arith.constant 3.200000e+01 : f32
    %90 = vector.broadcast %cst_33 : f32 to vector<16x1xf32>
    %91 = arith.divf %89, %90 : vector<16x1xf32>
    %92 = arith.mulf %86, %86 : vector<16x1xf32>
    %93 = arith.subf %91, %92 : vector<16x1xf32>
    %94 = vector.broadcast %86 : vector<16x1xf32> to vector<16x32xf32>
    %95 = arith.subf %82, %94 : vector<16x32xf32>
    %cst_34 = arith.constant 9.99999974E-6 : f32
    %96 = vector.broadcast %cst_34 : f32 to vector<16x1xf32>
    %97 = arith.addf %93, %96 : vector<16x1xf32>
    %98 = math.rsqrt %97 : vector<16x1xf32>
    %99 = vector.broadcast %98 : vector<16x1xf32> to vector<16x32xf32>
    %100 = arith.mulf %95, %99 : vector<16x32xf32>
    %c0_35 = arith.constant 0 : index
    %c512 = arith.constant 512 : index
    %101 = vector.load %arg6[%c0_35, %c512] : memref<1x5504xf32, #tpu.memory_space<vmem>>, vector<1x32xf32>
    %102 = vector.broadcast %101 : vector<1x32xf32> to vector<16x32xf32>
    %103 = arith.mulf %100, %102 : vector<16x32xf32>
    %c0_36 = arith.constant 0 : index
    %c640 = arith.constant 640 : index
    %104 = vector.load %arg6[%c0_36, %c640] : memref<1x5504xf32, #tpu.memory_space<vmem>>, vector<1x32xf32>
    %105 = vector.broadcast %104 : vector<1x32xf32> to vector<16x32xf32>
    %106 = arith.addf %103, %105 : vector<16x32xf32>
    %107 = arith.truncf %106 : vector<16x32xf32> to vector<16x32xbf16>
    %c0_37 = arith.constant 0 : index
    %c256 = arith.constant 256 : index
    %108 = vector.load %arg5[%c0_37, %c256] : memref<64x2944xbf16, #tpu.memory_space<vmem>>, vector<32x64xbf16>
    %cst_38 = arith.constant dense<0.000000e+00> : vector<16x64xf32>
    %109 = tpu.matmul %107, %108, %cst_38 {dimension_numbers = #tpu.dot_dimension_numbers<[1], [0], [0], [1], [0, 0, 1, 1], [], []>} : vector<16x32xbf16>, vector<32x64xbf16>, vector<16x64xf32> -> vector<16x64xf32>
    %c0_39 = arith.constant 0 : index
    %c256_40 = arith.constant 256 : index
    %110 = vector.load %arg6[%c0_39, %c256_40] : memref<1x5504xf32, #tpu.memory_space<vmem>>, vector<1x64xf32>
    %111 = vector.broadcast %110 : vector<1x64xf32> to vector<16x64xf32>
    %112 = arith.addf %109, %111 : vector<16x64xf32>
    %cst_41 = arith.constant 0.000000e+00 : f32
    %113 = vector.broadcast %cst_41 : f32 to vector<16x64xf32>
    %114 = arith.maximumf %112, %113 : vector<16x64xf32>
    %115 = arith.truncf %114 : vector<16x64xf32> to vector<16x64xbf16>
    %c0_42 = arith.constant 0 : index
    %c384 = arith.constant 384 : index
    %116 = vector.load %arg5[%c0_42, %c384] : memref<64x2944xbf16, #tpu.memory_space<vmem>>, vector<64x32xbf16>
    %cst_43 = arith.constant dense<0.000000e+00> : vector<16x32xf32>
    %117 = tpu.matmul %115, %116, %cst_43 {dimension_numbers = #tpu.dot_dimension_numbers<[1], [0], [0], [1], [0, 0, 1, 1], [], []>} : vector<16x64xbf16>, vector<64x32xbf16>, vector<16x32xf32> -> vector<16x32xf32>
    %c0_44 = arith.constant 0 : index
    %c384_45 = arith.constant 384 : index
    %118 = vector.load %arg6[%c0_44, %c384_45] : memref<1x5504xf32, #tpu.memory_space<vmem>>, vector<1x32xf32>
    %119 = vector.broadcast %118 : vector<1x32xf32> to vector<16x32xf32>
    %120 = arith.addf %117, %119 : vector<16x32xf32>
    %121 = arith.addf %106, %120 : vector<16x32xf32>
    %cst_46 = arith.constant dense<0.000000e+00> : vector<16xf32>
    %122 = vector.multi_reduction <add>, %121, %cst_46 [1] : vector<16x32xf32> to vector<16xf32>
    %123 = vector.shape_cast %122 : vector<16xf32> to vector<16x1xf32>
    %cst_47 = arith.constant 3.200000e+01 : f32
    %124 = vector.broadcast %cst_47 : f32 to vector<16x1xf32>
    %125 = arith.divf %123, %124 : vector<16x1xf32>
    %126 = arith.mulf %121, %121 : vector<16x32xf32>
    %cst_48 = arith.constant dense<0.000000e+00> : vector<16xf32>
    %127 = vector.multi_reduction <add>, %126, %cst_48 [1] : vector<16x32xf32> to vector<16xf32>
    %128 = vector.shape_cast %127 : vector<16xf32> to vector<16x1xf32>
    %cst_49 = arith.constant 3.200000e+01 : f32
    %129 = vector.broadcast %cst_49 : f32 to vector<16x1xf32>
    %130 = arith.divf %128, %129 : vector<16x1xf32>
    %131 = arith.mulf %125, %125 : vector<16x1xf32>
    %132 = arith.subf %130, %131 : vector<16x1xf32>
    %133 = vector.broadcast %125 : vector<16x1xf32> to vector<16x32xf32>
    %134 = arith.subf %121, %133 : vector<16x32xf32>
    %cst_50 = arith.constant 9.99999974E-6 : f32
    %135 = vector.broadcast %cst_50 : f32 to vector<16x1xf32>
    %136 = arith.addf %132, %135 : vector<16x1xf32>
    %137 = math.rsqrt %136 : vector<16x1xf32>
    %138 = vector.broadcast %137 : vector<16x1xf32> to vector<16x32xf32>
    %139 = arith.mulf %134, %138 : vector<16x32xf32>
    %c0_51 = arith.constant 0 : index
    %c768 = arith.constant 768 : index
    %140 = vector.load %arg6[%c0_51, %c768] : memref<1x5504xf32, #tpu.memory_space<vmem>>, vector<1x32xf32>
    %141 = vector.broadcast %140 : vector<1x32xf32> to vector<16x32xf32>
    %142 = arith.mulf %139, %141 : vector<16x32xf32>
    %c0_52 = arith.constant 0 : index
    %c896 = arith.constant 896 : index
    %143 = vector.load %arg6[%c0_52, %c896] : memref<1x5504xf32, #tpu.memory_space<vmem>>, vector<1x32xf32>
    %144 = vector.broadcast %143 : vector<1x32xf32> to vector<16x32xf32>
    %145 = arith.addf %142, %144 : vector<16x32xf32>
    %146 = arith.truncf %145 : vector<16x32xf32> to vector<16x32xbf16>
    %c0_53 = arith.constant 0 : index
    %c512_54 = arith.constant 512 : index
    %147 = vector.load %arg5[%c0_53, %c512_54] : memref<64x2944xbf16, #tpu.memory_space<vmem>>, vector<32x96xbf16>
    %cst_55 = arith.constant dense<0.000000e+00> : vector<16x96xf32>
    %148 = tpu.matmul %146, %147, %cst_55 {dimension_numbers = #tpu.dot_dimension_numbers<[1], [0], [0], [1], [0, 0, 1, 1], [], []>} : vector<16x32xbf16>, vector<32x96xbf16>, vector<16x96xf32> -> vector<16x96xf32>
    %c0_56 = arith.constant 0 : index
    %c1024 = arith.constant 1024 : index
    %149 = vector.load %arg6[%c0_56, %c1024] : memref<1x5504xf32, #tpu.memory_space<vmem>>, vector<1x96xf32>
    %150 = vector.broadcast %149 : vector<1x96xf32> to vector<16x96xf32>
    %151 = arith.addf %148, %150 : vector<16x96xf32>
    %152 = vector.extract_strided_slice %151 {offsets = [0, 0], sizes = [16, 32], strides = [1, 1]} : vector<16x96xf32> to vector<16x32xf32>
    %153 = vector.extract_strided_slice %151 {offsets = [0, 32], sizes = [16, 32], strides = [1, 1]} : vector<16x96xf32> to vector<16x32xf32>
    %154 = vector.extract_strided_slice %151 {offsets = [0, 64], sizes = [16, 32], strides = [1, 1]} : vector<16x96xf32> to vector<16x32xf32>
    %155 = arith.truncf %152 : vector<16x32xf32> to vector<16x32xbf16>
    %156 = arith.truncf %153 : vector<16x32xf32> to vector<16x32xbf16>
    %157 = arith.truncf %154 : vector<16x32xf32> to vector<16x32xbf16>
    %158 = vector.extract_strided_slice %155 {offsets = [0, 0], sizes = [16, 8], strides = [1, 1]} : vector<16x32xbf16> to vector<16x8xbf16>
    %159 = vector.extract_strided_slice %156 {offsets = [0, 0], sizes = [16, 8], strides = [1, 1]} : vector<16x32xbf16> to vector<16x8xbf16>
    %cst_57 = arith.constant dense<0.000000e+00> : vector<16x16xf32>
    %160 = tpu.matmul %158, %159, %cst_57 {dimension_numbers = #tpu.dot_dimension_numbers<[1], [1], [0], [0], [0, 0, 1, 0], [], []>} : vector<16x8xbf16>, vector<16x8xbf16>, vector<16x16xf32> -> vector<16x16xf32>
    %161 = vector.extract_strided_slice %155 {offsets = [0, 8], sizes = [16, 8], strides = [1, 1]} : vector<16x32xbf16> to vector<16x8xbf16>
    %162 = vector.extract_strided_slice %156 {offsets = [0, 8], sizes = [16, 8], strides = [1, 1]} : vector<16x32xbf16> to vector<16x8xbf16>
    %cst_58 = arith.constant dense<0.000000e+00> : vector<16x16xf32>
    %163 = tpu.matmul %161, %162, %cst_58 {dimension_numbers = #tpu.dot_dimension_numbers<[1], [1], [0], [0], [0, 0, 1, 0], [], []>} : vector<16x8xbf16>, vector<16x8xbf16>, vector<16x16xf32> -> vector<16x16xf32>
    %164 = vector.extract_strided_slice %155 {offsets = [0, 16], sizes = [16, 8], strides = [1, 1]} : vector<16x32xbf16> to vector<16x8xbf16>
    %165 = vector.extract_strided_slice %156 {offsets = [0, 16], sizes = [16, 8], strides = [1, 1]} : vector<16x32xbf16> to vector<16x8xbf16>
    %cst_59 = arith.constant dense<0.000000e+00> : vector<16x16xf32>
    %166 = tpu.matmul %164, %165, %cst_59 {dimension_numbers = #tpu.dot_dimension_numbers<[1], [1], [0], [0], [0, 0, 1, 0], [], []>} : vector<16x8xbf16>, vector<16x8xbf16>, vector<16x16xf32> -> vector<16x16xf32>
    %167 = vector.extract_strided_slice %155 {offsets = [0, 24], sizes = [16, 8], strides = [1, 1]} : vector<16x32xbf16> to vector<16x8xbf16>
    %168 = vector.extract_strided_slice %156 {offsets = [0, 24], sizes = [16, 8], strides = [1, 1]} : vector<16x32xbf16> to vector<16x8xbf16>
    %cst_60 = arith.constant dense<0.000000e+00> : vector<16x16xf32>
    %169 = tpu.matmul %167, %168, %cst_60 {dimension_numbers = #tpu.dot_dimension_numbers<[1], [1], [0], [0], [0, 0, 1, 0], [], []>} : vector<16x8xbf16>, vector<16x8xbf16>, vector<16x16xf32> -> vector<16x16xf32>
    %170 = vector.shape_cast %160 : vector<16x16xf32> to vector<1x16x16xf32>
    %171 = vector.shape_cast %163 : vector<16x16xf32> to vector<1x16x16xf32>
    %172 = vector.shape_cast %166 : vector<16x16xf32> to vector<1x16x16xf32>
    %173 = vector.shape_cast %169 : vector<16x16xf32> to vector<1x16x16xf32>
    %174 = tpu.concatenate %170, %171, %172, %173 in 0 : vector<1x16x16xf32>, vector<1x16x16xf32>, vector<1x16x16xf32>, vector<1x16x16xf32> -> vector<4x16x16xf32>
    %175 = vector.shape_cast %2 : vector<16x16xf32> to vector<1x16x16xf32>
    %176 = vector.broadcast %175 : vector<1x16x16xf32> to vector<4x16x16xf32>
    %177 = arith.addf %174, %176 : vector<4x16x16xf32>
    %cst_61 = arith.constant dense<0xFF800000> : vector<4x16xf32>
    %178 = vector.multi_reduction <maximumf>, %177, %cst_61 [2] : vector<4x16x16xf32> to vector<4x16xf32>
    %179 = vector.shape_cast %178 : vector<4x16xf32> to vector<4x16x1xf32>
    %180 = vector.broadcast %179 : vector<4x16x1xf32> to vector<4x16x16xf32>
    %181 = arith.subf %177, %180 : vector<4x16x16xf32>
    %182 = math.exp %181 : vector<4x16x16xf32>
    %cst_62 = arith.constant dense<0.000000e+00> : vector<4x16xf32>
    %183 = vector.multi_reduction <add>, %182, %cst_62 [2] : vector<4x16x16xf32> to vector<4x16xf32>
    %184 = vector.shape_cast %183 : vector<4x16xf32> to vector<4x16x1xf32>
    %cst_63 = arith.constant 1.000000e-30 : f32
    %185 = vector.broadcast %cst_63 : f32 to vector<4x16x1xf32>
    %186 = arith.addf %184, %185 : vector<4x16x1xf32>
    %187 = tpu.reciprocal %186 {approx = true} : vector<4x16x1xf32> -> vector<4x16x1xf32>
    %188 = vector.broadcast %187 : vector<4x16x1xf32> to vector<4x16x16xf32>
    %189 = arith.mulf %182, %188 : vector<4x16x16xf32>
    %190 = arith.truncf %189 : vector<4x16x16xf32> to vector<4x16x16xbf16>
    %c0_64 = arith.constant 0 : index
    %c1152 = arith.constant 1152 : index
    %191 = vector.load %arg6[%c0_64, %c1152] : memref<1x5504xf32, #tpu.memory_space<vmem>>, vector<1x32xf32>
    %192 = vector.extract_strided_slice %190 {offsets = [0, 0, 0], sizes = [1, 16, 16], strides = [1, 1, 1]} : vector<4x16x16xbf16> to vector<1x16x16xbf16>
    %193 = vector.shape_cast %192 : vector<1x16x16xbf16> to vector<16x16xbf16>
    %194 = vector.extract_strided_slice %157 {offsets = [0, 0], sizes = [16, 8], strides = [1, 1]} : vector<16x32xbf16> to vector<16x8xbf16>
    %cst_65 = arith.constant dense<0.000000e+00> : vector<16x8xf32>
    %195 = tpu.matmul %193, %194, %cst_65 {dimension_numbers = #tpu.dot_dimension_numbers<[1], [0], [0], [1], [0, 0, 1, 1], [], []>} : vector<16x16xbf16>, vector<16x8xbf16>, vector<16x8xf32> -> vector<16x8xf32>
    %196 = arith.truncf %195 : vector<16x8xf32> to vector<16x8xbf16>
    %c0_66 = arith.constant 0 : index
    %c640_67 = arith.constant 640 : index
    %197 = vector.load %arg5[%c0_66, %c640_67] : memref<64x2944xbf16, #tpu.memory_space<vmem>>, vector<8x32xbf16>
    %cst_68 = arith.constant dense<0.000000e+00> : vector<16x32xf32>
    %198 = tpu.matmul %196, %197, %cst_68 {dimension_numbers = #tpu.dot_dimension_numbers<[1], [0], [0], [1], [0, 0, 1, 1], [], []>} : vector<16x8xbf16>, vector<8x32xbf16>, vector<16x32xf32> -> vector<16x32xf32>
    %199 = vector.broadcast %191 : vector<1x32xf32> to vector<16x32xf32>
    %200 = arith.addf %199, %198 : vector<16x32xf32>
    %201 = vector.extract_strided_slice %190 {offsets = [1, 0, 0], sizes = [1, 16, 16], strides = [1, 1, 1]} : vector<4x16x16xbf16> to vector<1x16x16xbf16>
    %202 = vector.shape_cast %201 : vector<1x16x16xbf16> to vector<16x16xbf16>
    %203 = vector.extract_strided_slice %157 {offsets = [0, 8], sizes = [16, 8], strides = [1, 1]} : vector<16x32xbf16> to vector<16x8xbf16>
    %cst_69 = arith.constant dense<0.000000e+00> : vector<16x8xf32>
    %204 = tpu.matmul %202, %203, %cst_69 {dimension_numbers = #tpu.dot_dimension_numbers<[1], [0], [0], [1], [0, 0, 1, 1], [], []>} : vector<16x16xbf16>, vector<16x8xbf16>, vector<16x8xf32> -> vector<16x8xf32>
    %205 = arith.truncf %204 : vector<16x8xf32> to vector<16x8xbf16>
    %c8_70 = arith.constant 8 : index
    %c640_71 = arith.constant 640 : index
    %206 = vector.load %arg5[%c8_70, %c640_71] : memref<64x2944xbf16, #tpu.memory_space<vmem>>, vector<8x32xbf16>
    %cst_72 = arith.constant dense<0.000000e+00> : vector<16x32xf32>
    %207 = tpu.matmul %205, %206, %cst_72 {dimension_numbers = #tpu.dot_dimension_numbers<[1], [0], [0], [1], [0, 0, 1, 1], [], []>} : vector<16x8xbf16>, vector<8x32xbf16>, vector<16x32xf32> -> vector<16x32xf32>
    %208 = arith.addf %200, %207 : vector<16x32xf32>
    %209 = vector.extract_strided_slice %190 {offsets = [2, 0, 0], sizes = [1, 16, 16], strides = [1, 1, 1]} : vector<4x16x16xbf16> to vector<1x16x16xbf16>
    %210 = vector.shape_cast %209 : vector<1x16x16xbf16> to vector<16x16xbf16>
    %211 = vector.extract_strided_slice %157 {offsets = [0, 16], sizes = [16, 8], strides = [1, 1]} : vector<16x32xbf16> to vector<16x8xbf16>
    %cst_73 = arith.constant dense<0.000000e+00> : vector<16x8xf32>
    %212 = tpu.matmul %210, %211, %cst_73 {dimension_numbers = #tpu.dot_dimension_numbers<[1], [0], [0], [1], [0, 0, 1, 1], [], []>} : vector<16x16xbf16>, vector<16x8xbf16>, vector<16x8xf32> -> vector<16x8xf32>
    %213 = arith.truncf %212 : vector<16x8xf32> to vector<16x8xbf16>
    %c16_74 = arith.constant 16 : index
    %c640_75 = arith.constant 640 : index
    %214 = vector.load %arg5[%c16_74, %c640_75] : memref<64x2944xbf16, #tpu.memory_space<vmem>>, vector<8x32xbf16>
    %cst_76 = arith.constant dense<0.000000e+00> : vector<16x32xf32>
    %215 = tpu.matmul %213, %214, %cst_76 {dimension_numbers = #tpu.dot_dimension_numbers<[1], [0], [0], [1], [0, 0, 1, 1], [], []>} : vector<16x8xbf16>, vector<8x32xbf16>, vector<16x32xf32> -> vector<16x32xf32>
    %216 = arith.addf %208, %215 : vector<16x32xf32>
    %217 = vector.extract_strided_slice %190 {offsets = [3, 0, 0], sizes = [1, 16, 16], strides = [1, 1, 1]} : vector<4x16x16xbf16> to vector<1x16x16xbf16>
    %218 = vector.shape_cast %217 : vector<1x16x16xbf16> to vector<16x16xbf16>
    %219 = vector.extract_strided_slice %157 {offsets = [0, 24], sizes = [16, 8], strides = [1, 1]} : vector<16x32xbf16> to vector<16x8xbf16>
    %cst_77 = arith.constant dense<0.000000e+00> : vector<16x8xf32>
    %220 = tpu.matmul %218, %219, %cst_77 {dimension_numbers = #tpu.dot_dimension_numbers<[1], [0], [0], [1], [0, 0, 1, 1], [], []>} : vector<16x16xbf16>, vector<16x8xbf16>, vector<16x8xf32> -> vector<16x8xf32>
    %221 = arith.truncf %220 : vector<16x8xf32> to vector<16x8xbf16>
    %c24_78 = arith.constant 24 : index
    %c640_79 = arith.constant 640 : index
    %222 = vector.load %arg5[%c24_78, %c640_79] : memref<64x2944xbf16, #tpu.memory_space<vmem>>, vector<8x32xbf16>
    %cst_80 = arith.constant dense<0.000000e+00> : vector<16x32xf32>
    %223 = tpu.matmul %221, %222, %cst_80 {dimension_numbers = #tpu.dot_dimension_numbers<[1], [0], [0], [1], [0, 0, 1, 1], [], []>} : vector<16x8xbf16>, vector<8x32xbf16>, vector<16x32xf32> -> vector<16x32xf32>
    %224 = arith.addf %216, %223 : vector<16x32xf32>
    %225 = arith.addf %145, %224 : vector<16x32xf32>
    %cst_81 = arith.constant dense<0.000000e+00> : vector<16xf32>
    %226 = vector.multi_reduction <add>, %225, %cst_81 [1] : vector<16x32xf32> to vector<16xf32>
    %227 = vector.shape_cast %226 : vector<16xf32> to vector<16x1xf32>
    %cst_82 = arith.constant 3.200000e+01 : f32
    %228 = vector.broadcast %cst_82 : f32 to vector<16x1xf32>
    %229 = arith.divf %227, %228 : vector<16x1xf32>
    %230 = arith.mulf %225, %225 : vector<16x32xf32>
    %cst_83 = arith.constant dense<0.000000e+00> : vector<16xf32>
    %231 = vector.multi_reduction <add>, %230, %cst_83 [1] : vector<16x32xf32> to vector<16xf32>
    %232 = vector.shape_cast %231 : vector<16xf32> to vector<16x1xf32>
    %cst_84 = arith.constant 3.200000e+01 : f32
    %233 = vector.broadcast %cst_84 : f32 to vector<16x1xf32>
    %234 = arith.divf %232, %233 : vector<16x1xf32>
    %235 = arith.mulf %229, %229 : vector<16x1xf32>
    %236 = arith.subf %234, %235 : vector<16x1xf32>
    %237 = vector.broadcast %229 : vector<16x1xf32> to vector<16x32xf32>
    %238 = arith.subf %225, %237 : vector<16x32xf32>
    %cst_85 = arith.constant 9.99999974E-6 : f32
    %239 = vector.broadcast %cst_85 : f32 to vector<16x1xf32>
    %240 = arith.addf %236, %239 : vector<16x1xf32>
    %241 = math.rsqrt %240 : vector<16x1xf32>
    %242 = vector.broadcast %241 : vector<16x1xf32> to vector<16x32xf32>
    %243 = arith.mulf %238, %242 : vector<16x32xf32>
    %c0_86 = arith.constant 0 : index
    %c1536 = arith.constant 1536 : index
    %244 = vector.load %arg6[%c0_86, %c1536] : memref<1x5504xf32, #tpu.memory_space<vmem>>, vector<1x32xf32>
    %245 = vector.broadcast %244 : vector<1x32xf32> to vector<16x32xf32>
    %246 = arith.mulf %243, %245 : vector<16x32xf32>
    %c0_87 = arith.constant 0 : index
    %c1664 = arith.constant 1664 : index
    %247 = vector.load %arg6[%c0_87, %c1664] : memref<1x5504xf32, #tpu.memory_space<vmem>>, vector<1x32xf32>
    %248 = vector.broadcast %247 : vector<1x32xf32> to vector<16x32xf32>
    %249 = arith.addf %246, %248 : vector<16x32xf32>
    %250 = arith.truncf %249 : vector<16x32xf32> to vector<16x32xbf16>
    %c0_88 = arith.constant 0 : index
    %c768_89 = arith.constant 768 : index
    %251 = vector.load %arg5[%c0_88, %c768_89] : memref<64x2944xbf16, #tpu.memory_space<vmem>>, vector<32x64xbf16>
    %cst_90 = arith.constant dense<0.000000e+00> : vector<16x64xf32>
    %252 = tpu.matmul %250, %251, %cst_90 {dimension_numbers = #tpu.dot_dimension_numbers<[1], [0], [0], [1], [0, 0, 1, 1], [], []>} : vector<16x32xbf16>, vector<32x64xbf16>, vector<16x64xf32> -> vector<16x64xf32>
    %c0_91 = arith.constant 0 : index
    %c1280 = arith.constant 1280 : index
    %253 = vector.load %arg6[%c0_91, %c1280] : memref<1x5504xf32, #tpu.memory_space<vmem>>, vector<1x64xf32>
    %254 = vector.broadcast %253 : vector<1x64xf32> to vector<16x64xf32>
    %255 = arith.addf %252, %254 : vector<16x64xf32>
    %cst_92 = arith.constant 0.000000e+00 : f32
    %256 = vector.broadcast %cst_92 : f32 to vector<16x64xf32>
    %257 = arith.maximumf %255, %256 : vector<16x64xf32>
    %258 = arith.truncf %257 : vector<16x64xf32> to vector<16x64xbf16>
    %c0_93 = arith.constant 0 : index
    %c896_94 = arith.constant 896 : index
    %259 = vector.load %arg5[%c0_93, %c896_94] : memref<64x2944xbf16, #tpu.memory_space<vmem>>, vector<64x32xbf16>
    %cst_95 = arith.constant dense<0.000000e+00> : vector<16x32xf32>
    %260 = tpu.matmul %258, %259, %cst_95 {dimension_numbers = #tpu.dot_dimension_numbers<[1], [0], [0], [1], [0, 0, 1, 1], [], []>} : vector<16x64xbf16>, vector<64x32xbf16>, vector<16x32xf32> -> vector<16x32xf32>
    %c0_96 = arith.constant 0 : index
    %c1408 = arith.constant 1408 : index
    %261 = vector.load %arg6[%c0_96, %c1408] : memref<1x5504xf32, #tpu.memory_space<vmem>>, vector<1x32xf32>
    %262 = vector.broadcast %261 : vector<1x32xf32> to vector<16x32xf32>
    %263 = arith.addf %260, %262 : vector<16x32xf32>
    %264 = arith.addf %249, %263 : vector<16x32xf32>
    %cst_97 = arith.constant dense<0.000000e+00> : vector<16xf32>
    %265 = vector.multi_reduction <add>, %264, %cst_97 [1] : vector<16x32xf32> to vector<16xf32>
    %266 = vector.shape_cast %265 : vector<16xf32> to vector<16x1xf32>
    %cst_98 = arith.constant 3.200000e+01 : f32
    %267 = vector.broadcast %cst_98 : f32 to vector<16x1xf32>
    %268 = arith.divf %266, %267 : vector<16x1xf32>
    %269 = arith.mulf %264, %264 : vector<16x32xf32>
    %cst_99 = arith.constant dense<0.000000e+00> : vector<16xf32>
    %270 = vector.multi_reduction <add>, %269, %cst_99 [1] : vector<16x32xf32> to vector<16xf32>
    %271 = vector.shape_cast %270 : vector<16xf32> to vector<16x1xf32>
    %cst_100 = arith.constant 3.200000e+01 : f32
    %272 = vector.broadcast %cst_100 : f32 to vector<16x1xf32>
    %273 = arith.divf %271, %272 : vector<16x1xf32>
    %274 = arith.mulf %268, %268 : vector<16x1xf32>
    %275 = arith.subf %273, %274 : vector<16x1xf32>
    %276 = vector.broadcast %268 : vector<16x1xf32> to vector<16x32xf32>
    %277 = arith.subf %264, %276 : vector<16x32xf32>
    %cst_101 = arith.constant 9.99999974E-6 : f32
    %278 = vector.broadcast %cst_101 : f32 to vector<16x1xf32>
    %279 = arith.addf %275, %278 : vector<16x1xf32>
    %280 = math.rsqrt %279 : vector<16x1xf32>
    %281 = vector.broadcast %280 : vector<16x1xf32> to vector<16x32xf32>
    %282 = arith.mulf %277, %281 : vector<16x32xf32>
    %c0_102 = arith.constant 0 : index
    %c1792 = arith.constant 1792 : index
    %283 = vector.load %arg6[%c0_102, %c1792] : memref<1x5504xf32, #tpu.memory_space<vmem>>, vector<1x32xf32>
    %284 = vector.broadcast %283 : vector<1x32xf32> to vector<16x32xf32>
    %285 = arith.mulf %282, %284 : vector<16x32xf32>
    %c0_103 = arith.constant 0 : index
    %c1920 = arith.constant 1920 : index
    %286 = vector.load %arg6[%c0_103, %c1920] : memref<1x5504xf32, #tpu.memory_space<vmem>>, vector<1x32xf32>
    %287 = vector.broadcast %286 : vector<1x32xf32> to vector<16x32xf32>
    %288 = arith.addf %285, %287 : vector<16x32xf32>
    %c0_104 = arith.constant 0 : index
    %c0_105 = arith.constant 0 : index
    %289 = vector.load %arg3[%c0_104, %c0_105] : memref<16x16xf32, #tpu.memory_space<vmem>>, vector<16x16xf32>
    %c0_106 = arith.constant 0 : index
    %c0_107 = arith.constant 0 : index
    %290 = vector.load %arg4[%c0_106, %c0_107] : memref<16x16xf32, #tpu.memory_space<vmem>>, vector<16x16xf32>
    %291 = arith.truncf %1 : vector<16x32xf32> to vector<16x32xbf16>
    %c0_108 = arith.constant 0 : index
    %c1024_109 = arith.constant 1024 : index
    %292 = vector.load %arg5[%c0_108, %c1024_109] : memref<64x2944xbf16, #tpu.memory_space<vmem>>, vector<32x96xbf16>
    %cst_110 = arith.constant dense<0.000000e+00> : vector<16x96xf32>
    %293 = tpu.matmul %291, %292, %cst_110 {dimension_numbers = #tpu.dot_dimension_numbers<[1], [0], [0], [1], [0, 0, 1, 1], [], []>} : vector<16x32xbf16>, vector<32x96xbf16>, vector<16x96xf32> -> vector<16x96xf32>
    %c0_111 = arith.constant 0 : index
    %c2048 = arith.constant 2048 : index
    %294 = vector.load %arg6[%c0_111, %c2048] : memref<1x5504xf32, #tpu.memory_space<vmem>>, vector<1x96xf32>
    %295 = vector.broadcast %294 : vector<1x96xf32> to vector<16x96xf32>
    %296 = arith.addf %293, %295 : vector<16x96xf32>
    %297 = vector.extract_strided_slice %296 {offsets = [0, 0], sizes = [16, 32], strides = [1, 1]} : vector<16x96xf32> to vector<16x32xf32>
    %298 = vector.extract_strided_slice %296 {offsets = [0, 32], sizes = [16, 32], strides = [1, 1]} : vector<16x96xf32> to vector<16x32xf32>
    %299 = vector.extract_strided_slice %296 {offsets = [0, 64], sizes = [16, 32], strides = [1, 1]} : vector<16x96xf32> to vector<16x32xf32>
    %300 = arith.truncf %297 : vector<16x32xf32> to vector<16x32xbf16>
    %301 = arith.truncf %298 : vector<16x32xf32> to vector<16x32xbf16>
    %302 = arith.truncf %299 : vector<16x32xf32> to vector<16x32xbf16>
    %303 = vector.extract_strided_slice %300 {offsets = [0, 0], sizes = [16, 8], strides = [1, 1]} : vector<16x32xbf16> to vector<16x8xbf16>
    %304 = vector.extract_strided_slice %301 {offsets = [0, 0], sizes = [16, 8], strides = [1, 1]} : vector<16x32xbf16> to vector<16x8xbf16>
    %cst_112 = arith.constant dense<0.000000e+00> : vector<16x16xf32>
    %305 = tpu.matmul %303, %304, %cst_112 {dimension_numbers = #tpu.dot_dimension_numbers<[1], [1], [0], [0], [0, 0, 1, 0], [], []>} : vector<16x8xbf16>, vector<16x8xbf16>, vector<16x16xf32> -> vector<16x16xf32>
    %306 = vector.extract_strided_slice %300 {offsets = [0, 8], sizes = [16, 8], strides = [1, 1]} : vector<16x32xbf16> to vector<16x8xbf16>
    %307 = vector.extract_strided_slice %301 {offsets = [0, 8], sizes = [16, 8], strides = [1, 1]} : vector<16x32xbf16> to vector<16x8xbf16>
    %cst_113 = arith.constant dense<0.000000e+00> : vector<16x16xf32>
    %308 = tpu.matmul %306, %307, %cst_113 {dimension_numbers = #tpu.dot_dimension_numbers<[1], [1], [0], [0], [0, 0, 1, 0], [], []>} : vector<16x8xbf16>, vector<16x8xbf16>, vector<16x16xf32> -> vector<16x16xf32>
    %309 = vector.extract_strided_slice %300 {offsets = [0, 16], sizes = [16, 8], strides = [1, 1]} : vector<16x32xbf16> to vector<16x8xbf16>
    %310 = vector.extract_strided_slice %301 {offsets = [0, 16], sizes = [16, 8], strides = [1, 1]} : vector<16x32xbf16> to vector<16x8xbf16>
    %cst_114 = arith.constant dense<0.000000e+00> : vector<16x16xf32>
    %311 = tpu.matmul %309, %310, %cst_114 {dimension_numbers = #tpu.dot_dimension_numbers<[1], [1], [0], [0], [0, 0, 1, 0], [], []>} : vector<16x8xbf16>, vector<16x8xbf16>, vector<16x16xf32> -> vector<16x16xf32>
    %312 = vector.extract_strided_slice %300 {offsets = [0, 24], sizes = [16, 8], strides = [1, 1]} : vector<16x32xbf16> to vector<16x8xbf16>
    %313 = vector.extract_strided_slice %301 {offsets = [0, 24], sizes = [16, 8], strides = [1, 1]} : vector<16x32xbf16> to vector<16x8xbf16>
    %cst_115 = arith.constant dense<0.000000e+00> : vector<16x16xf32>
    %314 = tpu.matmul %312, %313, %cst_115 {dimension_numbers = #tpu.dot_dimension_numbers<[1], [1], [0], [0], [0, 0, 1, 0], [], []>} : vector<16x8xbf16>, vector<16x8xbf16>, vector<16x16xf32> -> vector<16x16xf32>
    %315 = vector.shape_cast %305 : vector<16x16xf32> to vector<1x16x16xf32>
    %316 = vector.shape_cast %308 : vector<16x16xf32> to vector<1x16x16xf32>
    %317 = vector.shape_cast %311 : vector<16x16xf32> to vector<1x16x16xf32>
    %318 = vector.shape_cast %314 : vector<16x16xf32> to vector<1x16x16xf32>
    %319 = tpu.concatenate %315, %316, %317, %318 in 0 : vector<1x16x16xf32>, vector<1x16x16xf32>, vector<1x16x16xf32>, vector<1x16x16xf32> -> vector<4x16x16xf32>
    %320 = vector.shape_cast %289 : vector<16x16xf32> to vector<1x16x16xf32>
    %321 = vector.broadcast %320 : vector<1x16x16xf32> to vector<4x16x16xf32>
    %322 = arith.addf %319, %321 : vector<4x16x16xf32>
    %cst_116 = arith.constant dense<0xFF800000> : vector<4x16xf32>
    %323 = vector.multi_reduction <maximumf>, %322, %cst_116 [2] : vector<4x16x16xf32> to vector<4x16xf32>
    %324 = vector.shape_cast %323 : vector<4x16xf32> to vector<4x16x1xf32>
    %325 = vector.broadcast %324 : vector<4x16x1xf32> to vector<4x16x16xf32>
    %326 = arith.subf %322, %325 : vector<4x16x16xf32>
    %327 = math.exp %326 : vector<4x16x16xf32>
    %cst_117 = arith.constant dense<0.000000e+00> : vector<4x16xf32>
    %328 = vector.multi_reduction <add>, %327, %cst_117 [2] : vector<4x16x16xf32> to vector<4x16xf32>
    %329 = vector.shape_cast %328 : vector<4x16xf32> to vector<4x16x1xf32>
    %cst_118 = arith.constant 1.000000e-30 : f32
    %330 = vector.broadcast %cst_118 : f32 to vector<4x16x1xf32>
    %331 = arith.addf %329, %330 : vector<4x16x1xf32>
    %332 = tpu.reciprocal %331 {approx = true} : vector<4x16x1xf32> -> vector<4x16x1xf32>
    %333 = vector.broadcast %332 : vector<4x16x1xf32> to vector<4x16x16xf32>
    %334 = arith.mulf %327, %333 : vector<4x16x16xf32>
    %335 = arith.truncf %334 : vector<4x16x16xf32> to vector<4x16x16xbf16>
    %c0_119 = arith.constant 0 : index
    %c2176 = arith.constant 2176 : index
    %336 = vector.load %arg6[%c0_119, %c2176] : memref<1x5504xf32, #tpu.memory_space<vmem>>, vector<1x32xf32>
    %337 = vector.extract_strided_slice %335 {offsets = [0, 0, 0], sizes = [1, 16, 16], strides = [1, 1, 1]} : vector<4x16x16xbf16> to vector<1x16x16xbf16>
    %338 = vector.shape_cast %337 : vector<1x16x16xbf16> to vector<16x16xbf16>
    %339 = vector.extract_strided_slice %302 {offsets = [0, 0], sizes = [16, 8], strides = [1, 1]} : vector<16x32xbf16> to vector<16x8xbf16>
    %cst_120 = arith.constant dense<0.000000e+00> : vector<16x8xf32>
    %340 = tpu.matmul %338, %339, %cst_120 {dimension_numbers = #tpu.dot_dimension_numbers<[1], [0], [0], [1], [0, 0, 1, 1], [], []>} : vector<16x16xbf16>, vector<16x8xbf16>, vector<16x8xf32> -> vector<16x8xf32>
    %341 = arith.truncf %340 : vector<16x8xf32> to vector<16x8xbf16>
    %c0_121 = arith.constant 0 : index
    %c1152_122 = arith.constant 1152 : index
    %342 = vector.load %arg5[%c0_121, %c1152_122] : memref<64x2944xbf16, #tpu.memory_space<vmem>>, vector<8x32xbf16>
    %cst_123 = arith.constant dense<0.000000e+00> : vector<16x32xf32>
    %343 = tpu.matmul %341, %342, %cst_123 {dimension_numbers = #tpu.dot_dimension_numbers<[1], [0], [0], [1], [0, 0, 1, 1], [], []>} : vector<16x8xbf16>, vector<8x32xbf16>, vector<16x32xf32> -> vector<16x32xf32>
    %344 = vector.broadcast %336 : vector<1x32xf32> to vector<16x32xf32>
    %345 = arith.addf %344, %343 : vector<16x32xf32>
    %346 = vector.extract_strided_slice %335 {offsets = [1, 0, 0], sizes = [1, 16, 16], strides = [1, 1, 1]} : vector<4x16x16xbf16> to vector<1x16x16xbf16>
    %347 = vector.shape_cast %346 : vector<1x16x16xbf16> to vector<16x16xbf16>
    %348 = vector.extract_strided_slice %302 {offsets = [0, 8], sizes = [16, 8], strides = [1, 1]} : vector<16x32xbf16> to vector<16x8xbf16>
    %cst_124 = arith.constant dense<0.000000e+00> : vector<16x8xf32>
    %349 = tpu.matmul %347, %348, %cst_124 {dimension_numbers = #tpu.dot_dimension_numbers<[1], [0], [0], [1], [0, 0, 1, 1], [], []>} : vector<16x16xbf16>, vector<16x8xbf16>, vector<16x8xf32> -> vector<16x8xf32>
    %350 = arith.truncf %349 : vector<16x8xf32> to vector<16x8xbf16>
    %c8_125 = arith.constant 8 : index
    %c1152_126 = arith.constant 1152 : index
    %351 = vector.load %arg5[%c8_125, %c1152_126] : memref<64x2944xbf16, #tpu.memory_space<vmem>>, vector<8x32xbf16>
    %cst_127 = arith.constant dense<0.000000e+00> : vector<16x32xf32>
    %352 = tpu.matmul %350, %351, %cst_127 {dimension_numbers = #tpu.dot_dimension_numbers<[1], [0], [0], [1], [0, 0, 1, 1], [], []>} : vector<16x8xbf16>, vector<8x32xbf16>, vector<16x32xf32> -> vector<16x32xf32>
    %353 = arith.addf %345, %352 : vector<16x32xf32>
    %354 = vector.extract_strided_slice %335 {offsets = [2, 0, 0], sizes = [1, 16, 16], strides = [1, 1, 1]} : vector<4x16x16xbf16> to vector<1x16x16xbf16>
    %355 = vector.shape_cast %354 : vector<1x16x16xbf16> to vector<16x16xbf16>
    %356 = vector.extract_strided_slice %302 {offsets = [0, 16], sizes = [16, 8], strides = [1, 1]} : vector<16x32xbf16> to vector<16x8xbf16>
    %cst_128 = arith.constant dense<0.000000e+00> : vector<16x8xf32>
    %357 = tpu.matmul %355, %356, %cst_128 {dimension_numbers = #tpu.dot_dimension_numbers<[1], [0], [0], [1], [0, 0, 1, 1], [], []>} : vector<16x16xbf16>, vector<16x8xbf16>, vector<16x8xf32> -> vector<16x8xf32>
    %358 = arith.truncf %357 : vector<16x8xf32> to vector<16x8xbf16>
    %c16_129 = arith.constant 16 : index
    %c1152_130 = arith.constant 1152 : index
    %359 = vector.load %arg5[%c16_129, %c1152_130] : memref<64x2944xbf16, #tpu.memory_space<vmem>>, vector<8x32xbf16>
    %cst_131 = arith.constant dense<0.000000e+00> : vector<16x32xf32>
    %360 = tpu.matmul %358, %359, %cst_131 {dimension_numbers = #tpu.dot_dimension_numbers<[1], [0], [0], [1], [0, 0, 1, 1], [], []>} : vector<16x8xbf16>, vector<8x32xbf16>, vector<16x32xf32> -> vector<16x32xf32>
    %361 = arith.addf %353, %360 : vector<16x32xf32>
    %362 = vector.extract_strided_slice %335 {offsets = [3, 0, 0], sizes = [1, 16, 16], strides = [1, 1, 1]} : vector<4x16x16xbf16> to vector<1x16x16xbf16>
    %363 = vector.shape_cast %362 : vector<1x16x16xbf16> to vector<16x16xbf16>
    %364 = vector.extract_strided_slice %302 {offsets = [0, 24], sizes = [16, 8], strides = [1, 1]} : vector<16x32xbf16> to vector<16x8xbf16>
    %cst_132 = arith.constant dense<0.000000e+00> : vector<16x8xf32>
    %365 = tpu.matmul %363, %364, %cst_132 {dimension_numbers = #tpu.dot_dimension_numbers<[1], [0], [0], [1], [0, 0, 1, 1], [], []>} : vector<16x16xbf16>, vector<16x8xbf16>, vector<16x8xf32> -> vector<16x8xf32>
    %366 = arith.truncf %365 : vector<16x8xf32> to vector<16x8xbf16>
    %c24_133 = arith.constant 24 : index
    %c1152_134 = arith.constant 1152 : index
    %367 = vector.load %arg5[%c24_133, %c1152_134] : memref<64x2944xbf16, #tpu.memory_space<vmem>>, vector<8x32xbf16>
    %cst_135 = arith.constant dense<0.000000e+00> : vector<16x32xf32>
    %368 = tpu.matmul %366, %367, %cst_135 {dimension_numbers = #tpu.dot_dimension_numbers<[1], [0], [0], [1], [0, 0, 1, 1], [], []>} : vector<16x8xbf16>, vector<8x32xbf16>, vector<16x32xf32> -> vector<16x32xf32>
    %369 = arith.addf %361, %368 : vector<16x32xf32>
    %370 = arith.addf %1, %369 : vector<16x32xf32>
    %cst_136 = arith.constant dense<0.000000e+00> : vector<16xf32>
    %371 = vector.multi_reduction <add>, %370, %cst_136 [1] : vector<16x32xf32> to vector<16xf32>
    %372 = vector.shape_cast %371 : vector<16xf32> to vector<16x1xf32>
    %cst_137 = arith.constant 3.200000e+01 : f32
    %373 = vector.broadcast %cst_137 : f32 to vector<16x1xf32>
    %374 = arith.divf %372, %373 : vector<16x1xf32>
    %375 = arith.mulf %370, %370 : vector<16x32xf32>
    %cst_138 = arith.constant dense<0.000000e+00> : vector<16xf32>
    %376 = vector.multi_reduction <add>, %375, %cst_138 [1] : vector<16x32xf32> to vector<16xf32>
    %377 = vector.shape_cast %376 : vector<16xf32> to vector<16x1xf32>
    %cst_139 = arith.constant 3.200000e+01 : f32
    %378 = vector.broadcast %cst_139 : f32 to vector<16x1xf32>
    %379 = arith.divf %377, %378 : vector<16x1xf32>
    %380 = arith.mulf %374, %374 : vector<16x1xf32>
    %381 = arith.subf %379, %380 : vector<16x1xf32>
    %382 = vector.broadcast %374 : vector<16x1xf32> to vector<16x32xf32>
    %383 = arith.subf %370, %382 : vector<16x32xf32>
    %cst_140 = arith.constant 9.99999974E-6 : f32
    %384 = vector.broadcast %cst_140 : f32 to vector<16x1xf32>
    %385 = arith.addf %381, %384 : vector<16x1xf32>
    %386 = math.rsqrt %385 : vector<16x1xf32>
    %387 = vector.broadcast %386 : vector<16x1xf32> to vector<16x32xf32>
    %388 = arith.mulf %383, %387 : vector<16x32xf32>
    %c0_141 = arith.constant 0 : index
    %c2944 = arith.constant 2944 : index
    %389 = vector.load %arg6[%c0_141, %c2944] : memref<1x5504xf32, #tpu.memory_space<vmem>>, vector<1x32xf32>
    %390 = vector.broadcast %389 : vector<1x32xf32> to vector<16x32xf32>
    %391 = arith.mulf %388, %390 : vector<16x32xf32>
    %c0_142 = arith.constant 0 : index
    %c3072 = arith.constant 3072 : index
    %392 = vector.load %arg6[%c0_142, %c3072] : memref<1x5504xf32, #tpu.memory_space<vmem>>, vector<1x32xf32>
    %393 = vector.broadcast %392 : vector<1x32xf32> to vector<16x32xf32>
    %394 = arith.addf %391, %393 : vector<16x32xf32>
    %395 = arith.truncf %394 : vector<16x32xf32> to vector<16x32xbf16>
    %c0_143 = arith.constant 0 : index
    %c1280_144 = arith.constant 1280 : index
    %396 = vector.load %arg5[%c0_143, %c1280_144] : memref<64x2944xbf16, #tpu.memory_space<vmem>>, vector<32x32xbf16>
    %cst_145 = arith.constant dense<0.000000e+00> : vector<16x32xf32>
    %397 = tpu.matmul %395, %396, %cst_145 {dimension_numbers = #tpu.dot_dimension_numbers<[1], [0], [0], [1], [0, 0, 1, 1], [], []>} : vector<16x32xbf16>, vector<32x32xbf16>, vector<16x32xf32> -> vector<16x32xf32>
    %c0_146 = arith.constant 0 : index
    %c2304 = arith.constant 2304 : index
    %398 = vector.load %arg6[%c0_146, %c2304] : memref<1x5504xf32, #tpu.memory_space<vmem>>, vector<1x32xf32>
    %399 = vector.broadcast %398 : vector<1x32xf32> to vector<16x32xf32>
    %400 = arith.addf %397, %399 : vector<16x32xf32>
    %401 = arith.truncf %288 : vector<16x32xf32> to vector<16x32xbf16>
    %c0_147 = arith.constant 0 : index
    %c1408_148 = arith.constant 1408 : index
    %402 = vector.load %arg5[%c0_147, %c1408_148] : memref<64x2944xbf16, #tpu.memory_space<vmem>>, vector<32x64xbf16>
    %cst_149 = arith.constant dense<0.000000e+00> : vector<16x64xf32>
    %403 = tpu.matmul %401, %402, %cst_149 {dimension_numbers = #tpu.dot_dimension_numbers<[1], [0], [0], [1], [0, 0, 1, 1], [], []>} : vector<16x32xbf16>, vector<32x64xbf16>, vector<16x64xf32> -> vector<16x64xf32>
    %c0_150 = arith.constant 0 : index
    %c2432 = arith.constant 2432 : index
    %404 = vector.load %arg6[%c0_150, %c2432] : memref<1x5504xf32, #tpu.memory_space<vmem>>, vector<1x64xf32>
    %405 = vector.broadcast %404 : vector<1x64xf32> to vector<16x64xf32>
    %406 = arith.addf %403, %405 : vector<16x64xf32>
    %407 = vector.extract_strided_slice %406 {offsets = [0, 0], sizes = [16, 32], strides = [1, 1]} : vector<16x64xf32> to vector<16x32xf32>
    %408 = vector.extract_strided_slice %406 {offsets = [0, 32], sizes = [16, 32], strides = [1, 1]} : vector<16x64xf32> to vector<16x32xf32>
    %409 = arith.truncf %400 : vector<16x32xf32> to vector<16x32xbf16>
    %410 = arith.truncf %407 : vector<16x32xf32> to vector<16x32xbf16>
    %411 = arith.truncf %408 : vector<16x32xf32> to vector<16x32xbf16>
    %412 = vector.extract_strided_slice %409 {offsets = [0, 0], sizes = [16, 8], strides = [1, 1]} : vector<16x32xbf16> to vector<16x8xbf16>
    %413 = vector.extract_strided_slice %410 {offsets = [0, 0], sizes = [16, 8], strides = [1, 1]} : vector<16x32xbf16> to vector<16x8xbf16>
    %cst_151 = arith.constant dense<0.000000e+00> : vector<16x16xf32>
    %414 = tpu.matmul %412, %413, %cst_151 {dimension_numbers = #tpu.dot_dimension_numbers<[1], [1], [0], [0], [0, 0, 1, 0], [], []>} : vector<16x8xbf16>, vector<16x8xbf16>, vector<16x16xf32> -> vector<16x16xf32>
    %415 = vector.extract_strided_slice %409 {offsets = [0, 8], sizes = [16, 8], strides = [1, 1]} : vector<16x32xbf16> to vector<16x8xbf16>
    %416 = vector.extract_strided_slice %410 {offsets = [0, 8], sizes = [16, 8], strides = [1, 1]} : vector<16x32xbf16> to vector<16x8xbf16>
    %cst_152 = arith.constant dense<0.000000e+00> : vector<16x16xf32>
    %417 = tpu.matmul %415, %416, %cst_152 {dimension_numbers = #tpu.dot_dimension_numbers<[1], [1], [0], [0], [0, 0, 1, 0], [], []>} : vector<16x8xbf16>, vector<16x8xbf16>, vector<16x16xf32> -> vector<16x16xf32>
    %418 = vector.extract_strided_slice %409 {offsets = [0, 16], sizes = [16, 8], strides = [1, 1]} : vector<16x32xbf16> to vector<16x8xbf16>
    %419 = vector.extract_strided_slice %410 {offsets = [0, 16], sizes = [16, 8], strides = [1, 1]} : vector<16x32xbf16> to vector<16x8xbf16>
    %cst_153 = arith.constant dense<0.000000e+00> : vector<16x16xf32>
    %420 = tpu.matmul %418, %419, %cst_153 {dimension_numbers = #tpu.dot_dimension_numbers<[1], [1], [0], [0], [0, 0, 1, 0], [], []>} : vector<16x8xbf16>, vector<16x8xbf16>, vector<16x16xf32> -> vector<16x16xf32>
    %421 = vector.extract_strided_slice %409 {offsets = [0, 24], sizes = [16, 8], strides = [1, 1]} : vector<16x32xbf16> to vector<16x8xbf16>
    %422 = vector.extract_strided_slice %410 {offsets = [0, 24], sizes = [16, 8], strides = [1, 1]} : vector<16x32xbf16> to vector<16x8xbf16>
    %cst_154 = arith.constant dense<0.000000e+00> : vector<16x16xf32>
    %423 = tpu.matmul %421, %422, %cst_154 {dimension_numbers = #tpu.dot_dimension_numbers<[1], [1], [0], [0], [0, 0, 1, 0], [], []>} : vector<16x8xbf16>, vector<16x8xbf16>, vector<16x16xf32> -> vector<16x16xf32>
    %424 = vector.shape_cast %414 : vector<16x16xf32> to vector<1x16x16xf32>
    %425 = vector.shape_cast %417 : vector<16x16xf32> to vector<1x16x16xf32>
    %426 = vector.shape_cast %420 : vector<16x16xf32> to vector<1x16x16xf32>
    %427 = vector.shape_cast %423 : vector<16x16xf32> to vector<1x16x16xf32>
    %428 = tpu.concatenate %424, %425, %426, %427 in 0 : vector<1x16x16xf32>, vector<1x16x16xf32>, vector<1x16x16xf32>, vector<1x16x16xf32> -> vector<4x16x16xf32>
    %429 = vector.shape_cast %290 : vector<16x16xf32> to vector<1x16x16xf32>
    %430 = vector.broadcast %429 : vector<1x16x16xf32> to vector<4x16x16xf32>
    %431 = arith.addf %428, %430 : vector<4x16x16xf32>
    %cst_155 = arith.constant dense<0xFF800000> : vector<4x16xf32>
    %432 = vector.multi_reduction <maximumf>, %431, %cst_155 [2] : vector<4x16x16xf32> to vector<4x16xf32>
    %433 = vector.shape_cast %432 : vector<4x16xf32> to vector<4x16x1xf32>
    %434 = vector.broadcast %433 : vector<4x16x1xf32> to vector<4x16x16xf32>
    %435 = arith.subf %431, %434 : vector<4x16x16xf32>
    %436 = math.exp %435 : vector<4x16x16xf32>
    %cst_156 = arith.constant dense<0.000000e+00> : vector<4x16xf32>
    %437 = vector.multi_reduction <add>, %436, %cst_156 [2] : vector<4x16x16xf32> to vector<4x16xf32>
    %438 = vector.shape_cast %437 : vector<4x16xf32> to vector<4x16x1xf32>
    %cst_157 = arith.constant 1.000000e-30 : f32
    %439 = vector.broadcast %cst_157 : f32 to vector<4x16x1xf32>
    %440 = arith.addf %438, %439 : vector<4x16x1xf32>
    %441 = tpu.reciprocal %440 {approx = true} : vector<4x16x1xf32> -> vector<4x16x1xf32>
    %442 = vector.broadcast %441 : vector<4x16x1xf32> to vector<4x16x16xf32>
    %443 = arith.mulf %436, %442 : vector<4x16x16xf32>
    %444 = arith.truncf %443 : vector<4x16x16xf32> to vector<4x16x16xbf16>
    %c0_158 = arith.constant 0 : index
    %c2560 = arith.constant 2560 : index
    %445 = vector.load %arg6[%c0_158, %c2560] : memref<1x5504xf32, #tpu.memory_space<vmem>>, vector<1x32xf32>
    %446 = vector.extract_strided_slice %444 {offsets = [0, 0, 0], sizes = [1, 16, 16], strides = [1, 1, 1]} : vector<4x16x16xbf16> to vector<1x16x16xbf16>
    %447 = vector.shape_cast %446 : vector<1x16x16xbf16> to vector<16x16xbf16>
    %448 = vector.extract_strided_slice %411 {offsets = [0, 0], sizes = [16, 8], strides = [1, 1]} : vector<16x32xbf16> to vector<16x8xbf16>
    %cst_159 = arith.constant dense<0.000000e+00> : vector<16x8xf32>
    %449 = tpu.matmul %447, %448, %cst_159 {dimension_numbers = #tpu.dot_dimension_numbers<[1], [0], [0], [1], [0, 0, 1, 1], [], []>} : vector<16x16xbf16>, vector<16x8xbf16>, vector<16x8xf32> -> vector<16x8xf32>
    %450 = arith.truncf %449 : vector<16x8xf32> to vector<16x8xbf16>
    %c0_160 = arith.constant 0 : index
    %c1536_161 = arith.constant 1536 : index
    %451 = vector.load %arg5[%c0_160, %c1536_161] : memref<64x2944xbf16, #tpu.memory_space<vmem>>, vector<8x32xbf16>
    %cst_162 = arith.constant dense<0.000000e+00> : vector<16x32xf32>
    %452 = tpu.matmul %450, %451, %cst_162 {dimension_numbers = #tpu.dot_dimension_numbers<[1], [0], [0], [1], [0, 0, 1, 1], [], []>} : vector<16x8xbf16>, vector<8x32xbf16>, vector<16x32xf32> -> vector<16x32xf32>
    %453 = vector.broadcast %445 : vector<1x32xf32> to vector<16x32xf32>
    %454 = arith.addf %453, %452 : vector<16x32xf32>
    %455 = vector.extract_strided_slice %444 {offsets = [1, 0, 0], sizes = [1, 16, 16], strides = [1, 1, 1]} : vector<4x16x16xbf16> to vector<1x16x16xbf16>
    %456 = vector.shape_cast %455 : vector<1x16x16xbf16> to vector<16x16xbf16>
    %457 = vector.extract_strided_slice %411 {offsets = [0, 8], sizes = [16, 8], strides = [1, 1]} : vector<16x32xbf16> to vector<16x8xbf16>
    %cst_163 = arith.constant dense<0.000000e+00> : vector<16x8xf32>
    %458 = tpu.matmul %456, %457, %cst_163 {dimension_numbers = #tpu.dot_dimension_numbers<[1], [0], [0], [1], [0, 0, 1, 1], [], []>} : vector<16x16xbf16>, vector<16x8xbf16>, vector<16x8xf32> -> vector<16x8xf32>
    %459 = arith.truncf %458 : vector<16x8xf32> to vector<16x8xbf16>
    %c8_164 = arith.constant 8 : index
    %c1536_165 = arith.constant 1536 : index
    %460 = vector.load %arg5[%c8_164, %c1536_165] : memref<64x2944xbf16, #tpu.memory_space<vmem>>, vector<8x32xbf16>
    %cst_166 = arith.constant dense<0.000000e+00> : vector<16x32xf32>
    %461 = tpu.matmul %459, %460, %cst_166 {dimension_numbers = #tpu.dot_dimension_numbers<[1], [0], [0], [1], [0, 0, 1, 1], [], []>} : vector<16x8xbf16>, vector<8x32xbf16>, vector<16x32xf32> -> vector<16x32xf32>
    %462 = arith.addf %454, %461 : vector<16x32xf32>
    %463 = vector.extract_strided_slice %444 {offsets = [2, 0, 0], sizes = [1, 16, 16], strides = [1, 1, 1]} : vector<4x16x16xbf16> to vector<1x16x16xbf16>
    %464 = vector.shape_cast %463 : vector<1x16x16xbf16> to vector<16x16xbf16>
    %465 = vector.extract_strided_slice %411 {offsets = [0, 16], sizes = [16, 8], strides = [1, 1]} : vector<16x32xbf16> to vector<16x8xbf16>
    %cst_167 = arith.constant dense<0.000000e+00> : vector<16x8xf32>
    %466 = tpu.matmul %464, %465, %cst_167 {dimension_numbers = #tpu.dot_dimension_numbers<[1], [0], [0], [1], [0, 0, 1, 1], [], []>} : vector<16x16xbf16>, vector<16x8xbf16>, vector<16x8xf32> -> vector<16x8xf32>
    %467 = arith.truncf %466 : vector<16x8xf32> to vector<16x8xbf16>
    %c16_168 = arith.constant 16 : index
    %c1536_169 = arith.constant 1536 : index
    %468 = vector.load %arg5[%c16_168, %c1536_169] : memref<64x2944xbf16, #tpu.memory_space<vmem>>, vector<8x32xbf16>
    %cst_170 = arith.constant dense<0.000000e+00> : vector<16x32xf32>
    %469 = tpu.matmul %467, %468, %cst_170 {dimension_numbers = #tpu.dot_dimension_numbers<[1], [0], [0], [1], [0, 0, 1, 1], [], []>} : vector<16x8xbf16>, vector<8x32xbf16>, vector<16x32xf32> -> vector<16x32xf32>
    %470 = arith.addf %462, %469 : vector<16x32xf32>
    %471 = vector.extract_strided_slice %444 {offsets = [3, 0, 0], sizes = [1, 16, 16], strides = [1, 1, 1]} : vector<4x16x16xbf16> to vector<1x16x16xbf16>
    %472 = vector.shape_cast %471 : vector<1x16x16xbf16> to vector<16x16xbf16>
    %473 = vector.extract_strided_slice %411 {offsets = [0, 24], sizes = [16, 8], strides = [1, 1]} : vector<16x32xbf16> to vector<16x8xbf16>
    %cst_171 = arith.constant dense<0.000000e+00> : vector<16x8xf32>
    %474 = tpu.matmul %472, %473, %cst_171 {dimension_numbers = #tpu.dot_dimension_numbers<[1], [0], [0], [1], [0, 0, 1, 1], [], []>} : vector<16x16xbf16>, vector<16x8xbf16>, vector<16x8xf32> -> vector<16x8xf32>
    %475 = arith.truncf %474 : vector<16x8xf32> to vector<16x8xbf16>
    %c24_172 = arith.constant 24 : index
    %c1536_173 = arith.constant 1536 : index
    %476 = vector.load %arg5[%c24_172, %c1536_173] : memref<64x2944xbf16, #tpu.memory_space<vmem>>, vector<8x32xbf16>
    %cst_174 = arith.constant dense<0.000000e+00> : vector<16x32xf32>
    %477 = tpu.matmul %475, %476, %cst_174 {dimension_numbers = #tpu.dot_dimension_numbers<[1], [0], [0], [1], [0, 0, 1, 1], [], []>} : vector<16x8xbf16>, vector<8x32xbf16>, vector<16x32xf32> -> vector<16x32xf32>
    %478 = arith.addf %470, %477 : vector<16x32xf32>
    %479 = arith.addf %394, %478 : vector<16x32xf32>
    %cst_175 = arith.constant dense<0.000000e+00> : vector<16xf32>
    %480 = vector.multi_reduction <add>, %479, %cst_175 [1] : vector<16x32xf32> to vector<16xf32>
    %481 = vector.shape_cast %480 : vector<16xf32> to vector<16x1xf32>
    %cst_176 = arith.constant 3.200000e+01 : f32
    %482 = vector.broadcast %cst_176 : f32 to vector<16x1xf32>
    %483 = arith.divf %481, %482 : vector<16x1xf32>
    %484 = arith.mulf %479, %479 : vector<16x32xf32>
    %cst_177 = arith.constant dense<0.000000e+00> : vector<16xf32>
    %485 = vector.multi_reduction <add>, %484, %cst_177 [1] : vector<16x32xf32> to vector<16xf32>
    %486 = vector.shape_cast %485 : vector<16xf32> to vector<16x1xf32>
    %cst_178 = arith.constant 3.200000e+01 : f32
    %487 = vector.broadcast %cst_178 : f32 to vector<16x1xf32>
    %488 = arith.divf %486, %487 : vector<16x1xf32>
    %489 = arith.mulf %483, %483 : vector<16x1xf32>
    %490 = arith.subf %488, %489 : vector<16x1xf32>
    %491 = vector.broadcast %483 : vector<16x1xf32> to vector<16x32xf32>
    %492 = arith.subf %479, %491 : vector<16x32xf32>
    %cst_179 = arith.constant 9.99999974E-6 : f32
    %493 = vector.broadcast %cst_179 : f32 to vector<16x1xf32>
    %494 = arith.addf %490, %493 : vector<16x1xf32>
    %495 = math.rsqrt %494 : vector<16x1xf32>
    %496 = vector.broadcast %495 : vector<16x1xf32> to vector<16x32xf32>
    %497 = arith.mulf %492, %496 : vector<16x32xf32>
    %c0_180 = arith.constant 0 : index
    %c3200 = arith.constant 3200 : index
    %498 = vector.load %arg6[%c0_180, %c3200] : memref<1x5504xf32, #tpu.memory_space<vmem>>, vector<1x32xf32>
    %499 = vector.broadcast %498 : vector<1x32xf32> to vector<16x32xf32>
    %500 = arith.mulf %497, %499 : vector<16x32xf32>
    %c0_181 = arith.constant 0 : index
    %c3328 = arith.constant 3328 : index
    %501 = vector.load %arg6[%c0_181, %c3328] : memref<1x5504xf32, #tpu.memory_space<vmem>>, vector<1x32xf32>
    %502 = vector.broadcast %501 : vector<1x32xf32> to vector<16x32xf32>
    %503 = arith.addf %500, %502 : vector<16x32xf32>
    %504 = arith.truncf %503 : vector<16x32xf32> to vector<16x32xbf16>
    %c0_182 = arith.constant 0 : index
    %c1664_183 = arith.constant 1664 : index
    %505 = vector.load %arg5[%c0_182, %c1664_183] : memref<64x2944xbf16, #tpu.memory_space<vmem>>, vector<32x64xbf16>
    %cst_184 = arith.constant dense<0.000000e+00> : vector<16x64xf32>
    %506 = tpu.matmul %504, %505, %cst_184 {dimension_numbers = #tpu.dot_dimension_numbers<[1], [0], [0], [1], [0, 0, 1, 1], [], []>} : vector<16x32xbf16>, vector<32x64xbf16>, vector<16x64xf32> -> vector<16x64xf32>
    %c0_185 = arith.constant 0 : index
    %c2688 = arith.constant 2688 : index
    %507 = vector.load %arg6[%c0_185, %c2688] : memref<1x5504xf32, #tpu.memory_space<vmem>>, vector<1x64xf32>
    %508 = vector.broadcast %507 : vector<1x64xf32> to vector<16x64xf32>
    %509 = arith.addf %506, %508 : vector<16x64xf32>
    %cst_186 = arith.constant 0.000000e+00 : f32
    %510 = vector.broadcast %cst_186 : f32 to vector<16x64xf32>
    %511 = arith.maximumf %509, %510 : vector<16x64xf32>
    %512 = arith.truncf %511 : vector<16x64xf32> to vector<16x64xbf16>
    %c0_187 = arith.constant 0 : index
    %c1792_188 = arith.constant 1792 : index
    %513 = vector.load %arg5[%c0_187, %c1792_188] : memref<64x2944xbf16, #tpu.memory_space<vmem>>, vector<64x32xbf16>
    %cst_189 = arith.constant dense<0.000000e+00> : vector<16x32xf32>
    %514 = tpu.matmul %512, %513, %cst_189 {dimension_numbers = #tpu.dot_dimension_numbers<[1], [0], [0], [1], [0, 0, 1, 1], [], []>} : vector<16x64xbf16>, vector<64x32xbf16>, vector<16x32xf32> -> vector<16x32xf32>
    %c0_190 = arith.constant 0 : index
    %c2816 = arith.constant 2816 : index
    %515 = vector.load %arg6[%c0_190, %c2816] : memref<1x5504xf32, #tpu.memory_space<vmem>>, vector<1x32xf32>
    %516 = vector.broadcast %515 : vector<1x32xf32> to vector<16x32xf32>
    %517 = arith.addf %514, %516 : vector<16x32xf32>
    %518 = arith.addf %503, %517 : vector<16x32xf32>
    %cst_191 = arith.constant dense<0.000000e+00> : vector<16xf32>
    %519 = vector.multi_reduction <add>, %518, %cst_191 [1] : vector<16x32xf32> to vector<16xf32>
    %520 = vector.shape_cast %519 : vector<16xf32> to vector<16x1xf32>
    %cst_192 = arith.constant 3.200000e+01 : f32
    %521 = vector.broadcast %cst_192 : f32 to vector<16x1xf32>
    %522 = arith.divf %520, %521 : vector<16x1xf32>
    %523 = arith.mulf %518, %518 : vector<16x32xf32>
    %cst_193 = arith.constant dense<0.000000e+00> : vector<16xf32>
    %524 = vector.multi_reduction <add>, %523, %cst_193 [1] : vector<16x32xf32> to vector<16xf32>
    %525 = vector.shape_cast %524 : vector<16xf32> to vector<16x1xf32>
    %cst_194 = arith.constant 3.200000e+01 : f32
    %526 = vector.broadcast %cst_194 : f32 to vector<16x1xf32>
    %527 = arith.divf %525, %526 : vector<16x1xf32>
    %528 = arith.mulf %522, %522 : vector<16x1xf32>
    %529 = arith.subf %527, %528 : vector<16x1xf32>
    %530 = vector.broadcast %522 : vector<16x1xf32> to vector<16x32xf32>
    %531 = arith.subf %518, %530 : vector<16x32xf32>
    %cst_195 = arith.constant 9.99999974E-6 : f32
    %532 = vector.broadcast %cst_195 : f32 to vector<16x1xf32>
    %533 = arith.addf %529, %532 : vector<16x1xf32>
    %534 = math.rsqrt %533 : vector<16x1xf32>
    %535 = vector.broadcast %534 : vector<16x1xf32> to vector<16x32xf32>
    %536 = arith.mulf %531, %535 : vector<16x32xf32>
    %c0_196 = arith.constant 0 : index
    %c3456 = arith.constant 3456 : index
    %537 = vector.load %arg6[%c0_196, %c3456] : memref<1x5504xf32, #tpu.memory_space<vmem>>, vector<1x32xf32>
    %538 = vector.broadcast %537 : vector<1x32xf32> to vector<16x32xf32>
    %539 = arith.mulf %536, %538 : vector<16x32xf32>
    %c0_197 = arith.constant 0 : index
    %c3584 = arith.constant 3584 : index
    %540 = vector.load %arg6[%c0_197, %c3584] : memref<1x5504xf32, #tpu.memory_space<vmem>>, vector<1x32xf32>
    %541 = vector.broadcast %540 : vector<1x32xf32> to vector<16x32xf32>
    %542 = arith.addf %539, %541 : vector<16x32xf32>
    %543 = arith.truncf %542 : vector<16x32xf32> to vector<16x32xbf16>
    %c0_198 = arith.constant 0 : index
    %c1920_199 = arith.constant 1920 : index
    %544 = vector.load %arg5[%c0_198, %c1920_199] : memref<64x2944xbf16, #tpu.memory_space<vmem>>, vector<32x96xbf16>
    %cst_200 = arith.constant dense<0.000000e+00> : vector<16x96xf32>
    %545 = tpu.matmul %543, %544, %cst_200 {dimension_numbers = #tpu.dot_dimension_numbers<[1], [0], [0], [1], [0, 0, 1, 1], [], []>} : vector<16x32xbf16>, vector<32x96xbf16>, vector<16x96xf32> -> vector<16x96xf32>
    %c0_201 = arith.constant 0 : index
    %c3712 = arith.constant 3712 : index
    %546 = vector.load %arg6[%c0_201, %c3712] : memref<1x5504xf32, #tpu.memory_space<vmem>>, vector<1x96xf32>
    %547 = vector.broadcast %546 : vector<1x96xf32> to vector<16x96xf32>
    %548 = arith.addf %545, %547 : vector<16x96xf32>
    %549 = vector.extract_strided_slice %548 {offsets = [0, 0], sizes = [16, 32], strides = [1, 1]} : vector<16x96xf32> to vector<16x32xf32>
    %550 = vector.extract_strided_slice %548 {offsets = [0, 32], sizes = [16, 32], strides = [1, 1]} : vector<16x96xf32> to vector<16x32xf32>
    %551 = vector.extract_strided_slice %548 {offsets = [0, 64], sizes = [16, 32], strides = [1, 1]} : vector<16x96xf32> to vector<16x32xf32>
    %552 = arith.truncf %549 : vector<16x32xf32> to vector<16x32xbf16>
    %553 = arith.truncf %550 : vector<16x32xf32> to vector<16x32xbf16>
    %554 = arith.truncf %551 : vector<16x32xf32> to vector<16x32xbf16>
    %555 = vector.extract_strided_slice %552 {offsets = [0, 0], sizes = [16, 8], strides = [1, 1]} : vector<16x32xbf16> to vector<16x8xbf16>
    %556 = vector.extract_strided_slice %553 {offsets = [0, 0], sizes = [16, 8], strides = [1, 1]} : vector<16x32xbf16> to vector<16x8xbf16>
    %cst_202 = arith.constant dense<0.000000e+00> : vector<16x16xf32>
    %557 = tpu.matmul %555, %556, %cst_202 {dimension_numbers = #tpu.dot_dimension_numbers<[1], [1], [0], [0], [0, 0, 1, 0], [], []>} : vector<16x8xbf16>, vector<16x8xbf16>, vector<16x16xf32> -> vector<16x16xf32>
    %558 = vector.extract_strided_slice %552 {offsets = [0, 8], sizes = [16, 8], strides = [1, 1]} : vector<16x32xbf16> to vector<16x8xbf16>
    %559 = vector.extract_strided_slice %553 {offsets = [0, 8], sizes = [16, 8], strides = [1, 1]} : vector<16x32xbf16> to vector<16x8xbf16>
    %cst_203 = arith.constant dense<0.000000e+00> : vector<16x16xf32>
    %560 = tpu.matmul %558, %559, %cst_203 {dimension_numbers = #tpu.dot_dimension_numbers<[1], [1], [0], [0], [0, 0, 1, 0], [], []>} : vector<16x8xbf16>, vector<16x8xbf16>, vector<16x16xf32> -> vector<16x16xf32>
    %561 = vector.extract_strided_slice %552 {offsets = [0, 16], sizes = [16, 8], strides = [1, 1]} : vector<16x32xbf16> to vector<16x8xbf16>
    %562 = vector.extract_strided_slice %553 {offsets = [0, 16], sizes = [16, 8], strides = [1, 1]} : vector<16x32xbf16> to vector<16x8xbf16>
    %cst_204 = arith.constant dense<0.000000e+00> : vector<16x16xf32>
    %563 = tpu.matmul %561, %562, %cst_204 {dimension_numbers = #tpu.dot_dimension_numbers<[1], [1], [0], [0], [0, 0, 1, 0], [], []>} : vector<16x8xbf16>, vector<16x8xbf16>, vector<16x16xf32> -> vector<16x16xf32>
    %564 = vector.extract_strided_slice %552 {offsets = [0, 24], sizes = [16, 8], strides = [1, 1]} : vector<16x32xbf16> to vector<16x8xbf16>
    %565 = vector.extract_strided_slice %553 {offsets = [0, 24], sizes = [16, 8], strides = [1, 1]} : vector<16x32xbf16> to vector<16x8xbf16>
    %cst_205 = arith.constant dense<0.000000e+00> : vector<16x16xf32>
    %566 = tpu.matmul %564, %565, %cst_205 {dimension_numbers = #tpu.dot_dimension_numbers<[1], [1], [0], [0], [0, 0, 1, 0], [], []>} : vector<16x8xbf16>, vector<16x8xbf16>, vector<16x16xf32> -> vector<16x16xf32>
    %567 = vector.shape_cast %557 : vector<16x16xf32> to vector<1x16x16xf32>
    %568 = vector.shape_cast %560 : vector<16x16xf32> to vector<1x16x16xf32>
    %569 = vector.shape_cast %563 : vector<16x16xf32> to vector<1x16x16xf32>
    %570 = vector.shape_cast %566 : vector<16x16xf32> to vector<1x16x16xf32>
    %571 = tpu.concatenate %567, %568, %569, %570 in 0 : vector<1x16x16xf32>, vector<1x16x16xf32>, vector<1x16x16xf32>, vector<1x16x16xf32> -> vector<4x16x16xf32>
    %572 = vector.shape_cast %289 : vector<16x16xf32> to vector<1x16x16xf32>
    %573 = vector.broadcast %572 : vector<1x16x16xf32> to vector<4x16x16xf32>
    %574 = arith.addf %571, %573 : vector<4x16x16xf32>
    %cst_206 = arith.constant dense<0xFF800000> : vector<4x16xf32>
    %575 = vector.multi_reduction <maximumf>, %574, %cst_206 [2] : vector<4x16x16xf32> to vector<4x16xf32>
    %576 = vector.shape_cast %575 : vector<4x16xf32> to vector<4x16x1xf32>
    %577 = vector.broadcast %576 : vector<4x16x1xf32> to vector<4x16x16xf32>
    %578 = arith.subf %574, %577 : vector<4x16x16xf32>
    %579 = math.exp %578 : vector<4x16x16xf32>
    %cst_207 = arith.constant dense<0.000000e+00> : vector<4x16xf32>
    %580 = vector.multi_reduction <add>, %579, %cst_207 [2] : vector<4x16x16xf32> to vector<4x16xf32>
    %581 = vector.shape_cast %580 : vector<4x16xf32> to vector<4x16x1xf32>
    %cst_208 = arith.constant 1.000000e-30 : f32
    %582 = vector.broadcast %cst_208 : f32 to vector<4x16x1xf32>
    %583 = arith.addf %581, %582 : vector<4x16x1xf32>
    %584 = tpu.reciprocal %583 {approx = true} : vector<4x16x1xf32> -> vector<4x16x1xf32>
    %585 = vector.broadcast %584 : vector<4x16x1xf32> to vector<4x16x16xf32>
    %586 = arith.mulf %579, %585 : vector<4x16x16xf32>
    %587 = arith.truncf %586 : vector<4x16x16xf32> to vector<4x16x16xbf16>
    %c0_209 = arith.constant 0 : index
    %c3840 = arith.constant 3840 : index
    %588 = vector.load %arg6[%c0_209, %c3840] : memref<1x5504xf32, #tpu.memory_space<vmem>>, vector<1x32xf32>
    %589 = vector.extract_strided_slice %587 {offsets = [0, 0, 0], sizes = [1, 16, 16], strides = [1, 1, 1]} : vector<4x16x16xbf16> to vector<1x16x16xbf16>
    %590 = vector.shape_cast %589 : vector<1x16x16xbf16> to vector<16x16xbf16>
    %591 = vector.extract_strided_slice %554 {offsets = [0, 0], sizes = [16, 8], strides = [1, 1]} : vector<16x32xbf16> to vector<16x8xbf16>
    %cst_210 = arith.constant dense<0.000000e+00> : vector<16x8xf32>
    %592 = tpu.matmul %590, %591, %cst_210 {dimension_numbers = #tpu.dot_dimension_numbers<[1], [0], [0], [1], [0, 0, 1, 1], [], []>} : vector<16x16xbf16>, vector<16x8xbf16>, vector<16x8xf32> -> vector<16x8xf32>
    %593 = arith.truncf %592 : vector<16x8xf32> to vector<16x8xbf16>
    %c0_211 = arith.constant 0 : index
    %c2048_212 = arith.constant 2048 : index
    %594 = vector.load %arg5[%c0_211, %c2048_212] : memref<64x2944xbf16, #tpu.memory_space<vmem>>, vector<8x32xbf16>
    %cst_213 = arith.constant dense<0.000000e+00> : vector<16x32xf32>
    %595 = tpu.matmul %593, %594, %cst_213 {dimension_numbers = #tpu.dot_dimension_numbers<[1], [0], [0], [1], [0, 0, 1, 1], [], []>} : vector<16x8xbf16>, vector<8x32xbf16>, vector<16x32xf32> -> vector<16x32xf32>
    %596 = vector.broadcast %588 : vector<1x32xf32> to vector<16x32xf32>
    %597 = arith.addf %596, %595 : vector<16x32xf32>
    %598 = vector.extract_strided_slice %587 {offsets = [1, 0, 0], sizes = [1, 16, 16], strides = [1, 1, 1]} : vector<4x16x16xbf16> to vector<1x16x16xbf16>
    %599 = vector.shape_cast %598 : vector<1x16x16xbf16> to vector<16x16xbf16>
    %600 = vector.extract_strided_slice %554 {offsets = [0, 8], sizes = [16, 8], strides = [1, 1]} : vector<16x32xbf16> to vector<16x8xbf16>
    %cst_214 = arith.constant dense<0.000000e+00> : vector<16x8xf32>
    %601 = tpu.matmul %599, %600, %cst_214 {dimension_numbers = #tpu.dot_dimension_numbers<[1], [0], [0], [1], [0, 0, 1, 1], [], []>} : vector<16x16xbf16>, vector<16x8xbf16>, vector<16x8xf32> -> vector<16x8xf32>
    %602 = arith.truncf %601 : vector<16x8xf32> to vector<16x8xbf16>
    %c8_215 = arith.constant 8 : index
    %c2048_216 = arith.constant 2048 : index
    %603 = vector.load %arg5[%c8_215, %c2048_216] : memref<64x2944xbf16, #tpu.memory_space<vmem>>, vector<8x32xbf16>
    %cst_217 = arith.constant dense<0.000000e+00> : vector<16x32xf32>
    %604 = tpu.matmul %602, %603, %cst_217 {dimension_numbers = #tpu.dot_dimension_numbers<[1], [0], [0], [1], [0, 0, 1, 1], [], []>} : vector<16x8xbf16>, vector<8x32xbf16>, vector<16x32xf32> -> vector<16x32xf32>
    %605 = arith.addf %597, %604 : vector<16x32xf32>
    %606 = vector.extract_strided_slice %587 {offsets = [2, 0, 0], sizes = [1, 16, 16], strides = [1, 1, 1]} : vector<4x16x16xbf16> to vector<1x16x16xbf16>
    %607 = vector.shape_cast %606 : vector<1x16x16xbf16> to vector<16x16xbf16>
    %608 = vector.extract_strided_slice %554 {offsets = [0, 16], sizes = [16, 8], strides = [1, 1]} : vector<16x32xbf16> to vector<16x8xbf16>
    %cst_218 = arith.constant dense<0.000000e+00> : vector<16x8xf32>
    %609 = tpu.matmul %607, %608, %cst_218 {dimension_numbers = #tpu.dot_dimension_numbers<[1], [0], [0], [1], [0, 0, 1, 1], [], []>} : vector<16x16xbf16>, vector<16x8xbf16>, vector<16x8xf32> -> vector<16x8xf32>
    %610 = arith.truncf %609 : vector<16x8xf32> to vector<16x8xbf16>
    %c16_219 = arith.constant 16 : index
    %c2048_220 = arith.constant 2048 : index
    %611 = vector.load %arg5[%c16_219, %c2048_220] : memref<64x2944xbf16, #tpu.memory_space<vmem>>, vector<8x32xbf16>
    %cst_221 = arith.constant dense<0.000000e+00> : vector<16x32xf32>
    %612 = tpu.matmul %610, %611, %cst_221 {dimension_numbers = #tpu.dot_dimension_numbers<[1], [0], [0], [1], [0, 0, 1, 1], [], []>} : vector<16x8xbf16>, vector<8x32xbf16>, vector<16x32xf32> -> vector<16x32xf32>
    %613 = arith.addf %605, %612 : vector<16x32xf32>
    %614 = vector.extract_strided_slice %587 {offsets = [3, 0, 0], sizes = [1, 16, 16], strides = [1, 1, 1]} : vector<4x16x16xbf16> to vector<1x16x16xbf16>
    %615 = vector.shape_cast %614 : vector<1x16x16xbf16> to vector<16x16xbf16>
    %616 = vector.extract_strided_slice %554 {offsets = [0, 24], sizes = [16, 8], strides = [1, 1]} : vector<16x32xbf16> to vector<16x8xbf16>
    %cst_222 = arith.constant dense<0.000000e+00> : vector<16x8xf32>
    %617 = tpu.matmul %615, %616, %cst_222 {dimension_numbers = #tpu.dot_dimension_numbers<[1], [0], [0], [1], [0, 0, 1, 1], [], []>} : vector<16x16xbf16>, vector<16x8xbf16>, vector<16x8xf32> -> vector<16x8xf32>
    %618 = arith.truncf %617 : vector<16x8xf32> to vector<16x8xbf16>
    %c24_223 = arith.constant 24 : index
    %c2048_224 = arith.constant 2048 : index
    %619 = vector.load %arg5[%c24_223, %c2048_224] : memref<64x2944xbf16, #tpu.memory_space<vmem>>, vector<8x32xbf16>
    %cst_225 = arith.constant dense<0.000000e+00> : vector<16x32xf32>
    %620 = tpu.matmul %618, %619, %cst_225 {dimension_numbers = #tpu.dot_dimension_numbers<[1], [0], [0], [1], [0, 0, 1, 1], [], []>} : vector<16x8xbf16>, vector<8x32xbf16>, vector<16x32xf32> -> vector<16x32xf32>
    %621 = arith.addf %613, %620 : vector<16x32xf32>
    %622 = arith.addf %542, %621 : vector<16x32xf32>
    %cst_226 = arith.constant dense<0.000000e+00> : vector<16xf32>
    %623 = vector.multi_reduction <add>, %622, %cst_226 [1] : vector<16x32xf32> to vector<16xf32>
    %624 = vector.shape_cast %623 : vector<16xf32> to vector<16x1xf32>
    %cst_227 = arith.constant 3.200000e+01 : f32
    %625 = vector.broadcast %cst_227 : f32 to vector<16x1xf32>
    %626 = arith.divf %624, %625 : vector<16x1xf32>
    %627 = arith.mulf %622, %622 : vector<16x32xf32>
    %cst_228 = arith.constant dense<0.000000e+00> : vector<16xf32>
    %628 = vector.multi_reduction <add>, %627, %cst_228 [1] : vector<16x32xf32> to vector<16xf32>
    %629 = vector.shape_cast %628 : vector<16xf32> to vector<16x1xf32>
    %cst_229 = arith.constant 3.200000e+01 : f32
    %630 = vector.broadcast %cst_229 : f32 to vector<16x1xf32>
    %631 = arith.divf %629, %630 : vector<16x1xf32>
    %632 = arith.mulf %626, %626 : vector<16x1xf32>
    %633 = arith.subf %631, %632 : vector<16x1xf32>
    %634 = vector.broadcast %626 : vector<16x1xf32> to vector<16x32xf32>
    %635 = arith.subf %622, %634 : vector<16x32xf32>
    %cst_230 = arith.constant 9.99999974E-6 : f32
    %636 = vector.broadcast %cst_230 : f32 to vector<16x1xf32>
    %637 = arith.addf %633, %636 : vector<16x1xf32>
    %638 = math.rsqrt %637 : vector<16x1xf32>
    %639 = vector.broadcast %638 : vector<16x1xf32> to vector<16x32xf32>
    %640 = arith.mulf %635, %639 : vector<16x32xf32>
    %c0_231 = arith.constant 0 : index
    %c4608 = arith.constant 4608 : index
    %641 = vector.load %arg6[%c0_231, %c4608] : memref<1x5504xf32, #tpu.memory_space<vmem>>, vector<1x32xf32>
    %642 = vector.broadcast %641 : vector<1x32xf32> to vector<16x32xf32>
    %643 = arith.mulf %640, %642 : vector<16x32xf32>
    %c0_232 = arith.constant 0 : index
    %c4736 = arith.constant 4736 : index
    %644 = vector.load %arg6[%c0_232, %c4736] : memref<1x5504xf32, #tpu.memory_space<vmem>>, vector<1x32xf32>
    %645 = vector.broadcast %644 : vector<1x32xf32> to vector<16x32xf32>
    %646 = arith.addf %643, %645 : vector<16x32xf32>
    %647 = arith.truncf %646 : vector<16x32xf32> to vector<16x32xbf16>
    %c0_233 = arith.constant 0 : index
    %c2176_234 = arith.constant 2176 : index
    %648 = vector.load %arg5[%c0_233, %c2176_234] : memref<64x2944xbf16, #tpu.memory_space<vmem>>, vector<32x32xbf16>
    %cst_235 = arith.constant dense<0.000000e+00> : vector<16x32xf32>
    %649 = tpu.matmul %647, %648, %cst_235 {dimension_numbers = #tpu.dot_dimension_numbers<[1], [0], [0], [1], [0, 0, 1, 1], [], []>} : vector<16x32xbf16>, vector<32x32xbf16>, vector<16x32xf32> -> vector<16x32xf32>
    %c0_236 = arith.constant 0 : index
    %c3968 = arith.constant 3968 : index
    %650 = vector.load %arg6[%c0_236, %c3968] : memref<1x5504xf32, #tpu.memory_space<vmem>>, vector<1x32xf32>
    %651 = vector.broadcast %650 : vector<1x32xf32> to vector<16x32xf32>
    %652 = arith.addf %649, %651 : vector<16x32xf32>
    %653 = arith.truncf %288 : vector<16x32xf32> to vector<16x32xbf16>
    %c0_237 = arith.constant 0 : index
    %c2304_238 = arith.constant 2304 : index
    %654 = vector.load %arg5[%c0_237, %c2304_238] : memref<64x2944xbf16, #tpu.memory_space<vmem>>, vector<32x64xbf16>
    %cst_239 = arith.constant dense<0.000000e+00> : vector<16x64xf32>
    %655 = tpu.matmul %653, %654, %cst_239 {dimension_numbers = #tpu.dot_dimension_numbers<[1], [0], [0], [1], [0, 0, 1, 1], [], []>} : vector<16x32xbf16>, vector<32x64xbf16>, vector<16x64xf32> -> vector<16x64xf32>
    %c0_240 = arith.constant 0 : index
    %c4096 = arith.constant 4096 : index
    %656 = vector.load %arg6[%c0_240, %c4096] : memref<1x5504xf32, #tpu.memory_space<vmem>>, vector<1x64xf32>
    %657 = vector.broadcast %656 : vector<1x64xf32> to vector<16x64xf32>
    %658 = arith.addf %655, %657 : vector<16x64xf32>
    %659 = vector.extract_strided_slice %658 {offsets = [0, 0], sizes = [16, 32], strides = [1, 1]} : vector<16x64xf32> to vector<16x32xf32>
    %660 = vector.extract_strided_slice %658 {offsets = [0, 32], sizes = [16, 32], strides = [1, 1]} : vector<16x64xf32> to vector<16x32xf32>
    %661 = arith.truncf %652 : vector<16x32xf32> to vector<16x32xbf16>
    %662 = arith.truncf %659 : vector<16x32xf32> to vector<16x32xbf16>
    %663 = arith.truncf %660 : vector<16x32xf32> to vector<16x32xbf16>
    %664 = vector.extract_strided_slice %661 {offsets = [0, 0], sizes = [16, 8], strides = [1, 1]} : vector<16x32xbf16> to vector<16x8xbf16>
    %665 = vector.extract_strided_slice %662 {offsets = [0, 0], sizes = [16, 8], strides = [1, 1]} : vector<16x32xbf16> to vector<16x8xbf16>
    %cst_241 = arith.constant dense<0.000000e+00> : vector<16x16xf32>
    %666 = tpu.matmul %664, %665, %cst_241 {dimension_numbers = #tpu.dot_dimension_numbers<[1], [1], [0], [0], [0, 0, 1, 0], [], []>} : vector<16x8xbf16>, vector<16x8xbf16>, vector<16x16xf32> -> vector<16x16xf32>
    %667 = vector.extract_strided_slice %661 {offsets = [0, 8], sizes = [16, 8], strides = [1, 1]} : vector<16x32xbf16> to vector<16x8xbf16>
    %668 = vector.extract_strided_slice %662 {offsets = [0, 8], sizes = [16, 8], strides = [1, 1]} : vector<16x32xbf16> to vector<16x8xbf16>
    %cst_242 = arith.constant dense<0.000000e+00> : vector<16x16xf32>
    %669 = tpu.matmul %667, %668, %cst_242 {dimension_numbers = #tpu.dot_dimension_numbers<[1], [1], [0], [0], [0, 0, 1, 0], [], []>} : vector<16x8xbf16>, vector<16x8xbf16>, vector<16x16xf32> -> vector<16x16xf32>
    %670 = vector.extract_strided_slice %661 {offsets = [0, 16], sizes = [16, 8], strides = [1, 1]} : vector<16x32xbf16> to vector<16x8xbf16>
    %671 = vector.extract_strided_slice %662 {offsets = [0, 16], sizes = [16, 8], strides = [1, 1]} : vector<16x32xbf16> to vector<16x8xbf16>
    %cst_243 = arith.constant dense<0.000000e+00> : vector<16x16xf32>
    %672 = tpu.matmul %670, %671, %cst_243 {dimension_numbers = #tpu.dot_dimension_numbers<[1], [1], [0], [0], [0, 0, 1, 0], [], []>} : vector<16x8xbf16>, vector<16x8xbf16>, vector<16x16xf32> -> vector<16x16xf32>
    %673 = vector.extract_strided_slice %661 {offsets = [0, 24], sizes = [16, 8], strides = [1, 1]} : vector<16x32xbf16> to vector<16x8xbf16>
    %674 = vector.extract_strided_slice %662 {offsets = [0, 24], sizes = [16, 8], strides = [1, 1]} : vector<16x32xbf16> to vector<16x8xbf16>
    %cst_244 = arith.constant dense<0.000000e+00> : vector<16x16xf32>
    %675 = tpu.matmul %673, %674, %cst_244 {dimension_numbers = #tpu.dot_dimension_numbers<[1], [1], [0], [0], [0, 0, 1, 0], [], []>} : vector<16x8xbf16>, vector<16x8xbf16>, vector<16x16xf32> -> vector<16x16xf32>
    %676 = vector.shape_cast %666 : vector<16x16xf32> to vector<1x16x16xf32>
    %677 = vector.shape_cast %669 : vector<16x16xf32> to vector<1x16x16xf32>
    %678 = vector.shape_cast %672 : vector<16x16xf32> to vector<1x16x16xf32>
    %679 = vector.shape_cast %675 : vector<16x16xf32> to vector<1x16x16xf32>
    %680 = tpu.concatenate %676, %677, %678, %679 in 0 : vector<1x16x16xf32>, vector<1x16x16xf32>, vector<1x16x16xf32>, vector<1x16x16xf32> -> vector<4x16x16xf32>
    %681 = vector.shape_cast %290 : vector<16x16xf32> to vector<1x16x16xf32>
    %682 = vector.broadcast %681 : vector<1x16x16xf32> to vector<4x16x16xf32>
    %683 = arith.addf %680, %682 : vector<4x16x16xf32>
    %cst_245 = arith.constant dense<0xFF800000> : vector<4x16xf32>
    %684 = vector.multi_reduction <maximumf>, %683, %cst_245 [2] : vector<4x16x16xf32> to vector<4x16xf32>
    %685 = vector.shape_cast %684 : vector<4x16xf32> to vector<4x16x1xf32>
    %686 = vector.broadcast %685 : vector<4x16x1xf32> to vector<4x16x16xf32>
    %687 = arith.subf %683, %686 : vector<4x16x16xf32>
    %688 = math.exp %687 : vector<4x16x16xf32>
    %cst_246 = arith.constant dense<0.000000e+00> : vector<4x16xf32>
    %689 = vector.multi_reduction <add>, %688, %cst_246 [2] : vector<4x16x16xf32> to vector<4x16xf32>
    %690 = vector.shape_cast %689 : vector<4x16xf32> to vector<4x16x1xf32>
    %cst_247 = arith.constant 1.000000e-30 : f32
    %691 = vector.broadcast %cst_247 : f32 to vector<4x16x1xf32>
    %692 = arith.addf %690, %691 : vector<4x16x1xf32>
    %693 = tpu.reciprocal %692 {approx = true} : vector<4x16x1xf32> -> vector<4x16x1xf32>
    %694 = vector.broadcast %693 : vector<4x16x1xf32> to vector<4x16x16xf32>
    %695 = arith.mulf %688, %694 : vector<4x16x16xf32>
    %696 = arith.truncf %695 : vector<4x16x16xf32> to vector<4x16x16xbf16>
    %c0_248 = arith.constant 0 : index
    %c4224 = arith.constant 4224 : index
    %697 = vector.load %arg6[%c0_248, %c4224] : memref<1x5504xf32, #tpu.memory_space<vmem>>, vector<1x32xf32>
    %698 = vector.extract_strided_slice %696 {offsets = [0, 0, 0], sizes = [1, 16, 16], strides = [1, 1, 1]} : vector<4x16x16xbf16> to vector<1x16x16xbf16>
    %699 = vector.shape_cast %698 : vector<1x16x16xbf16> to vector<16x16xbf16>
    %700 = vector.extract_strided_slice %663 {offsets = [0, 0], sizes = [16, 8], strides = [1, 1]} : vector<16x32xbf16> to vector<16x8xbf16>
    %cst_249 = arith.constant dense<0.000000e+00> : vector<16x8xf32>
    %701 = tpu.matmul %699, %700, %cst_249 {dimension_numbers = #tpu.dot_dimension_numbers<[1], [0], [0], [1], [0, 0, 1, 1], [], []>} : vector<16x16xbf16>, vector<16x8xbf16>, vector<16x8xf32> -> vector<16x8xf32>
    %702 = arith.truncf %701 : vector<16x8xf32> to vector<16x8xbf16>
    %c0_250 = arith.constant 0 : index
    %c2432_251 = arith.constant 2432 : index
    %703 = vector.load %arg5[%c0_250, %c2432_251] : memref<64x2944xbf16, #tpu.memory_space<vmem>>, vector<8x32xbf16>
    %cst_252 = arith.constant dense<0.000000e+00> : vector<16x32xf32>
    %704 = tpu.matmul %702, %703, %cst_252 {dimension_numbers = #tpu.dot_dimension_numbers<[1], [0], [0], [1], [0, 0, 1, 1], [], []>} : vector<16x8xbf16>, vector<8x32xbf16>, vector<16x32xf32> -> vector<16x32xf32>
    %705 = vector.broadcast %697 : vector<1x32xf32> to vector<16x32xf32>
    %706 = arith.addf %705, %704 : vector<16x32xf32>
    %707 = vector.extract_strided_slice %696 {offsets = [1, 0, 0], sizes = [1, 16, 16], strides = [1, 1, 1]} : vector<4x16x16xbf16> to vector<1x16x16xbf16>
    %708 = vector.shape_cast %707 : vector<1x16x16xbf16> to vector<16x16xbf16>
    %709 = vector.extract_strided_slice %663 {offsets = [0, 8], sizes = [16, 8], strides = [1, 1]} : vector<16x32xbf16> to vector<16x8xbf16>
    %cst_253 = arith.constant dense<0.000000e+00> : vector<16x8xf32>
    %710 = tpu.matmul %708, %709, %cst_253 {dimension_numbers = #tpu.dot_dimension_numbers<[1], [0], [0], [1], [0, 0, 1, 1], [], []>} : vector<16x16xbf16>, vector<16x8xbf16>, vector<16x8xf32> -> vector<16x8xf32>
    %711 = arith.truncf %710 : vector<16x8xf32> to vector<16x8xbf16>
    %c8_254 = arith.constant 8 : index
    %c2432_255 = arith.constant 2432 : index
    %712 = vector.load %arg5[%c8_254, %c2432_255] : memref<64x2944xbf16, #tpu.memory_space<vmem>>, vector<8x32xbf16>
    %cst_256 = arith.constant dense<0.000000e+00> : vector<16x32xf32>
    %713 = tpu.matmul %711, %712, %cst_256 {dimension_numbers = #tpu.dot_dimension_numbers<[1], [0], [0], [1], [0, 0, 1, 1], [], []>} : vector<16x8xbf16>, vector<8x32xbf16>, vector<16x32xf32> -> vector<16x32xf32>
    %714 = arith.addf %706, %713 : vector<16x32xf32>
    %715 = vector.extract_strided_slice %696 {offsets = [2, 0, 0], sizes = [1, 16, 16], strides = [1, 1, 1]} : vector<4x16x16xbf16> to vector<1x16x16xbf16>
    %716 = vector.shape_cast %715 : vector<1x16x16xbf16> to vector<16x16xbf16>
    %717 = vector.extract_strided_slice %663 {offsets = [0, 16], sizes = [16, 8], strides = [1, 1]} : vector<16x32xbf16> to vector<16x8xbf16>
    %cst_257 = arith.constant dense<0.000000e+00> : vector<16x8xf32>
    %718 = tpu.matmul %716, %717, %cst_257 {dimension_numbers = #tpu.dot_dimension_numbers<[1], [0], [0], [1], [0, 0, 1, 1], [], []>} : vector<16x16xbf16>, vector<16x8xbf16>, vector<16x8xf32> -> vector<16x8xf32>
    %719 = arith.truncf %718 : vector<16x8xf32> to vector<16x8xbf16>
    %c16_258 = arith.constant 16 : index
    %c2432_259 = arith.constant 2432 : index
    %720 = vector.load %arg5[%c16_258, %c2432_259] : memref<64x2944xbf16, #tpu.memory_space<vmem>>, vector<8x32xbf16>
    %cst_260 = arith.constant dense<0.000000e+00> : vector<16x32xf32>
    %721 = tpu.matmul %719, %720, %cst_260 {dimension_numbers = #tpu.dot_dimension_numbers<[1], [0], [0], [1], [0, 0, 1, 1], [], []>} : vector<16x8xbf16>, vector<8x32xbf16>, vector<16x32xf32> -> vector<16x32xf32>
    %722 = arith.addf %714, %721 : vector<16x32xf32>
    %723 = vector.extract_strided_slice %696 {offsets = [3, 0, 0], sizes = [1, 16, 16], strides = [1, 1, 1]} : vector<4x16x16xbf16> to vector<1x16x16xbf16>
    %724 = vector.shape_cast %723 : vector<1x16x16xbf16> to vector<16x16xbf16>
    %725 = vector.extract_strided_slice %663 {offsets = [0, 24], sizes = [16, 8], strides = [1, 1]} : vector<16x32xbf16> to vector<16x8xbf16>
    %cst_261 = arith.constant dense<0.000000e+00> : vector<16x8xf32>
    %726 = tpu.matmul %724, %725, %cst_261 {dimension_numbers = #tpu.dot_dimension_numbers<[1], [0], [0], [1], [0, 0, 1, 1], [], []>} : vector<16x16xbf16>, vector<16x8xbf16>, vector<16x8xf32> -> vector<16x8xf32>
    %727 = arith.truncf %726 : vector<16x8xf32> to vector<16x8xbf16>
    %c24_262 = arith.constant 24 : index
    %c2432_263 = arith.constant 2432 : index
    %728 = vector.load %arg5[%c24_262, %c2432_263] : memref<64x2944xbf16, #tpu.memory_space<vmem>>, vector<8x32xbf16>
    %cst_264 = arith.constant dense<0.000000e+00> : vector<16x32xf32>
    %729 = tpu.matmul %727, %728, %cst_264 {dimension_numbers = #tpu.dot_dimension_numbers<[1], [0], [0], [1], [0, 0, 1, 1], [], []>} : vector<16x8xbf16>, vector<8x32xbf16>, vector<16x32xf32> -> vector<16x32xf32>
    %730 = arith.addf %722, %729 : vector<16x32xf32>
    %731 = arith.addf %646, %730 : vector<16x32xf32>
    %cst_265 = arith.constant dense<0.000000e+00> : vector<16xf32>
    %732 = vector.multi_reduction <add>, %731, %cst_265 [1] : vector<16x32xf32> to vector<16xf32>
    %733 = vector.shape_cast %732 : vector<16xf32> to vector<16x1xf32>
    %cst_266 = arith.constant 3.200000e+01 : f32
    %734 = vector.broadcast %cst_266 : f32 to vector<16x1xf32>
    %735 = arith.divf %733, %734 : vector<16x1xf32>
    %736 = arith.mulf %731, %731 : vector<16x32xf32>
    %cst_267 = arith.constant dense<0.000000e+00> : vector<16xf32>
    %737 = vector.multi_reduction <add>, %736, %cst_267 [1] : vector<16x32xf32> to vector<16xf32>
    %738 = vector.shape_cast %737 : vector<16xf32> to vector<16x1xf32>
    %cst_268 = arith.constant 3.200000e+01 : f32
    %739 = vector.broadcast %cst_268 : f32 to vector<16x1xf32>
    %740 = arith.divf %738, %739 : vector<16x1xf32>
    %741 = arith.mulf %735, %735 : vector<16x1xf32>
    %742 = arith.subf %740, %741 : vector<16x1xf32>
    %743 = vector.broadcast %735 : vector<16x1xf32> to vector<16x32xf32>
    %744 = arith.subf %731, %743 : vector<16x32xf32>
    %cst_269 = arith.constant 9.99999974E-6 : f32
    %745 = vector.broadcast %cst_269 : f32 to vector<16x1xf32>
    %746 = arith.addf %742, %745 : vector<16x1xf32>
    %747 = math.rsqrt %746 : vector<16x1xf32>
    %748 = vector.broadcast %747 : vector<16x1xf32> to vector<16x32xf32>
    %749 = arith.mulf %744, %748 : vector<16x32xf32>
    %c0_270 = arith.constant 0 : index
    %c4864 = arith.constant 4864 : index
    %750 = vector.load %arg6[%c0_270, %c4864] : memref<1x5504xf32, #tpu.memory_space<vmem>>, vector<1x32xf32>
    %751 = vector.broadcast %750 : vector<1x32xf32> to vector<16x32xf32>
    %752 = arith.mulf %749, %751 : vector<16x32xf32>
    %c0_271 = arith.constant 0 : index
    %c4992 = arith.constant 4992 : index
    %753 = vector.load %arg6[%c0_271, %c4992] : memref<1x5504xf32, #tpu.memory_space<vmem>>, vector<1x32xf32>
    %754 = vector.broadcast %753 : vector<1x32xf32> to vector<16x32xf32>
    %755 = arith.addf %752, %754 : vector<16x32xf32>
    %756 = arith.truncf %755 : vector<16x32xf32> to vector<16x32xbf16>
    %c0_272 = arith.constant 0 : index
    %c2560_273 = arith.constant 2560 : index
    %757 = vector.load %arg5[%c0_272, %c2560_273] : memref<64x2944xbf16, #tpu.memory_space<vmem>>, vector<32x64xbf16>
    %cst_274 = arith.constant dense<0.000000e+00> : vector<16x64xf32>
    %758 = tpu.matmul %756, %757, %cst_274 {dimension_numbers = #tpu.dot_dimension_numbers<[1], [0], [0], [1], [0, 0, 1, 1], [], []>} : vector<16x32xbf16>, vector<32x64xbf16>, vector<16x64xf32> -> vector<16x64xf32>
    %c0_275 = arith.constant 0 : index
    %c4352 = arith.constant 4352 : index
    %759 = vector.load %arg6[%c0_275, %c4352] : memref<1x5504xf32, #tpu.memory_space<vmem>>, vector<1x64xf32>
    %760 = vector.broadcast %759 : vector<1x64xf32> to vector<16x64xf32>
    %761 = arith.addf %758, %760 : vector<16x64xf32>
    %cst_276 = arith.constant 0.000000e+00 : f32
    %762 = vector.broadcast %cst_276 : f32 to vector<16x64xf32>
    %763 = arith.maximumf %761, %762 : vector<16x64xf32>
    %764 = arith.truncf %763 : vector<16x64xf32> to vector<16x64xbf16>
    %c0_277 = arith.constant 0 : index
    %c2688_278 = arith.constant 2688 : index
    %765 = vector.load %arg5[%c0_277, %c2688_278] : memref<64x2944xbf16, #tpu.memory_space<vmem>>, vector<64x32xbf16>
    %cst_279 = arith.constant dense<0.000000e+00> : vector<16x32xf32>
    %766 = tpu.matmul %764, %765, %cst_279 {dimension_numbers = #tpu.dot_dimension_numbers<[1], [0], [0], [1], [0, 0, 1, 1], [], []>} : vector<16x64xbf16>, vector<64x32xbf16>, vector<16x32xf32> -> vector<16x32xf32>
    %c0_280 = arith.constant 0 : index
    %c4480 = arith.constant 4480 : index
    %767 = vector.load %arg6[%c0_280, %c4480] : memref<1x5504xf32, #tpu.memory_space<vmem>>, vector<1x32xf32>
    %768 = vector.broadcast %767 : vector<1x32xf32> to vector<16x32xf32>
    %769 = arith.addf %766, %768 : vector<16x32xf32>
    %770 = arith.addf %755, %769 : vector<16x32xf32>
    %cst_281 = arith.constant dense<0.000000e+00> : vector<16xf32>
    %771 = vector.multi_reduction <add>, %770, %cst_281 [1] : vector<16x32xf32> to vector<16xf32>
    %772 = vector.shape_cast %771 : vector<16xf32> to vector<16x1xf32>
    %cst_282 = arith.constant 3.200000e+01 : f32
    %773 = vector.broadcast %cst_282 : f32 to vector<16x1xf32>
    %774 = arith.divf %772, %773 : vector<16x1xf32>
    %775 = arith.mulf %770, %770 : vector<16x32xf32>
    %cst_283 = arith.constant dense<0.000000e+00> : vector<16xf32>
    %776 = vector.multi_reduction <add>, %775, %cst_283 [1] : vector<16x32xf32> to vector<16xf32>
    %777 = vector.shape_cast %776 : vector<16xf32> to vector<16x1xf32>
    %cst_284 = arith.constant 3.200000e+01 : f32
    %778 = vector.broadcast %cst_284 : f32 to vector<16x1xf32>
    %779 = arith.divf %777, %778 : vector<16x1xf32>
    %780 = arith.mulf %774, %774 : vector<16x1xf32>
    %781 = arith.subf %779, %780 : vector<16x1xf32>
    %782 = vector.broadcast %774 : vector<16x1xf32> to vector<16x32xf32>
    %783 = arith.subf %770, %782 : vector<16x32xf32>
    %cst_285 = arith.constant 9.99999974E-6 : f32
    %784 = vector.broadcast %cst_285 : f32 to vector<16x1xf32>
    %785 = arith.addf %781, %784 : vector<16x1xf32>
    %786 = math.rsqrt %785 : vector<16x1xf32>
    %787 = vector.broadcast %786 : vector<16x1xf32> to vector<16x32xf32>
    %788 = arith.mulf %783, %787 : vector<16x32xf32>
    %c0_286 = arith.constant 0 : index
    %c5120 = arith.constant 5120 : index
    %789 = vector.load %arg6[%c0_286, %c5120] : memref<1x5504xf32, #tpu.memory_space<vmem>>, vector<1x32xf32>
    %790 = vector.broadcast %789 : vector<1x32xf32> to vector<16x32xf32>
    %791 = arith.mulf %788, %790 : vector<16x32xf32>
    %c0_287 = arith.constant 0 : index
    %c5248 = arith.constant 5248 : index
    %792 = vector.load %arg6[%c0_287, %c5248] : memref<1x5504xf32, #tpu.memory_space<vmem>>, vector<1x32xf32>
    %793 = vector.broadcast %792 : vector<1x32xf32> to vector<16x32xf32>
    %794 = arith.addf %791, %793 : vector<16x32xf32>
    %795 = arith.truncf %794 : vector<16x32xf32> to vector<16x32xbf16>
    %c0_288 = arith.constant 0 : index
    %c2816_289 = arith.constant 2816 : index
    %796 = vector.load %arg5[%c0_288, %c2816_289] : memref<64x2944xbf16, #tpu.memory_space<vmem>>, vector<32x128xbf16>
    %cst_290 = arith.constant dense<0.000000e+00> : vector<16x128xf32>
    %797 = tpu.matmul %795, %796, %cst_290 {dimension_numbers = #tpu.dot_dimension_numbers<[1], [0], [0], [1], [0, 0, 1, 1], [], []>} : vector<16x32xbf16>, vector<32x128xbf16>, vector<16x128xf32> -> vector<16x128xf32>
    %c0_291 = arith.constant 0 : index
    %c5376 = arith.constant 5376 : index
    %798 = vector.load %arg6[%c0_291, %c5376] : memref<1x5504xf32, #tpu.memory_space<vmem>>, vector<1x128xf32>
    %799 = vector.broadcast %798 : vector<1x128xf32> to vector<16x128xf32>
    %800 = arith.addf %797, %799 : vector<16x128xf32>
    %c0_292 = arith.constant 0 : index
    %c0_293 = arith.constant 0 : index
    %801 = vector.load %arg7[%c0_292, %c0_293] : memref<16x128xf32, #tpu.memory_space<vmem>>, vector<16x128xf32>
    tpu.vector_store %arg7[%c0_292, %c0_293], %800 {strides = array<i32>} : memref<16x128xf32, #tpu.memory_space<vmem>>, vector<16x128xf32>,
    return
  }
}

</mosaic_0001>

<bundles_post_ra>
// kernel: model_forward.1
= control target key start
LH: loop header
LB: loop body
LE: loop exit
PB: predicated region body
PF: predicated region fallthrough
CT: control target
= control target key end

     0   :  { %v7331_v0 = vmov 0.0   ;;  %vm7332_vm0 = vmmov 0   ;;  %vm58_vm1 = vcmask 261120   ;;  %s8687_s0 = inlined_call_operand.vmem [shape: f32[16,32], index: 0, kind: input, shape index: {}]   ;;  %s8688_s1 = inlined_call_operand.vmem [shape: f32[16,32], index: 1, kind: input, shape index: {}]   ;;  %s8689_s2 = inlined_call_operand.vmem [shape: f32[16,16], index: 2, kind: input, shape index: {}, may-alias: {2,3,4}]   ;;  %s8690_s3 = inlined_call_operand.vmem [shape: f32[16,16], index: 3, kind: input, shape index: {}, may-alias: {2,3,4}]   ;;  %s8691_s4 = inlined_call_operand.vmem [shape: f32[16,16], index: 4, kind: input, shape index: {}, may-alias: {2,3,4}]   ;;  %s8692_s5 = inlined_call_operand.vmem [shape: bf16[64,2944], index: 5, kind: input, shape index: {}]   ;;  %s8693_s6 = inlined_call_operand.vmem [shape: f32[1,5504], index: 6, kind: input, shape index: {}]   ;;  %s8694_s7 = inlined_call_operand.hbm [shape: f32[16,128], index: 7, kind: output, shape index: {}]  }
   0x1   :  { %6429 = vmatprep.subr.bf16.mxu0 %v7331_v0  ;;  %v7029_v1 = vld [vmem:[%s8692_s5] ss:$92 sps:$4 sm:$0xff]   ;;  %6433 = vmatprep.mubr.msk.bf16.mxu0 %vm7332_vm0, %v7331_v0  ;;  %v7030_v2 = vld [vmem:[%s8692_s5 + $0xb8] ss:$92 sps:$4 sm:$0xff]   ;;  %v7407_v4 = vld [vmem:[%s8687_s0 + $0x8] sm:$0xff] }
   0x2   :  { %v7399_v3 = vld [vmem:[%s8687_s0] sm:$0xff]  ;;  %6437 = vmatprep.subr.bf16.mxu1 %v7331_v0  ;;  %6439 = vmatprep.mubr.msk.bf16.mxu1 %vm7332_vm0, %v7331_v0 }
   0x3   :  { %6430 = vmatpush3.bf16.msra.mxu0 %v7029_v1  ;;  %v34_v5 = vpack.c.bf16 %v7407_v4, %v7399_v3 }
   0x4   :  { %6431 = vmatprep.subr.bf16.mxu0 %v7331_v0 }
   0x7   :  { %6432 = vmatpush3.bf16.msra.mxu0 %v7030_v2 }
   0x8   :  { %6443 = vmatprep.subr.bf16.mxu0 %v7331_v0 }
   0xa   :  { %6434 = vmatmul.mubr.msk.bf16.vlgmr.msra.gmra.mrb[0].mxu0 %vm58_vm1, %v34_v5 }
   0xb   :  { %6445 = vmatprep.mubr.msk.bf16.mxu0 %vm7332_vm0, %v7331_v0 }
   0xc   :  { %12 = vsyncpa [#allocation3], 0  ;;  %v6052_v6 = vld [vmem:[%s8693_s6] ss:$0 sm:$0xff]  ;;  %s7333_s0 = smov 120   ;;  %s7334_s11 = smov 96  }
   0xd   :  { %s7335_s12 = smov 80   ;;  %s7336_s13 = smov 88   ;;  %vm107_vm2 = vcmask 64512   ;;  %v7459_v25 = vld [vmem:[%s8689_s2] sm:$0xff]  ;;  %v7464_v27 = vld [vmem:[%s8689_s2 + $0x8] sm:$0xff]  ;;  %vm316_vm3 = vcmask 130048  }
   0xe   :  { %s7337_s14 = smov 72   ;;  %s7338_s15 = smov 112   ;;  %vm470_vm4 = vcmask 1043456   ;;  %vm978_vm5 = vcmask 523264  }
   0xf   :  { %s7339_s16 = smov 104   ;;  %s7340_s2 = smov 56  }
  0x10   :  { %s7341_s21 = smov 64   ;;  %s7342_s22 = smov 48  }
  0x11   :  { %s7343_s23 = smov 40   ;;  %s7344_s10 = smov [#allocation2]  }
  0x12   :  { %s6041_s17 = sshll.u32 %s7344_s10, 4  ;;  %s6042_s17 = int_to_ptr.vmem [resolvable:$true] %s6041_s17 }
  0x13   :  { %s7307_s18 = scalar_lea.vmem %s6042_s17, 256  ;;  %p7312_p1 = scmp.lt.s32.totalorder %s6042_s17, %s6042_s17 }
  0x14   :  { %p7308_p0 = scmp.ne.s32.totalorder %s6042_s17, %s7307_s18  ;;  %p7313_p2 = scmp.lt.s32.totalorder %s7307_s18, %s7307_s18 }
  0x16   :  { %p7314_p3 = por %p7313_p2, %p7312_p1 }
  0x18   :  { %p7315_p4 = pnand %p7314_p3, %p7308_p0 }
  0xdd   :  { %v96_v7 = vpop.f32.mrb[0].mxu0 }
  0xde   :  { %v6435_v8 = vpop.f32.mrb[1].mxu0  ;;  %v97_v10 = vadd.f32 %v6052_v6, %v96_v7 }
  0xdf   :  { %v99_v9 = vpop.f32.mrb[2].mxu0 }
  0xe0   :  { %v100_v11 = vadd.f32 %v6052_v6, %v99_v9  ;;  %v6436_v12 = vpop.f32.mrb[3].mxu0 }
  0xe2   :  { %v7419_v13 = vpack.c.bf16 %v100_v11, %v97_v10 }
  0xe4   :  { %155 = vrot.lane.b32.xlu1 %v7419_v13, %s7333_s0  ;;  %105 = vrot.lane.b32.xlu0 %v7419_v13, %s7334_s11 }
  0xe8   :  { %208 = vrot.lane.b32.xlu1 %v7419_v13, %s7335_s12  ;;  %157 = vrot.lane.b32.xlu0 %v7419_v13, %s7336_s13 }
  0xec   :  { %259 = vrot.lane.b32.xlu1 %v7419_v13, %s7337_s14  ;;  %206 = vrot.lane.b32.xlu0 %v7419_v13, %s7338_s15 }
  0xf0   :  { %257 = vrot.lane.b32.xlu0 %v7419_v13, %s7339_s16 }
 0x156   :  { %v156_v14 = vpop.permute.xlu1 %155  ;;  %v106_v15 = vpop.permute.xlu0 %105 }
 0x157   :  { %v112_v16 = vsel %vm107_vm2, %v106_v15, 0 }
 0x158   :  { %6438 = vmatpush3.bf16.xpose.msra.mxu1 %v112_v16 }
 0x159   :  { %6449 = vmatprep.subr.bf16.mxu1 %v7331_v0 }
 0x15a   :  { %v209_v17 = vpop.permute.xlu1 %208  ;;  %v158_v18 = vpop.permute.xlu0 %157 }
 0x15b   :  { %v163_v19 = vsel %vm107_vm2, %v158_v18, 0  ;;  %v214_v20 = vsel %vm107_vm2, %v209_v17, 0 }
 0x15c   :  { %6444 = vmatpush3.bf16.xpose.msra.mxu0 %v163_v19 }
 0x15d   :  { %6455 = vmatprep.subr.bf16.mxu0 %v7331_v0 }
 0x15e   :  { %v260_v21 = vpop.permute.xlu1 %259  ;;  %v207_v23 = vpop.permute.xlu0 %206 }
 0x15f   :  { %6440 = vmatmul.mubr.msk.bf16.vlgmr.msra.gmra.mrb[0].mxu1 %vm107_vm2, %v7419_v13  ;;  %v265_v22 = vsel %vm107_vm2, %v260_v21, 0 }
 0x160   :  { %6450 = vmatpush3.bf16.xpose.msra.mxu1 %v214_v20  ;;  %6451 = vmatprep.mubr.msk.bf16.mxu1 %vm7332_vm0, %v7331_v0 }
 0x161   :  { %6461 = vmatprep.subr.bf16.mxu1 %v7331_v0 }
 0x162   :  { %v258_v24 = vpop.permute.xlu0 %257 }
 0x163   :  { %6446 = vmatmul.mubr.msk.bf16.vlgmr.msra.gmra.mrb[4].mxu0 %vm107_vm2, %v156_v14 }
 0x164   :  { %6456 = vmatpush3.bf16.xpose.msra.mxu0 %v265_v22  ;;  %6457 = vmatprep.mubr.msk.bf16.mxu0 %vm7332_vm0, %v7331_v0 }
 0x165   :  { %6467 = vmatprep.subr.bf16.mxu0 %v7331_v0 }
 0x167   :  { %6452 = vmatmul.mubr.msk.bf16.vlgmr.msra.gmra.mrb[4].mxu1 %vm107_vm2, %v207_v23 }
 0x168   :  { %6463 = vmatprep.mubr.msk.bf16.mxu1 %vm7332_vm0, %v7331_v0 }
 0x16b   :  { %6458 = vmatmul.mubr.msk.bf16.vlgmr.msra.gmra.mrb[8].mxu0 %vm107_vm2, %v258_v24 }
 0x16c   :  { %6469 = vmatprep.mubr.msk.bf16.mxu0 %vm7332_vm0, %v7331_v0 }
 0x232   :  { %v148_v26 = vpop.f32.mrb[0].mxu1 }
 0x233   :  { %v308_v28 = vadd.f32 %v148_v26, %v7459_v25  ;;  %v6441_v29 = vpop.f32.mrb[1].mxu1 }
 0x234   :  { %v151_v30 = vpop.f32.mrb[2].mxu1 }
 0x235   :  { %v309_v31 = vadd.f32 %v151_v30, %v7464_v27  ;;  %v6442_v32 = vpop.f32.mrb[3].mxu1  ;;  %v317_v33 = vsel %vm316_vm3, %v308_v28, -inf }
 0x236   :  { %318 = vmax.xlane.f32.xlu1 %v317_v33  ;;  %v199_v34 = vpop.f32.mrb[4].mxu0 }
 0x237   :  { %v310_v35 = vadd.f32 %v199_v34, %v7459_v25  ;;  %v6447_v36 = vpop.f32.mrb[5].mxu0  ;;  %v320_v37 = vsel %vm316_vm3, %v309_v31, -inf }
 0x238   :  { %321 = vmax.xlane.f32.xlu0 %v320_v37  ;;  %v202_v38 = vpop.f32.mrb[6].mxu0 }
 0x239   :  { %v311_v39 = vadd.f32 %v202_v38, %v7464_v27  ;;  %v6448_v40 = vpop.f32.mrb[7].mxu0  ;;  %v323_v44 = vsel %vm316_vm3, %v310_v35, -inf }
 0x23a   :  { %v250_v41 = vpop.f32.mrb[4].mxu1 }
 0x23b   :  { %v312_v42 = vadd.f32 %v250_v41, %v7459_v25  ;;  %v6453_v43 = vpop.f32.mrb[5].mxu1  ;;  %v326_v45 = vsel %vm316_vm3, %v311_v39, -inf }
 0x23c   :  { %v253_v46 = vpop.f32.mrb[6].mxu1  ;;  %324 = vmax.xlane.f32.xlu0 %v323_v44  ;;  %327 = vmax.xlane.f32.xlu1 %v326_v45 }
 0x23d   :  { %v313_v47 = vadd.f32 %v253_v46, %v7464_v27  ;;  %v6454_v48 = vpop.f32.mrb[7].mxu1  ;;  %v329_v52 = vsel %vm316_vm3, %v312_v42, -inf }
 0x23e   :  { %v301_v49 = vpop.f32.mrb[8].mxu0 }
 0x23f   :  { %v314_v50 = vadd.f32 %v301_v49, %v7459_v25  ;;  %v6459_v51 = vpop.f32.mrb[9].mxu0  ;;  %v332_v53 = vsel %vm316_vm3, %v313_v47, -inf }
 0x240   :  { %330 = vmax.xlane.f32.xlu0 %v329_v52  ;;  %333 = vmax.xlane.f32.xlu1 %v332_v53  ;;  %v304_v54 = vpop.f32.mrb[10].mxu0 }
 0x241   :  { %v315_v55 = vadd.f32 %v304_v54, %v7464_v27  ;;  %v6460_v56 = vpop.f32.mrb[11].mxu0  ;;  %v335_v57 = vsel %vm316_vm3, %v314_v50, -inf }
 0x243   :  { %v338_v58 = vsel %vm316_vm3, %v315_v55, -inf }
 0x244   :  { %336 = vmax.xlane.f32.xlu0 %v335_v57  ;;  %339 = vmax.xlane.f32.xlu1 %v338_v58 }
 0x2c3   :  { %v319_v59 = vpop.xlane.xlu1 %318 }
 0x2c4   :  { %v341_v60 = vsub.f32 %v308_v28, %v319_v59 }
 0x2c5   :  { %v322_v61 = vpop.xlane.xlu0 %321 }
 0x2c6   :  { %v349_v62 = vmul.f32 1.442695, %v341_v60  ;;  %v342_v63 = vsub.f32 %v309_v31, %v322_v61 }
 0x2c8   :  { %7071 = vpow2.f32 %v349_v62  ;;  %v351_v1 = vmul.f32 1.442695, %v342_v63 }
 0x2c9   :  { %v325_v2 = vpop.xlane.xlu0 %324  ;;  %v328_v5 = vpop.xlane.xlu1 %327 }
 0x2ca   :  { %7073 = vpow2.f32 %v351_v1  ;;  %v343_v6 = vsub.f32 %v310_v35, %v325_v2  ;;  %v344_v7 = vsub.f32 %v311_v39, %v328_v5 }
 0x2cc   :  { %v353_v8 = vmul.f32 1.442695, %v343_v6  ;;  %v355_v9 = vmul.f32 1.442695, %v344_v7 }
 0x2cd   :  { %v331_v10 = vpop.xlane.xlu0 %330  ;;  %v334_v24 = vpop.xlane.xlu1 %333 }
 0x2ce   :  { %7075 = vpow2.f32 %v353_v8  ;;  %v345_v11 = vsub.f32 %v312_v42, %v331_v10  ;;  %v346_v26 = vsub.f32 %v313_v47, %v334_v24 }
 0x2cf   :  { %7077 = vpow2.f32 %v355_v9 }
 0x2d0   :  { %v357_v12 = vmul.f32 1.442695, %v345_v11  ;;  %v359_v31 = vmul.f32 1.442695, %v346_v26 }
 0x2d1   :  { %v337_v28 = vpop.xlane.xlu0 %336  ;;  %v340_v29 = vpop.xlane.xlu1 %339 }
 0x2d2   :  { %v7072_v14 = vpop.eup %7071  ;;  %7079 = vpow2.f32 %v357_v12  ;;  %v347_v30 = vsub.f32 %v314_v50, %v337_v28  ;;  %v348_v32 = vsub.f32 %v315_v55, %v340_v29 }
 0x2d3   :  { %v365_v15 = vsel %vm316_vm3, %v7072_v14, 0.0  ;;  %7081 = vpow2.f32 %v359_v31 }
 0x2d4   :  { %v7074_v16 = vpop.eup %7073  ;;  %366 = vadd.xlane.f32.xlu0 %v365_v15  ;;  %v361_v33 = vmul.f32 1.442695, %v347_v30  ;;  %v363_v34 = vmul.f32 1.442695, %v348_v32  ;;  %v669_v32 = vld [vmem:[%s8692_s5 + $0xbc] sm:$0xf] }
 0x2d5   :  { %v368_v17 = vsel %vm316_vm3, %v7074_v16, 0.0 }
 0x2d6   :  { %369 = vadd.xlane.f32.xlu1 %v368_v17  ;;  %7083 = vpow2.f32 %v361_v33 }
 0x2d7   :  { %7085 = vpow2.f32 %v363_v34 }
 0x2d8   :  { %v7484_v18 = vpop.eup %7075 }
 0x2d9   :  { %v7486_v19 = vpop.eup %7077  ;;  %v371_v20 = vsel %vm316_vm3, %v7484_v18, 0.0 }
 0x2da   :  { %372 = vadd.xlane.f32.xlu0 %v371_v20  ;;  %v374_v21 = vsel %vm316_vm3, %v7486_v19, 0.0  ;;  %v466_v20 = vld [vmem:[%s8692_s5 + $0x4] sm:$0xf] }
 0x2db   :  { %375 = vadd.xlane.f32.xlu1 %v374_v21  ;;  %v472_v21 = vsel %vm470_vm4, %v466_v20, 0 }
 0x2dc   :  { %v7492_v22 = vpop.eup %7079  ;;  %6468 = vmatpush3.bf16.msra.mxu0 %v472_v21 }
 0x2dd   :  { %v377_v23 = vsel %vm316_vm3, %v7492_v22, 0.0  ;;  %v7500_v35 = vpop.eup %7081  ;;  %6479 = vmatprep.subr.bf16.mxu0 %v7331_v0 }
 0x2de   :  { %378 = vadd.xlane.f32.xlu0 %v377_v23  ;;  %v380_v37 = vsel %vm316_vm3, %v7500_v35, 0.0  ;;  %v571_v23 = vld [vmem:[%s8692_s5 + $0x60] sm:$0xf] }
 0x2df   :  { %v576_v30 = vsel %vm470_vm4, %v571_v23, 0  ;;  %v7034_v23 = vld [vmem:[%s8692_s5 + $0xc4] ss:$92 sps:$4 sm:$0xff]  }
 0x2e0   :  { %v7502_v36 = vpop.eup %7083 }
 0x2e1   :  { %v7506_v38 = vpop.eup %7085  ;;  %v383_v39 = vsel %vm316_vm3, %v7502_v36, 0.0 }
 0x2e2   :  { %v386_v40 = vsel %vm316_vm3, %v7506_v38, 0.0 }
 0x2ec   :  { %523 = vrot.lane.b32.xlu1 %v7419_v13, %s7340_s2 }
 0x2f4   :  { %418 = vrot.lane.b32.xlu0 %v7419_v13, %s7341_s21 }
 0x310   :  { %381 = vadd.xlane.f32.xlu1 %v380_v37  ;;  %v674_v37 = vsel %vm470_vm4, %v669_v32, 0 }
 0x313   :  { %384 = vadd.xlane.f32.xlu0 %v383_v39  ;;  %v767_v39 = vld [vmem:[%s8692_s5 + $0x118] sm:$0xf] }
 0x314   :  { %387 = vadd.xlane.f32.xlu1 %v386_v40 }
 0x325   :  { %621 = vrot.lane.b32.xlu1 %v7419_v13, %s7342_s22 }
 0x329   :  { %719 = vrot.lane.b32.xlu0 %v7419_v13, %s7343_s23 }
 0x361   :  { %v367_v41 = vpop.xlane.xlu0 %366 }
 0x362   :  { %v389_v42 = vadd.f32 1e-30, %v367_v41 }
 0x363   :  { %v370_v43 = vpop.xlane.xlu1 %369 }
 0x364   :  { %7087 = vrcp.f32 %v389_v42  ;;  %v390_v44 = vadd.f32 1e-30, %v370_v43 }
 0x366   :  { %7089 = vrcp.f32 %v390_v44  ;;  %v772_v44 = vsel %vm470_vm4, %v767_v39, 0 }
 0x367   :  { %v373_v45 = vpop.xlane.xlu0 %372 }
 0x368   :  { %v391_v46 = vadd.f32 1e-30, %v373_v45  ;;  %v376_v47 = vpop.xlane.xlu1 %375 }
 0x369   :  { %v392_v48 = vadd.f32 1e-30, %v376_v47 }
 0x36a   :  { %7091 = vrcp.f32 %v391_v46 }
 0x36b   :  { %7093 = vrcp.f32 %v392_v48  ;;  %v379_v49 = vpop.xlane.xlu0 %378 }
 0x36c   :  { %v524_v57 = vpop.permute.xlu1 %523  ;;  %v393_v61 = vadd.f32 1e-30, %v379_v49 }
 0x36e   :  { %v7088_v50 = vpop.eup %7087  ;;  %7095 = vrcp.f32 %v393_v61 }
 0x36f   :  { %v419_v51 = vpop.permute.xlu0 %418  ;;  %v405_v53 = vmul.f32 %v7088_v50, %v7072_v14 }
 0x370   :  { %v7090_v52 = vpop.eup %7089  ;;  %6462 = vmatpush3.bf16.msra.mxu1 %v419_v51 }
 0x371   :  { %v406_v54 = vmul.f32 %v7090_v52, %v7074_v16  ;;  %6473 = vmatprep.subr.bf16.mxu1 %v7331_v0 }
 0x373   :  { %v413_v13 = vpack.c.bf16 %v406_v54, %v405_v53  ;;  %v6062_v54 = vld [vmem:[%s8693_s6 + $0x1] ss:$0 sm:$0xff] }
 0x374   :  { %v7092_v55 = vpop.eup %7091 }
 0x375   :  { %v7094_v56 = vpop.eup %7093  ;;  %6464 = vmatmul.mubr.msk.bf16.vlgmr.msra.gmra.mrb[8].mxu1 %vm316_vm3, %v413_v13  ;;  %v407_v58 = vmul.f32 %v7092_v55, %v7484_v18 }
 0x376   :  { %6474 = vmatpush3.bf16.msra.mxu1 %v524_v57  ;;  %6475 = vmatprep.mubr.msk.bf16.mxu1 %vm7332_vm0, %v7331_v0  ;;  %v408_v59 = vmul.f32 %v7094_v56, %v7486_v19 }
 0x377   :  { %6485 = vmatprep.subr.bf16.mxu1 %v7331_v0 }
 0x378   :  { %v414_v60 = vpack.c.bf16 %v408_v59, %v407_v58  ;;  %v7096_v8 = vpop.eup %7095 }
 0x379   :  { %v409_v10 = vmul.f32 %v7096_v8, %v7492_v22 }
 0x37d   :  { %6476 = vmatmul.mubr.msk.bf16.vlgmr.msra.gmra.mrb[12].mxu1 %vm316_vm3, %v414_v60 }
 0x37e   :  { %6487 = vmatprep.mubr.msk.bf16.mxu1 %vm7332_vm0, %v7331_v0 }
 0x39d   :  { %v382_v62 = vpop.xlane.xlu1 %381 }
 0x39e   :  { %v394_v63 = vadd.f32 1e-30, %v382_v62 }
 0x3a0   :  { %7097 = vrcp.f32 %v394_v63  ;;  %v385_v1 = vpop.xlane.xlu0 %384 }
 0x3a1   :  { %v395_v2 = vadd.f32 1e-30, %v385_v1  ;;  %v388_v5 = vpop.xlane.xlu1 %387 }
 0x3a2   :  { %v396_v6 = vadd.f32 1e-30, %v388_v5 }
 0x3a3   :  { %7099 = vrcp.f32 %v395_v2 }
 0x3a4   :  { %7101 = vrcp.f32 %v396_v6  ;;  %v720_v16 = vpop.permute.xlu0 %719 }
 0x3a5   :  { %v622_v7 = vpop.permute.xlu1 %621 }
 0x3a6   :  { %6486 = vmatpush3.bf16.msra.mxu1 %v622_v7 }
 0x3a7   :  { %6497 = vmatprep.subr.bf16.mxu1 %v7331_v0 }
 0x3aa   :  { %v7098_v9 = vpop.eup %7097 }
 0x3ab   :  { %v410_v11 = vmul.f32 %v7098_v9, %v7500_v35 }
 0x3ad   :  { %v7100_v12 = vpop.eup %7099  ;;  %v415_v14 = vpack.c.bf16 %v410_v11, %v409_v10 }
 0x3ae   :  { %v7102_v15 = vpop.eup %7101  ;;  %v411_v17 = vmul.f32 %v7100_v12, %v7502_v36 }
 0x3af   :  { %6488 = vmatmul.mubr.msk.bf16.vlgmr.msra.gmra.mrb[16].mxu1 %vm316_vm3, %v415_v14  ;;  %v412_v18 = vmul.f32 %v7102_v15, %v7506_v38 }
 0x3b0   :  { %6498 = vmatpush3.bf16.msra.mxu1 %v720_v16  ;;  %6499 = vmatprep.mubr.msk.bf16.mxu1 %vm7332_vm0, %v7331_v0 }
 0x3b1   :  { %6509 = vmatprep.subr.bf16.mxu1 %v7331_v0  ;;  %v416_v19 = vpack.c.bf16 %v412_v18, %v411_v17 }
 0x3b7   :  { %6500 = vmatmul.mubr.msk.bf16.vlgmr.msra.gmra.mrb[20].mxu1 %vm316_vm3, %v416_v19 }
 0x3b8   :  { %6513 = vmatprep.mubr.msk.bf16.mxu1 %vm7332_vm0, %v7331_v0 }
 0x448   :  { %v458_v22 = vpop.f32.mrb[8].mxu1 }
 0x449   :  { %v6465_v24 = vpop.f32.mrb[9].mxu1 }
 0x44a   :  { %v461_v26 = vpop.f32.mrb[10].mxu1 }
 0x44b   :  { %v465_v28 = vpack.c.bf16 %v461_v26, %v458_v22  ;;  %v6466_v29 = vpop.f32.mrb[11].mxu1  ;;  %v7033_v22 = vld [vmem:[%s8692_s5 + $0xc] ss:$92 sps:$4 sm:$0xff]  }
 0x44d   :  { %6470 = vmatmul.mubr.msk.bf16.vlgmr.msra.gmra.mrb[12].mxu0 %vm107_vm2, %v465_v28 }
 0x44e   :  { %6480 = vmatpush3.bf16.msra.mxu0 %v576_v30  ;;  %6481 = vmatprep.mubr.msk.bf16.mxu0 %vm7332_vm0, %v7331_v0 }
 0x44f   :  { %6491 = vmatprep.subr.bf16.mxu0 %v7331_v0 }
 0x450   :  { %v563_v31 = vpop.f32.mrb[12].mxu1 }
 0x451   :  { %v6477_v33 = vpop.f32.mrb[13].mxu1 }
 0x452   :  { %v566_v34 = vpop.f32.mrb[14].mxu1 }
 0x453   :  { %v570_v35 = vpack.c.bf16 %v566_v34, %v563_v31  ;;  %v6478_v36 = vpop.f32.mrb[15].mxu1 }
 0x455   :  { %6482 = vmatmul.mubr.msk.bf16.vlgmr.msra.gmra.mrb[16].mxu0 %vm107_vm2, %v570_v35 }
 0x456   :  { %6492 = vmatpush3.bf16.msra.mxu0 %v674_v37  ;;  %6493 = vmatprep.mubr.msk.bf16.mxu0 %vm7332_vm0, %v7331_v0 }
 0x457   :  { %6503 = vmatprep.subr.bf16.mxu0 %v7331_v0 }
 0x482   :  { %v661_v38 = vpop.f32.mrb[16].mxu1 }
 0x483   :  { %v6489_v40 = vpop.f32.mrb[17].mxu1 }
 0x484   :  { %v664_v41 = vpop.f32.mrb[18].mxu1 }
 0x485   :  { %v668_v42 = vpack.c.bf16 %v664_v41, %v661_v38  ;;  %v6490_v43 = vpop.f32.mrb[19].mxu1 }
 0x487   :  { %6494 = vmatmul.mubr.msk.bf16.vlgmr.msra.gmra.mrb[20].mxu0 %vm107_vm2, %v668_v42  ;;  %v6069_v42 = vld [vmem:[%s8693_s6 + $0x4] ss:$0 sm:$0xff] }
 0x488   :  { %6504 = vmatpush3.bf16.msra.mxu0 %v772_v44  ;;  %6505 = vmatprep.mubr.msk.bf16.mxu0 %vm7332_vm0, %v7331_v0 }
 0x489   :  { %6517 = vmatprep.subr.bf16.mxu0 %v7331_v0 }
 0x48a   :  { %v759_v45 = vpop.f32.mrb[20].mxu1 }
 0x48b   :  { %v6501_v46 = vpop.f32.mrb[21].mxu1 }
 0x48c   :  { %v762_v47 = vpop.f32.mrb[22].mxu1 }
 0x48d   :  { %v766_v48 = vpack.c.bf16 %v762_v47, %v759_v45  ;;  %v6502_v49 = vpop.f32.mrb[23].mxu1 }
 0x48f   :  { %6506 = vmatmul.mubr.msk.bf16.vlgmr.msra.gmra.mrb[24].mxu0 %vm107_vm2, %v766_v48  ;;  %v6070_v48 = vld [vmem:[%s8693_s6 + $0x5] ss:$0 sm:$0xff] }
 0x490   :  { %6525 = vmatprep.mubr.msk.bf16.mxu0 %vm7332_vm0, %v7331_v0  ;;  %6518 = vmatpush3.bf16.msra.mxu0 %v7033_v22 }
 0x491   :  { %6519 = vmatprep.subr.bf16.mxu0 %v7331_v0 }
 0x494   :  { %6520 = vmatpush3.bf16.msra.mxu0 %v7034_v23 }
 0x495   :  { %6521 = vmatprep.subr.bf16.mxu0 %v7331_v0 }
 0x520   :  { %v508_v50 = vpop.f32.mrb[12].mxu0 }
 0x521   :  { %v6471_v51 = vpop.f32.mrb[13].mxu0  ;;  %v521_v13 = vadd.f32 %v6062_v54, %v508_v50 }
 0x522   :  { %v511_v52 = vpop.f32.mrb[14].mxu0 }
 0x523   :  { %v6472_v53 = vpop.f32.mrb[15].mxu0  ;;  %v522_v56 = vadd.f32 %v6062_v54, %v511_v52  ;;  %v7036_v54 = vld [vmem:[%s8692_s5 + $0x234] ss:$92 sps:$4 sm:$0xff]  }
 0x524   :  { %v7035_v53 = vld [vmem:[%s8692_s5 + $0x17c] ss:$92 sps:$4 sm:$0xff]  }
 0x525   :  { %6522 = vmatpush3.bf16.msra.mxu0 %v7035_v53 }
 0x526   :  { %6523 = vmatprep.subr.bf16.mxu0 %v7331_v0 }
 0x528   :  { %v612_v55 = vpop.f32.mrb[16].mxu0 }
 0x529   :  { %v619_v57 = vadd.f32 %v612_v55, %v521_v13  ;;  %v6483_v58 = vpop.f32.mrb[17].mxu0  ;;  %6524 = vmatpush3.bf16.msra.mxu0 %v7036_v54  ;;  %v6071_v13 = vld [vmem:[%s8693_s6 + $0x2] ss:$0 sm:$0xff] }
 0x52a   :  { %v615_v59 = vpop.f32.mrb[18].mxu0  ;;  %6543 = vmatprep.subr.bf16.mxu0 %v7331_v0 }
 0x52b   :  { %v620_v60 = vadd.f32 %v615_v59, %v522_v56  ;;  %v6484_v61 = vpop.f32.mrb[19].mxu0 }
 0x55a   :  { %v710_v62 = vpop.f32.mrb[20].mxu0 }
 0x55b   :  { %v717_v63 = vadd.f32 %v710_v62, %v619_v57  ;;  %v6495_v1 = vpop.f32.mrb[21].mxu0 }
 0x55c   :  { %v713_v2 = vpop.f32.mrb[22].mxu0  ;;  %v6075_v1 = vld [vmem:[%s8693_s6 + $0x3] ss:$0 sm:$0xff] }
 0x55d   :  { %v718_v5 = vadd.f32 %v713_v2, %v620_v60  ;;  %v6496_v6 = vpop.f32.mrb[23].mxu0 }
 0x562   :  { %v808_v7 = vpop.f32.mrb[24].mxu0 }
 0x563   :  { %v815_v8 = vadd.f32 %v808_v7, %v717_v63  ;;  %v6507_v9 = vpop.f32.mrb[25].mxu0 }
 0x564   :  { %v811_v10 = vpop.f32.mrb[26].mxu0 }
 0x565   :  { %v817_v11 = vadd.f32 %v815_v8, %v7399_v3  ;;  %v816_v12 = vadd.f32 %v811_v10, %v718_v5  ;;  %v6508_v14 = vpop.f32.mrb[27].mxu0  ;;  %v7031_v3 = vld [vmem:[%s8692_s5 + $0x8] ss:$92 sps:$4 sm:$0xff]  }
 0x566   :  { %6510 = vmatpush3.bf16.msra.mxu1 %v7031_v3 }
 0x567   :  { %v818_v15 = vadd.f32 %v816_v12, %v7407_v4  ;;  %v819_v16 = vsel %vm58_vm1, %v817_v11, 0.0  ;;  %v828_v19 = vmul.f32 %v817_v11, %v817_v11  ;;  %v7032_v4 = vld [vmem:[%s8692_s5 + $0xc0] ss:$92 sps:$4 sm:$0xff]   ;;  %6511 = vmatprep.subr.bf16.mxu1 %v7331_v0 }
 0x568   :  { %820 = vadd.xlane.f32.xlu1 %v819_v16 }
 0x569   :  { %v822_v17 = vsel %vm58_vm1, %v818_v15, 0.0  ;;  %v829_v18 = vmul.f32 %v818_v15, %v818_v15  ;;  %v830_v21 = vsel %vm58_vm1, %v828_v19, 0.0  ;;  %v7037_v19 = vld [vmem:[%s8692_s5 + $0x10] ss:$92 sps:$4 sm:$0xff]  }
 0x56a   :  { %823 = vadd.xlane.f32.xlu0 %v822_v17  ;;  %6512 = vmatpush3.bf16.msra.mxu1 %v7032_v4 }
 0x56b   :  { %v833_v20 = vsel %vm58_vm1, %v829_v18, 0.0  ;;  %6529 = vmatprep.subr.bf16.mxu1 %v7331_v0 }
 0x56c   :  { %834 = vadd.xlane.f32.xlu1 %v833_v20  ;;  %v7038_v20 = vld [vmem:[%s8692_s5 + $0xc8] ss:$92 sps:$4 sm:$0xff]  }
 0x56e   :  { %831 = vadd.xlane.f32.xlu0 %v830_v21 }
 0x5f5   :  { %v821_v24 = vpop.xlane.xlu1 %820 }
 0x5f6   :  { %v826_v28 = vmul.f32 0.03125, %v821_v24 }
 0x5f7   :  { %v824_v26 = vpop.xlane.xlu0 %823 }
 0x5f8   :  { %v827_v29 = vmul.f32 0.03125, %v824_v26  ;;  %v838_v34 = vmul.f32 %v826_v28, %v826_v28  ;;  %v842_v43 = vsub.f32 %v817_v11, %v826_v28 }
 0x5f9   :  { %v835_v30 = vpop.xlane.xlu1 %834 }
 0x5fa   :  { %v839_v31 = vmul.f32 %v827_v29, %v827_v29  ;;  %v837_v32 = vmul.f32 0.03125, %v835_v30  ;;  %v843_v40 = vsub.f32 %v818_v15, %v827_v29 }
 0x5fb   :  { %v832_v33 = vpop.xlane.xlu0 %831 }
 0x5fc   :  { %v841_v35 = vsub.f32 %v837_v32, %v839_v31  ;;  %v836_v36 = vmul.f32 0.03125, %v832_v33 }
 0x5fe   :  { %v845_v37 = vadd.f32 1e-05, %v841_v35  ;;  %v840_v38 = vsub.f32 %v836_v36, %v838_v34 }
 0x600   :  { %7103 = vrsqrt.f32 %v845_v37  ;;  %v844_v39 = vadd.f32 1e-05, %v840_v38  ;;  %v6081_v37 = vld [vmem:[%s8693_s6 + $0x6] ss:$0 sm:$0xff] }
 0x602   :  { %7105 = vrsqrt.f32 %v844_v39 }
 0x60a   :  { %v7104_v41 = vpop.eup %7103 }
 0x60b   :  { %v849_v44 = vmul.f32 %v7104_v41, %v843_v40 }
 0x60c   :  { %v7106_v45 = vpop.eup %7105 }
 0x60d   :  { %v848_v46 = vmul.f32 %v7106_v45, %v842_v43  ;;  %v858_v47 = vmul.f32 %v6069_v42, %v849_v44  ;;  %v6082_v43 = vld [vmem:[%s8693_s6 + $0x7] ss:$0 sm:$0xff] }
 0x60f   :  { %v857_v49 = vmul.f32 %v6069_v42, %v848_v46  ;;  %v867_v51 = vadd.f32 %v6070_v48, %v858_v47 }
 0x611   :  { %v866_v50 = vadd.f32 %v6070_v48, %v857_v49  ;;  %v6083_v48 = vld [vmem:[%s8693_s6 + $0x8] ss:$0 sm:$0xff] }
 0x613   :  { %v868_v52 = vpack.c.bf16 %v867_v51, %v866_v50 }
 0x615   :  { %6514 = vmatmul.mubr.msk.bf16.vlgmr.msra.gmra.mrb[24].mxu1 %vm58_vm1, %v868_v52 }
 0x616   :  { %6533 = vmatprep.mubr.msk.bf16.mxu1 %vm7332_vm0, %v7331_v0  ;;  %6530 = vmatpush3.bf16.msra.mxu1 %v7037_v19 }
 0x617   :  { %6531 = vmatprep.subr.bf16.mxu1 %v7331_v0 }
 0x61a   :  { %6532 = vmatpush3.bf16.msra.mxu1 %v7038_v20 }
 0x61b   :  { %6537 = vmatprep.subr.bf16.mxu1 %v7331_v0 }
 0x6e8   :  { %v929_v55 = vpop.f32.mrb[24].mxu1 }
 0x6e9   :  { %v930_v56 = vadd.f32 %v6071_v13, %v929_v55  ;;  %v6515_v57 = vpop.f32.mrb[25].mxu1 }
 0x6ea   :  { %v932_v58 = vpop.f32.mrb[26].mxu1 }
 0x6eb   :  { %v933_v59 = vadd.f32 %v6071_v13, %v932_v58  ;;  %v6516_v60 = vpop.f32.mrb[27].mxu1  ;;  %v936_v61 = vmax.f32 %v930_v56, 0.0 }
 0x6ed   :  { %v937_v62 = vmax.f32 %v933_v59, 0.0 }
 0x6ef   :  { %v938_v63 = vpack.c.bf16 %v937_v62, %v936_v61 }
 0x6f1   :  { %6526 = vmatmul.mubr.msk.bf16.vlgmr.msra.gmra.mrb[28].mxu0 %vm978_vm5, %v938_v63 }
 0x6f2   :  { %6545 = vmatprep.mubr.msk.bf16.mxu0 %vm7332_vm0, %v7331_v0 }
 0x7c4   :  { %v1016_v2 = vpop.f32.mrb[28].mxu0 }
 0x7c5   :  { %v1017_v5 = vadd.f32 %v6075_v1, %v1016_v2  ;;  %v6527_v6 = vpop.f32.mrb[29].mxu0 }
 0x7c6   :  { %v1019_v7 = vpop.f32.mrb[30].mxu0 }
 0x7c7   :  { %v1023_v8 = vadd.f32 %v1017_v5, %v866_v50  ;;  %v1020_v9 = vadd.f32 %v6075_v1, %v1019_v7  ;;  %v6528_v10 = vpop.f32.mrb[31].mxu0 }
 0x7c9   :  { %v1024_v11 = vadd.f32 %v1020_v9, %v867_v51  ;;  %v1025_v12 = vsel %vm58_vm1, %v1023_v8, 0.0  ;;  %v1033_v14 = vmul.f32 %v1023_v8, %v1023_v8 }
 0x7ca   :  { %1026 = vadd.xlane.f32.xlu0 %v1025_v12 }
 0x7cb   :  { %v1028_v15 = vsel %vm58_vm1, %v1024_v11, 0.0  ;;  %v1034_v16 = vmul.f32 %v1024_v11, %v1024_v11  ;;  %v1035_v17 = vsel %vm58_vm1, %v1033_v14, 0.0 }
 0x7cc   :  { %1029 = vadd.xlane.f32.xlu1 %v1028_v15 }
 0x7cd   :  { %v1038_v18 = vsel %vm58_vm1, %v1034_v16, 0.0 }
 0x7ce   :  { %1036 = vadd.xlane.f32.xlu0 %v1035_v17 }
 0x7d0   :  { %1039 = vadd.xlane.f32.xlu1 %v1038_v18 }
 0x857   :  { %v1027_v21 = vpop.xlane.xlu0 %1026 }
 0x858   :  { %v1031_v3 = vmul.f32 0.03125, %v1027_v21 }
 0x859   :  { %v1030_v4 = vpop.xlane.xlu1 %1029 }
 0x85a   :  { %v1032_v22 = vmul.f32 0.03125, %v1030_v4  ;;  %v1043_v24 = vmul.f32 %v1031_v3, %v1031_v3  ;;  %v1047_v35 = vsub.f32 %v1023_v8, %v1031_v3 }
 0x85b   :  { %v1037_v23 = vpop.xlane.xlu0 %1036 }
 0x85c   :  { %v1041_v26 = vmul.f32 0.03125, %v1037_v23  ;;  %v1044_v29 = vmul.f32 %v1032_v22, %v1032_v22  ;;  %v1048_v38 = vsub.f32 %v1024_v11, %v1032_v22 }
 0x85d   :  { %v1040_v28 = vpop.xlane.xlu1 %1039 }
 0x85e   :  { %v1045_v30 = vsub.f32 %v1041_v26, %v1043_v24  ;;  %v1042_v31 = vmul.f32 0.03125, %v1040_v28 }
 0x860   :  { %v1049_v32 = vadd.f32 1e-05, %v1045_v30  ;;  %v1046_v33 = vsub.f32 %v1042_v31, %v1044_v29 }
 0x862   :  { %7107 = vrsqrt.f32 %v1049_v32  ;;  %v1050_v34 = vadd.f32 1e-05, %v1046_v33 }
 0x864   :  { %7109 = vrsqrt.f32 %v1050_v34 }
 0x86c   :  { %v7108_v36 = vpop.eup %7107 }
 0x86d   :  { %v1053_v39 = vmul.f32 %v7108_v36, %v1047_v35 }
 0x86e   :  { %v7110_v40 = vpop.eup %7109 }
 0x86f   :  { %v1054_v41 = vmul.f32 %v7110_v40, %v1048_v38  ;;  %v1062_v42 = vmul.f32 %v6081_v37, %v1053_v39 }
 0x871   :  { %v1063_v44 = vmul.f32 %v6081_v37, %v1054_v41  ;;  %v7639_v45 = vadd.f32 %v6082_v43, %v1062_v42 }
 0x873   :  { %v7641_v46 = vadd.f32 %v6082_v43, %v1063_v44 }
 0x875   :  { %v1073_v47 = vpack.c.bf16 %v7641_v46, %v7639_v45 }
 0x877   :  { %6534 = vmatmul.mubr.msk.bf16.vlgmr.msra.gmra.mrb[28].mxu1 %vm58_vm1, %v1073_v47 }
 0x878   :  { %6539 = vmatprep.mubr.msk.bf16.mxu1 %vm7332_vm0, %v7331_v0 }
 0x94a   :  { %v1134_v49 = vpop.f32.mrb[28].mxu1 }
 0x94b   :  { %v6535_v50 = vpop.f32.mrb[29].mxu1  ;;  %v1135_v52 = vadd.f32 %v6083_v48, %v1134_v49 }
 0x94c   :  { %v1137_v51 = vpop.f32.mrb[30].mxu1 }
 0x94d   :  { %v1138_v53 = vadd.f32 %v6083_v48, %v1137_v51  ;;  %v6536_v54 = vpop.f32.mrb[31].mxu1 }
 0x94f   :  { %v7651_v13 = vpack.c.bf16 %v1138_v53, %v1135_v52 }
 0x951   :  { %1194 = vrot.lane.b32.xlu1 %v7651_v13, %s7336_s13  ;;  %1143 = vrot.lane.b32.xlu0 %v7651_v13, %s7334_s11 }
 0x955   :  { %1192 = vrot.lane.b32.xlu1 %v7651_v13, %s7333_s0  ;;  %1245 = vrot.lane.b32.xlu0 %v7651_v13, %s7335_s12 }
 0x959   :  { %1243 = vrot.lane.b32.xlu1 %v7651_v13, %s7338_s15  ;;  %1296 = vrot.lane.b32.xlu0 %v7651_v13, %s7337_s14 }
 0x95d   :  { %1294 = vrot.lane.b32.xlu1 %v7651_v13, %s7339_s16 }
 0x9c3   :  { %v1195_v55 = vpop.permute.xlu1 %1194  ;;  %v1144_v56 = vpop.permute.xlu0 %1143 }
 0x9c4   :  { %v1200_v57 = vsel %vm107_vm2, %v1195_v55, 0  ;;  %v1149_v58 = vsel %vm107_vm2, %v1144_v56, 0 }
 0x9c5   :  { %6538 = vmatpush3.bf16.xpose.msra.mxu1 %v1149_v58  ;;  %6544 = vmatpush3.bf16.xpose.msra.mxu0 %v1200_v57 }
 0x9c6   :  { %6549 = vmatprep.subr.bf16.mxu1 %v7331_v0  ;;  %6555 = vmatprep.subr.bf16.mxu0 %v7331_v0 }
 0x9c7   :  { %v1193_v59 = vpop.permute.xlu1 %1192  ;;  %v1246_v60 = vpop.permute.xlu0 %1245 }
 0x9c8   :  { %v1251_v62 = vsel %vm107_vm2, %v1246_v60, 0 }
 0x9cb   :  { %v1297_v61 = vpop.permute.xlu0 %1296  ;;  %v1244_v1 = vpop.permute.xlu1 %1243 }
 0x9cc   :  { %v1302_v63 = vsel %vm107_vm2, %v1297_v61, 0  ;;  %6540 = vmatmul.mubr.msk.bf16.vlgmr.msra.gmra.mrb[32].mxu1 %vm107_vm2, %v7651_v13  ;;  %6546 = vmatmul.mubr.msk.bf16.vlgmr.msra.gmra.mrb[32].mxu0 %vm107_vm2, %v1193_v59 }
 0x9cd   :  { %6550 = vmatpush3.bf16.xpose.msra.mxu1 %v1251_v62  ;;  %6556 = vmatpush3.bf16.xpose.msra.mxu0 %v1302_v63 }
 0x9ce   :  { %6551 = vmatprep.mubr.msk.bf16.mxu1 %vm7332_vm0, %v7331_v0  ;;  %6557 = vmatprep.mubr.msk.bf16.mxu0 %vm7332_vm0, %v7331_v0 }
 0x9cf   :  { %6561 = vmatprep.subr.bf16.mxu1 %v7331_v0  ;;  %6567 = vmatprep.subr.bf16.mxu0 %v7331_v0  ;;  %v1295_v2 = vpop.permute.xlu1 %1294 }
 0x9d4   :  { %6552 = vmatmul.mubr.msk.bf16.vlgmr.msra.gmra.mrb[36].mxu1 %vm107_vm2, %v1244_v1  ;;  %6558 = vmatmul.mubr.msk.bf16.vlgmr.msra.gmra.mrb[36].mxu0 %vm107_vm2, %v1295_v2 }
 0x9d5   :  { %6563 = vmatprep.mubr.msk.bf16.mxu1 %vm7332_vm0, %v7331_v0  ;;  %6569 = vmatprep.mubr.msk.bf16.mxu0 %vm7332_vm0, %v7331_v0 }
 0xa9f   :  { %v1185_v5 = vpop.f32.mrb[32].mxu1  ;;  %v1236_v6 = vpop.f32.mrb[32].mxu0 }
 0xaa0   :  { %v1345_v7 = vadd.f32 %v1185_v5, %v7459_v25  ;;  %v6541_v8 = vpop.f32.mrb[33].mxu1  ;;  %v6547_v9 = vpop.f32.mrb[33].mxu0  ;;  %v1347_v12 = vadd.f32 %v1236_v6, %v7459_v25 }
 0xaa1   :  { %v1188_v10 = vpop.f32.mrb[34].mxu1  ;;  %v1239_v11 = vpop.f32.mrb[34].mxu0 }
 0xaa2   :  { %v1346_v14 = vadd.f32 %v1188_v10, %v7464_v27  ;;  %v6542_v15 = vpop.f32.mrb[35].mxu1  ;;  %v6548_v16 = vpop.f32.mrb[35].mxu0  ;;  %v1353_v17 = vsel %vm316_vm3, %v1345_v7, -inf  ;;  %v1348_v19 = vadd.f32 %v1239_v11, %v7464_v27  ;;  %v1359_v20 = vsel %vm316_vm3, %v1347_v12, -inf }
 0xaa3   :  { %1354 = vmax.xlane.f32.xlu0 %v1353_v17 }
 0xaa4   :  { %v1356_v18 = vsel %vm316_vm3, %v1346_v14, -inf  ;;  %v1362_v33 = vsel %vm316_vm3, %v1348_v19, -inf }
 0xaa5   :  { %1357 = vmax.xlane.f32.xlu1 %v1356_v18 }
 0xaa7   :  { %v1287_v21 = vpop.f32.mrb[36].mxu1  ;;  %1360 = vmax.xlane.f32.xlu0 %v1359_v20  ;;  %v1338_v3 = vpop.f32.mrb[36].mxu0 }
 0xaa8   :  { %v1349_v4 = vadd.f32 %v1287_v21, %v7459_v25  ;;  %v6553_v22 = vpop.f32.mrb[37].mxu1  ;;  %v6559_v23 = vpop.f32.mrb[37].mxu0  ;;  %v1351_v28 = vadd.f32 %v1338_v3, %v7459_v25 }
 0xaa9   :  { %v1290_v24 = vpop.f32.mrb[38].mxu1  ;;  %v1341_v26 = vpop.f32.mrb[38].mxu0 }
 0xaaa   :  { %v1350_v29 = vadd.f32 %v1290_v24, %v7464_v27  ;;  %v6554_v30 = vpop.f32.mrb[39].mxu1  ;;  %v6560_v31 = vpop.f32.mrb[39].mxu0  ;;  %v1365_v32 = vsel %vm316_vm3, %v1349_v4, -inf  ;;  %v1352_v34 = vadd.f32 %v1341_v26, %v7464_v27  ;;  %v1371_v36 = vsel %vm316_vm3, %v1351_v28, -inf }
 0xaab   :  { %1366 = vmax.xlane.f32.xlu1 %v1365_v32  ;;  %1363 = vmax.xlane.f32.xlu0 %v1362_v33 }
 0xaac   :  { %v1368_v35 = vsel %vm316_vm3, %v1350_v29, -inf  ;;  %v1374_v25 = vsel %vm316_vm3, %v1352_v34, -inf }
 0xaaf   :  { %1369 = vmax.xlane.f32.xlu0 %v1368_v35  ;;  %1372 = vmax.xlane.f32.xlu1 %v1371_v36 }
 0xab3   :  { %1375 = vmax.xlane.f32.xlu0 %v1374_v25 }
 0xac0   :  { %1454 = vrot.lane.b32.xlu1 %v7651_v13, %s7341_s21 }
 0xb30   :  { %v1355_v37 = vpop.xlane.xlu0 %1354 }
 0xb31   :  { %v1377_v38 = vsub.f32 %v1345_v7, %v1355_v37 }
 0xb32   :  { %v1358_v39 = vpop.xlane.xlu1 %1357 }
 0xb33   :  { %v1385_v40 = vmul.f32 1.442695, %v1377_v38  ;;  %v1378_v41 = vsub.f32 %v1346_v14, %v1358_v39 }
 0xb34   :  { %v1361_v42 = vpop.xlane.xlu0 %1360 }
 0xb35   :  { %7111 = vpow2.f32 %v1385_v40  ;;  %v1387_v27 = vmul.f32 1.442695, %v1378_v41  ;;  %v1379_v43 = vsub.f32 %v1347_v12, %v1361_v42 }
 0xb37   :  { %7113 = vpow2.f32 %v1387_v27  ;;  %v1389_v44 = vmul.f32 1.442695, %v1379_v43 }
 0xb38   :  { %v1367_v47 = vpop.xlane.xlu1 %1366  ;;  %v1364_v48 = vpop.xlane.xlu0 %1363 }
 0xb39   :  { %7115 = vpow2.f32 %v1389_v44  ;;  %v1381_v49 = vsub.f32 %v1349_v4, %v1367_v47  ;;  %v1380_v50 = vsub.f32 %v1348_v19, %v1364_v48 }
 0xb3b   :  { %v1393_v51 = vmul.f32 1.442695, %v1381_v49  ;;  %v1391_v52 = vmul.f32 1.442695, %v1380_v50 }
 0xb3c   :  { %v1370_v53 = vpop.xlane.xlu0 %1369  ;;  %v1373_v54 = vpop.xlane.xlu1 %1372 }
 0xb3d   :  { %7117 = vpow2.f32 %v1393_v51  ;;  %v1382_v55 = vsub.f32 %v1350_v29, %v1370_v53  ;;  %v1383_v56 = vsub.f32 %v1351_v28, %v1373_v54 }
 0xb3e   :  { %7119 = vpow2.f32 %v1391_v52 }
 0xb3f   :  { %v7112_v57 = vpop.eup %7111  ;;  %v1395_v58 = vmul.f32 1.442695, %v1382_v55  ;;  %v1397_v59 = vmul.f32 1.442695, %v1383_v56 }
 0xb40   :  { %v1455_v60 = vpop.permute.xlu1 %1454  ;;  %v1376_v61 = vpop.xlane.xlu0 %1375  ;;  %v1401_v62 = vsel %vm316_vm3, %v7112_v57, 0.0 }
 0xb41   :  { %v7114_v63 = vpop.eup %7113  ;;  %7121 = vpow2.f32 %v1395_v58  ;;  %v1384_v1 = vsub.f32 %v1352_v34, %v1376_v61  ;;  %1402 = vadd.xlane.f32.xlu1 %v1401_v62  ;;  %6562 = vmatpush3.bf16.msra.mxu1 %v1455_v60  ;;  %v1606_v60 = vld [vmem:[%s8692_s5 + $0x70] sm:$0xf] }
 0xb42   :  { %7123 = vpow2.f32 %v1397_v59  ;;  %v1404_v2 = vsel %vm316_vm3, %v7114_v63, 0.0  ;;  %6573 = vmatprep.subr.bf16.mxu1 %v7331_v0 }
 0xb43   :  { %v7116_v5 = vpop.eup %7115  ;;  %v1399_v6 = vmul.f32 1.442695, %v1384_v1  ;;  %1405 = vadd.xlane.f32.xlu0 %v1404_v2  ;;  %v1611_v2 = vsel %vm470_vm4, %v1606_v60, 0 }
 0xb44   :  { %v1407_v7 = vsel %vm316_vm3, %v7116_v5, 0.0 }
 0xb45   :  { %7125 = vpow2.f32 %v1399_v6  ;;  %1408 = vadd.xlane.f32.xlu1 %v1407_v7  ;;  %v1704_v6 = vld [vmem:[%s8692_s5 + $0xcc] sm:$0xf] }
 0xb47   :  { %v7710_v8 = vpop.eup %7117 }
 0xb48   :  { %v7120_v9 = vpop.eup %7119  ;;  %v1413_v10 = vsel %vm316_vm3, %v7710_v8, 0.0 }
 0xb49   :  { %1414 = vadd.xlane.f32.xlu1 %v1413_v10  ;;  %v1410_v11 = vsel %vm316_vm3, %v7120_v9, 0.0 }
 0xb4a   :  { %1411 = vadd.xlane.f32.xlu0 %v1410_v11  ;;  %v1709_v11 = vsel %vm470_vm4, %v1704_v6, 0 }
 0xb4b   :  { %v7122_v12 = vpop.eup %7121 }
 0xb4c   :  { %v7715_v14 = vpop.eup %7123  ;;  %v1416_v15 = vsel %vm316_vm3, %v7122_v12, 0.0 }
 0xb4d   :  { %v1419_v16 = vsel %vm316_vm3, %v7715_v14, 0.0 }
 0xb4e   :  { %1420 = vadd.xlane.f32.xlu1 %v1419_v16  ;;  %1417 = vadd.xlane.f32.xlu0 %v1416_v15 }
 0xb4f   :  { %v7126_v17 = vpop.eup %7125 }
 0xb50   :  { %v1422_v18 = vsel %vm316_vm3, %v7126_v17, 0.0 }
 0xb52   :  { %1423 = vadd.xlane.f32.xlu0 %v1422_v18 }
 0xb5f   :  { %1656 = vrot.lane.b32.xlu1 %v7651_v13, %s7342_s22 }
 0xb63   :  { %1754 = vrot.lane.b32.xlu1 %v7651_v13, %s7343_s23 }
 0xb68   :  { %1558 = vrot.lane.b32.xlu0 %v7651_v13, %s7340_s2 }
 0xbce   :  { %v1403_v19 = vpop.xlane.xlu1 %1402 }
 0xbcf   :  { %v1425_v20 = vadd.f32 1e-30, %v1403_v19 }
 0xbd0   :  { %v1406_v21 = vpop.xlane.xlu0 %1405 }
 0xbd1   :  { %7127 = vrcp.f32 %v1425_v20  ;;  %v1426_v3 = vadd.f32 1e-30, %v1406_v21 }
 0xbd2   :  { %v1409_v4 = vpop.xlane.xlu1 %1408 }
 0xbd3   :  { %7129 = vrcp.f32 %v1426_v3  ;;  %v1427_v22 = vadd.f32 1e-30, %v1409_v4 }
 0xbd5   :  { %7131 = vrcp.f32 %v1427_v22 }
 0xbd6   :  { %v1415_v26 = vpop.xlane.xlu1 %1414 }
 0xbd7   :  { %v1412_v23 = vpop.xlane.xlu0 %1411  ;;  %v1429_v32 = vadd.f32 1e-30, %v1415_v26 }
 0xbd8   :  { %v1428_v24 = vadd.f32 1e-30, %v1412_v23 }
 0xbda   :  { %7133 = vrcp.f32 %v1428_v24 }
 0xbdb   :  { %v7128_v28 = vpop.eup %7127  ;;  %v1418_v29 = vpop.xlane.xlu0 %1417 }
 0xbdc   :  { %v1430_v30 = vadd.f32 1e-30, %v1418_v29  ;;  %v1441_v33 = vmul.f32 %v7128_v28, %v7112_v57  ;;  %v1421_v36 = vpop.xlane.xlu1 %1420  ;;  %v1502_v57 = vld [vmem:[%s8692_s5 + $0x14] sm:$0xf]  ;;  %v6093_v29 = vld [vmem:[%s8693_s6 + $0x9] ss:$0 sm:$0xff] }
 0xbdd   :  { %v7130_v31 = vpop.eup %7129  ;;  %v1431_v41 = vadd.f32 1e-30, %v1421_v36  ;;  %v1507_v58 = vsel %vm470_vm4, %v1502_v57, 0  ;;  %v7043_v57 = vld [vmem:[%s8692_s5 + $0x1c] ss:$92 sps:$4 sm:$0xff]  }
 0xbde   :  { %v1442_v13 = vmul.f32 %v7130_v31, %v7114_v63  ;;  %7135 = vrcp.f32 %v1430_v30  ;;  %6568 = vmatpush3.bf16.msra.mxu0 %v1507_v58  ;;  %v7044_v58 = vld [vmem:[%s8692_s5 + $0xd4] ss:$92 sps:$4 sm:$0xff]  }
 0xbdf   :  { %v1424_v34 = vpop.xlane.xlu0 %1423  ;;  %7137 = vrcp.f32 %v1429_v32  ;;  %v7132_v25 = vpop.eup %7131  ;;  %6579 = vmatprep.subr.bf16.mxu0 %v7331_v0 }
 0xbe0   :  { %v1449_v35 = vpack.c.bf16 %v1442_v13, %v1441_v33  ;;  %v1432_v37 = vadd.f32 1e-30, %v1424_v34  ;;  %v1443_v42 = vmul.f32 %v7132_v25, %v7116_v5  ;;  %v1657_v44 = vpop.permute.xlu1 %1656 }
 0xbe2   :  { %6564 = vmatmul.mubr.msk.bf16.vlgmr.msra.gmra.mrb[40].mxu1 %vm316_vm3, %v1449_v35  ;;  %7139 = vrcp.f32 %v1432_v37 }
 0xbe3   :  { %v1559_v38 = vpop.permute.xlu0 %1558  ;;  %6575 = vmatprep.mubr.msk.bf16.mxu1 %vm7332_vm0, %v7331_v0  ;;  %7141 = vrcp.f32 %v1431_v41 }
 0xbe4   :  { %v7134_v39 = vpop.eup %7133  ;;  %6574 = vmatpush3.bf16.msra.mxu1 %v1559_v38  ;;  %v1755_v52 = vpop.permute.xlu1 %1754 }
 0xbe5   :  { %v1444_v40 = vmul.f32 %v7134_v39, %v7120_v9  ;;  %6585 = vmatprep.subr.bf16.mxu1 %v7331_v0 }
 0xbe7   :  { %v1450_v27 = vpack.c.bf16 %v1444_v40, %v1443_v42 }
 0xbe8   :  { %v7136_v43 = vpop.eup %7135 }
 0xbe9   :  { %v7138_v47 = vpop.eup %7137  ;;  %v1446_v48 = vmul.f32 %v7136_v43, %v7122_v12 }
 0xbea   :  { %6576 = vmatmul.mubr.msk.bf16.vlgmr.msra.gmra.mrb[44].mxu1 %vm316_vm3, %v1450_v27  ;;  %v1445_v49 = vmul.f32 %v7138_v47, %v7710_v8 }
 0xbeb   :  { %6586 = vmatpush3.bf16.msra.mxu1 %v1657_v44  ;;  %6587 = vmatprep.mubr.msk.bf16.mxu1 %vm7332_vm0, %v7331_v0 }
 0xbec   :  { %6597 = vmatprep.subr.bf16.mxu1 %v7331_v0  ;;  %v1451_v50 = vpack.c.bf16 %v1446_v48, %v1445_v49  ;;  %v7140_v51 = vpop.eup %7139 }
 0xbed   :  { %v7142_v53 = vpop.eup %7141  ;;  %v1448_v54 = vmul.f32 %v7140_v51, %v7126_v17 }
 0xbee   :  { %v1447_v55 = vmul.f32 %v7142_v53, %v7715_v14  ;;  %v1802_v14 = vld [vmem:[%s8692_s5 + $0x128] sm:$0xf] }
 0xbef   :  { %v1807_v19 = vsel %vm470_vm4, %v1802_v14, 0 }
 0xbf0   :  { %v1452_v56 = vpack.c.bf16 %v1448_v54, %v1447_v55 }
 0xbf2   :  { %6588 = vmatmul.mubr.msk.bf16.vlgmr.msra.gmra.mrb[48].mxu1 %vm316_vm3, %v1451_v50 }
 0xbf3   :  { %6598 = vmatpush3.bf16.msra.mxu1 %v1755_v52  ;;  %6599 = vmatprep.mubr.msk.bf16.mxu1 %vm7332_vm0, %v7331_v0 }
 0xbf4   :  { %6609 = vmatprep.subr.bf16.mxu1 %v7331_v0 }
 0xbfa   :  { %6600 = vmatmul.mubr.msk.bf16.vlgmr.msra.gmra.mrb[52].mxu1 %vm316_vm3, %v1452_v56 }
 0xbfb   :  { %6613 = vmatprep.mubr.msk.bf16.mxu1 %vm7332_vm0, %v7331_v0 }
 0xcb5   :  { %v1494_v59 = vpop.f32.mrb[40].mxu1 }
 0xcb6   :  { %v6565_v61 = vpop.f32.mrb[41].mxu1 }
 0xcb7   :  { %v1497_v62 = vpop.f32.mrb[42].mxu1 }
 0xcb8   :  { %v1501_v63 = vpack.c.bf16 %v1497_v62, %v1494_v59  ;;  %v6566_v1 = vpop.f32.mrb[43].mxu1 }
 0xcba   :  { %6570 = vmatmul.mubr.msk.bf16.vlgmr.msra.gmra.mrb[40].mxu0 %vm107_vm2, %v1501_v63 }
 0xcbb   :  { %6580 = vmatpush3.bf16.msra.mxu0 %v1611_v2  ;;  %6581 = vmatprep.mubr.msk.bf16.mxu0 %vm7332_vm0, %v7331_v0 }
 0xcbc   :  { %6591 = vmatprep.subr.bf16.mxu0 %v7331_v0 }
 0xcbd   :  { %v1598_v5 = vpop.f32.mrb[44].mxu1 }
 0xcbe   :  { %v6577_v7 = vpop.f32.mrb[45].mxu1 }
 0xcbf   :  { %v1601_v8 = vpop.f32.mrb[46].mxu1 }
 0xcc0   :  { %v1605_v9 = vpack.c.bf16 %v1601_v8, %v1598_v5  ;;  %v6578_v10 = vpop.f32.mrb[47].mxu1 }
 0xcc2   :  { %6582 = vmatmul.mubr.msk.bf16.vlgmr.msra.gmra.mrb[44].mxu0 %vm107_vm2, %v1605_v9 }
 0xcc3   :  { %6592 = vmatpush3.bf16.msra.mxu0 %v1709_v11  ;;  %6593 = vmatprep.mubr.msk.bf16.mxu0 %vm7332_vm0, %v7331_v0 }
 0xcc4   :  { %6603 = vmatprep.subr.bf16.mxu0 %v7331_v0 }
 0xcc5   :  { %v1696_v12 = vpop.f32.mrb[48].mxu1 }
 0xcc6   :  { %v6589_v15 = vpop.f32.mrb[49].mxu1 }
 0xcc7   :  { %v1699_v16 = vpop.f32.mrb[50].mxu1 }
 0xcc8   :  { %v1703_v17 = vpack.c.bf16 %v1699_v16, %v1696_v12  ;;  %v6590_v18 = vpop.f32.mrb[51].mxu1  ;;  %v6100_v16 = vld [vmem:[%s8693_s6 + $0xc] ss:$0 sm:$0xff] }
 0xcca   :  { %6594 = vmatmul.mubr.msk.bf16.vlgmr.msra.gmra.mrb[48].mxu0 %vm107_vm2, %v1703_v17 }
 0xccb   :  { %6604 = vmatpush3.bf16.msra.mxu0 %v1807_v19  ;;  %6605 = vmatprep.mubr.msk.bf16.mxu0 %vm7332_vm0, %v7331_v0 }
 0xccc   :  { %6617 = vmatprep.subr.bf16.mxu0 %v7331_v0 }
 0xccd   :  { %v1794_v20 = vpop.f32.mrb[52].mxu1 }
 0xcce   :  { %v6601_v21 = vpop.f32.mrb[53].mxu1 }
 0xccf   :  { %v1797_v3 = vpop.f32.mrb[54].mxu1  ;;  %v6101_v21 = vld [vmem:[%s8693_s6 + $0xd] ss:$0 sm:$0xff] }
 0xcd0   :  { %v1801_v4 = vpack.c.bf16 %v1797_v3, %v1794_v20  ;;  %v6602_v22 = vpop.f32.mrb[55].mxu1 }
 0xcd2   :  { %6606 = vmatmul.mubr.msk.bf16.vlgmr.msra.gmra.mrb[52].mxu0 %vm107_vm2, %v1801_v4 }
 0xcd3   :  { %6625 = vmatprep.mubr.msk.bf16.mxu0 %vm7332_vm0, %v7331_v0  ;;  %6618 = vmatpush3.bf16.msra.mxu0 %v7043_v57 }
 0xcd4   :  { %6619 = vmatprep.subr.bf16.mxu0 %v7331_v0 }
 0xcd7   :  { %6620 = vmatpush3.bf16.msra.mxu0 %v7044_v58 }
 0xcd8   :  { %6621 = vmatprep.subr.bf16.mxu0 %v7331_v0 }
 0xd8d   :  { %v1543_v23 = vpop.f32.mrb[40].mxu0 }
 0xd8e   :  { %v6571_v24 = vpop.f32.mrb[41].mxu0  ;;  %v1556_v30 = vadd.f32 %v6093_v29, %v1543_v23  ;;  %v7041_v23 = vld [vmem:[%s8692_s5 + $0x20] ss:$92 sps:$4 sm:$0xff]  }
 0xd8f   :  { %v1546_v26 = vpop.f32.mrb[42].mxu0 }
 0xd90   :  { %v6572_v28 = vpop.f32.mrb[43].mxu0  ;;  %v1557_v32 = vadd.f32 %v6093_v29, %v1546_v26  ;;  %v7042_v26 = vld [vmem:[%s8692_s5 + $0xd8] ss:$92 sps:$4 sm:$0xff]   ;;  %v7830_v29 = vld [vmem:[%s8688_s1 + $0x8] sm:$0xff] }
 0xd91   :  { %v7825_v28 = vld [vmem:[%s8688_s1] sm:$0xff] }
 0xd95   :  { %v1647_v31 = vpop.f32.mrb[44].mxu0 }
 0xd96   :  { %v1654_v33 = vadd.f32 %v1647_v31, %v1556_v30  ;;  %v6583_v13 = vpop.f32.mrb[45].mxu0  ;;  %v2110_v30 = vpack.c.bf16 %v7830_v29, %v7825_v28  ;;  %v7045_v31 = vld [vmem:[%s8692_s5 + $0x18c] ss:$92 sps:$4 sm:$0xff]  }
 0xd97   :  { %v1650_v34 = vpop.f32.mrb[46].mxu0  ;;  %6622 = vmatpush3.bf16.msra.mxu0 %v7045_v31 }
 0xd98   :  { %v1655_v35 = vadd.f32 %v1650_v34, %v1557_v32  ;;  %v6584_v36 = vpop.f32.mrb[47].mxu0  ;;  %6623 = vmatprep.subr.bf16.mxu0 %v7331_v0  ;;  %v7046_v32 = vld [vmem:[%s8692_s5 + $0x244] ss:$92 sps:$4 sm:$0xff]  }
 0xd9b   :  { %6624 = vmatpush3.bf16.msra.mxu0 %v7046_v32 }
 0xd9c   :  { %6643 = vmatprep.subr.bf16.mxu0 %v7331_v0 }
 0xd9d   :  { %v1745_v25 = vpop.f32.mrb[48].mxu0 }
 0xd9e   :  { %v1752_v37 = vadd.f32 %v1745_v25, %v1654_v33  ;;  %v6595_v38 = vpop.f32.mrb[49].mxu0  ;;  %v6102_v33 = vld [vmem:[%s8693_s6 + $0xa] ss:$0 sm:$0xff] }
 0xd9f   :  { %v1748_v39 = vpop.f32.mrb[50].mxu0 }
 0xda0   :  { %v1753_v40 = vadd.f32 %v1748_v39, %v1655_v35  ;;  %v6596_v41 = vpop.f32.mrb[51].mxu0 }
 0xda1   :  { %v6114_v41 = vld [vmem:[%s8693_s6 + $0x10] ss:$0 sm:$0xff] }
 0xda5   :  { %v1843_v42 = vpop.f32.mrb[52].mxu0 }
 0xda6   :  { %v1850_v27 = vadd.f32 %v1843_v42, %v1752_v37  ;;  %v6607_v43 = vpop.f32.mrb[53].mxu0 }
 0xda7   :  { %v1846_v44 = vpop.f32.mrb[54].mxu0 }
 0xda8   :  { %v1852_v47 = vadd.f32 %v1850_v27, %v7639_v45  ;;  %v1851_v48 = vadd.f32 %v1846_v44, %v1753_v40  ;;  %v6608_v49 = vpop.f32.mrb[55].mxu0  ;;  %v7039_v45 = vld [vmem:[%s8692_s5 + $0x18] ss:$92 sps:$4 sm:$0xff]  }
 0xda9   :  { %6610 = vmatpush3.bf16.msra.mxu1 %v7039_v45 }
 0xdaa   :  { %v1853_v50 = vadd.f32 %v1851_v48, %v7641_v46  ;;  %v1854_v51 = vsel %vm58_vm1, %v1852_v47, 0.0  ;;  %v1862_v52 = vmul.f32 %v1852_v47, %v1852_v47  ;;  %v7040_v46 = vld [vmem:[%s8692_s5 + $0xd0] ss:$92 sps:$4 sm:$0xff]   ;;  %6611 = vmatprep.subr.bf16.mxu1 %v7331_v0 }
 0xdab   :  { %1855 = vadd.xlane.f32.xlu0 %v1854_v51 }
 0xdac   :  { %v1857_v53 = vsel %vm58_vm1, %v1853_v50, 0.0  ;;  %v1864_v54 = vsel %vm58_vm1, %v1862_v52, 0.0  ;;  %v1863_v55 = vmul.f32 %v1853_v50, %v1853_v50 }
 0xdad   :  { %1858 = vadd.xlane.f32.xlu1 %v1857_v53  ;;  %6612 = vmatpush3.bf16.msra.mxu1 %v7040_v46 }
 0xdae   :  { %v1867_v56 = vsel %vm58_vm1, %v1863_v55, 0.0  ;;  %6629 = vmatprep.subr.bf16.mxu1 %v7331_v0 }
 0xdaf   :  { %1865 = vadd.xlane.f32.xlu0 %v1864_v54 }
 0xdb3   :  { %1868 = vadd.xlane.f32.xlu0 %v1867_v56 }
 0xe38   :  { %v1856_v59 = vpop.xlane.xlu0 %1855 }
 0xe39   :  { %v1860_v60 = vmul.f32 0.03125, %v1856_v59 }
 0xe3a   :  { %v1859_v61 = vpop.xlane.xlu1 %1858 }
 0xe3b   :  { %v1872_v63 = vmul.f32 %v1860_v60, %v1860_v60  ;;  %v1861_v1 = vmul.f32 0.03125, %v1859_v61  ;;  %v1876_v12 = vsub.f32 %v1852_v47, %v1860_v60 }
 0xe3c   :  { %v1866_v62 = vpop.xlane.xlu0 %1865 }
 0xe3d   :  { %v1870_v2 = vmul.f32 0.03125, %v1866_v62  ;;  %v1873_v7 = vmul.f32 %v1861_v1, %v1861_v1  ;;  %v1877_v17 = vsub.f32 %v1853_v50, %v1861_v1 }
 0xe3f   :  { %v1874_v5 = vsub.f32 %v1870_v2, %v1872_v63  ;;  %v2106_v63 = vld [vmem:[%s8690_s3] sm:$0xff] }
 0xe40   :  { %v1869_v6 = vpop.xlane.xlu0 %1868 }
 0xe41   :  { %v1878_v8 = vadd.f32 1e-05, %v1874_v5  ;;  %v1871_v9 = vmul.f32 0.03125, %v1869_v6  ;;  %v2107_v5 = vld [vmem:[%s8690_s3 + $0x8] sm:$0xff] }
 0xe43   :  { %7143 = vrsqrt.f32 %v1878_v8  ;;  %v1875_v10 = vsub.f32 %v1871_v9, %v1873_v7 }
 0xe45   :  { %v1879_v11 = vadd.f32 1e-05, %v1875_v10 }
 0xe47   :  { %7145 = vrsqrt.f32 %v1879_v11 }
 0xe4d   :  { %v7144_v14 = vpop.eup %7143 }
 0xe4e   :  { %v1882_v15 = vmul.f32 %v7144_v14, %v1876_v12 }
 0xe50   :  { %v1891_v20 = vmul.f32 %v6100_v16, %v1882_v15 }
 0xe51   :  { %v7146_v18 = vpop.eup %7145 }
 0xe52   :  { %v1883_v19 = vmul.f32 %v7146_v18, %v1877_v17  ;;  %v7807_v4 = vadd.f32 %v6101_v21, %v1891_v20 }
 0xe54   :  { %v1892_v3 = vmul.f32 %v6100_v16, %v1883_v19 }
 0xe56   :  { %v7809_v22 = vadd.f32 %v6101_v21, %v1892_v3 }
 0xe58   :  { %v1902_v24 = vpack.c.bf16 %v7809_v22, %v7807_v4 }
 0xe5a   :  { %6614 = vmatmul.mubr.msk.bf16.vlgmr.msra.gmra.mrb[56].mxu1 %vm58_vm1, %v1902_v24 }
 0xe5b   :  { %6630 = vmatpush3.bf16.msra.mxu1 %v7041_v23  ;;  %6633 = vmatprep.mubr.msk.bf16.mxu1 %vm7332_vm0, %v7331_v0 }
 0xe5c   :  { %6631 = vmatprep.subr.bf16.mxu1 %v7331_v0 }
 0xe5f   :  { %6632 = vmatpush3.bf16.msra.mxu1 %v7042_v26 }
 0xe60   :  { %6637 = vmatprep.subr.bf16.mxu1 %v7331_v0 }
 0xe62   :  { %6634 = vmatmul.mubr.msk.bf16.vlgmr.msra.gmra.mrb[60].mxu1 %vm58_vm1, %v2110_v30 }
 0xe63   :  { %6639 = vmatprep.mubr.msk.bf16.mxu1 %vm7332_vm0, %v7331_v0 }
 0xf2d   :  { %v1963_v13 = vpop.f32.mrb[56].mxu1 }
 0xf2e   :  { %v1964_v34 = vadd.f32 %v6102_v33, %v1963_v13  ;;  %v6615_v35 = vpop.f32.mrb[57].mxu1 }
 0xf2f   :  { %v1966_v36 = vpop.f32.mrb[58].mxu1 }
 0xf30   :  { %v1967_v25 = vadd.f32 %v6102_v33, %v1966_v36  ;;  %v6616_v37 = vpop.f32.mrb[59].mxu1  ;;  %v1970_v38 = vmax.f32 %v1964_v34, 0.0 }
 0xf32   :  { %v1971_v39 = vmax.f32 %v1967_v25, 0.0 }
 0xf34   :  { %v1972_v40 = vpack.c.bf16 %v1971_v39, %v1970_v38 }
 0xf35   :  { %v2171_v42 = vpop.f32.mrb[60].mxu1 }
 0xf36   :  { %6626 = vmatmul.mubr.msk.bf16.vlgmr.msra.gmra.mrb[56].mxu0 %vm978_vm5, %v1972_v40  ;;  %v6635_v27 = vpop.f32.mrb[61].mxu1  ;;  %v2172_v44 = vadd.f32 %v6114_v41, %v2171_v42 }
 0xf37   :  { %v2174_v43 = vpop.f32.mrb[62].mxu1  ;;  %6645 = vmatprep.mubr.msk.bf16.mxu0 %vm7332_vm0, %v7331_v0 }
 0xf38   :  { %v2175_v47 = vadd.f32 %v6114_v41, %v2174_v43  ;;  %v6636_v48 = vpop.f32.mrb[63].mxu1 }
 0xf3a   :  { %v7856_v49 = vpack.c.bf16 %v2175_v47, %v2172_v44 }
 0xf3c   :  { %2231 = vrot.lane.b32.xlu0 %v7856_v49, %s7336_s13  ;;  %2180 = vrot.lane.b32.xlu1 %v7856_v49, %s7334_s11 }
 0xf40   :  { %2280 = vrot.lane.b32.xlu0 %v7856_v49, %s7338_s15  ;;  %2229 = vrot.lane.b32.xlu1 %v7856_v49, %s7333_s0 }
 0xf44   :  { %2331 = vrot.lane.b32.xlu0 %v7856_v49, %s7339_s16  ;;  %2282 = vrot.lane.b32.xlu1 %v7856_v49, %s7335_s12 }
 0xf48   :  { %2333 = vrot.lane.b32.xlu1 %v7856_v49, %s7337_s14 }
 0xfae   :  { %v2232_v50 = vpop.permute.xlu0 %2231  ;;  %v2181_v51 = vpop.permute.xlu1 %2180 }
 0xfaf   :  { %v2237_v52 = vsel %vm107_vm2, %v2232_v50, 0  ;;  %v2186_v53 = vsel %vm107_vm2, %v2181_v51, 0 }
 0xfb0   :  { %6638 = vmatpush3.bf16.xpose.msra.mxu1 %v2186_v53  ;;  %6644 = vmatpush3.bf16.xpose.msra.mxu0 %v2237_v52 }
 0xfb1   :  { %6649 = vmatprep.subr.bf16.mxu1 %v7331_v0  ;;  %6655 = vmatprep.subr.bf16.mxu0 %v7331_v0 }
 0xfb2   :  { %v2230_v54 = vpop.permute.xlu1 %2229  ;;  %v2281_v57 = vpop.permute.xlu0 %2280 }
 0xfb6   :  { %v2283_v55 = vpop.permute.xlu1 %2282  ;;  %v2332_v58 = vpop.permute.xlu0 %2331 }
 0xfb7   :  { %v2288_v56 = vsel %vm107_vm2, %v2283_v55, 0  ;;  %6640 = vmatmul.mubr.msk.bf16.vlgmr.msra.gmra.mrb[64].mxu1 %vm107_vm2, %v7856_v49  ;;  %6646 = vmatmul.mubr.msk.bf16.vlgmr.msra.gmra.mrb[60].mxu0 %vm107_vm2, %v2230_v54 }
 0xfb8   :  { %6650 = vmatpush3.bf16.xpose.msra.mxu1 %v2288_v56  ;;  %6651 = vmatprep.mubr.msk.bf16.mxu1 %vm7332_vm0, %v7331_v0 }
 0xfb9   :  { %6657 = vmatprep.mubr.msk.bf16.mxu0 %vm7332_vm0, %v7331_v0  ;;  %6661 = vmatprep.subr.bf16.mxu1 %v7331_v0 }
 0xfba   :  { %v2334_v45 = vpop.permute.xlu1 %2333 }
 0xfbb   :  { %v2339_v46 = vsel %vm107_vm2, %v2334_v45, 0 }
 0xfbc   :  { %6656 = vmatpush3.bf16.xpose.msra.mxu0 %v2339_v46 }
 0xfbd   :  { %6667 = vmatprep.subr.bf16.mxu0 %v7331_v0 }
 0xfbf   :  { %6652 = vmatmul.mubr.msk.bf16.vlgmr.msra.gmra.mrb[68].mxu1 %vm107_vm2, %v2281_v57 }
 0xfc0   :  { %6663 = vmatprep.mubr.msk.bf16.mxu1 %vm7332_vm0, %v7331_v0 }
 0xfc3   :  { %6658 = vmatmul.mubr.msk.bf16.vlgmr.msra.gmra.mrb[64].mxu0 %vm107_vm2, %v2332_v58 }
 0xfc4   :  { %6669 = vmatprep.mubr.msk.bf16.mxu0 %vm7332_vm0, %v7331_v0 }
0x1009   :  { %v7893_v59 = vpop.f32.mrb[56].mxu0 }
0x100a   :  { %v6627_v60 = vpop.f32.mrb[57].mxu0 }
0x100b   :  { %v7895_v61 = vpop.f32.mrb[58].mxu0 }
0x100c   :  { %v6628_v62 = vpop.f32.mrb[59].mxu0 }
0x108a   :  { %v2222_v1 = vpop.f32.mrb[64].mxu1  ;;  %v2273_v2 = vpop.f32.mrb[60].mxu0 }
0x108b   :  { %v2382_v6 = vadd.f32 %v2222_v1, %v2106_v63  ;;  %v6641_v7 = vpop.f32.mrb[65].mxu1  ;;  %v6647_v8 = vpop.f32.mrb[61].mxu0  ;;  %v2384_v17 = vadd.f32 %v2273_v2, %v2106_v63 }
0x108c   :  { %v2225_v9 = vpop.f32.mrb[66].mxu1  ;;  %v2276_v10 = vpop.f32.mrb[62].mxu0 }
0x108d   :  { %v2383_v11 = vadd.f32 %v2225_v9, %v2107_v5  ;;  %v2385_v12 = vadd.f32 %v2276_v10, %v2107_v5  ;;  %v6642_v14 = vpop.f32.mrb[67].mxu1  ;;  %v6648_v15 = vpop.f32.mrb[63].mxu0  ;;  %v2390_v16 = vsel %vm316_vm3, %v2382_v6, -inf  ;;  %v2396_v23 = vsel %vm316_vm3, %v2384_v17, -inf }
0x108e   :  { %2391 = vmax.xlane.f32.xlu1 %v2390_v16 }
0x108f   :  { %v2393_v18 = vsel %vm316_vm3, %v2383_v11, -inf  ;;  %v2399_v19 = vsel %vm316_vm3, %v2385_v12, -inf }
0x1090   :  { %2394 = vmax.xlane.f32.xlu0 %v2393_v18 }
0x1092   :  { %v2324_v20 = vpop.f32.mrb[68].mxu1  ;;  %2400 = vmax.xlane.f32.xlu1 %v2399_v19 }
0x1093   :  { %v2386_v21 = vadd.f32 %v2324_v20, %v2106_v63  ;;  %v6653_v3 = vpop.f32.mrb[69].mxu1 }
0x1094   :  { %v2327_v24 = vpop.f32.mrb[70].mxu1  ;;  %2397 = vmax.xlane.f32.xlu0 %v2396_v23 }
0x1095   :  { %v2387_v26 = vadd.f32 %v2327_v24, %v2107_v5  ;;  %v6654_v30 = vpop.f32.mrb[71].mxu1  ;;  %v2402_v13 = vsel %vm316_vm3, %v2386_v21, -inf }
0x1096   :  { %v2375_v31 = vpop.f32.mrb[64].mxu0 }
0x1097   :  { %v2388_v32 = vadd.f32 %v2375_v31, %v2106_v63  ;;  %v6659_v33 = vpop.f32.mrb[65].mxu0  ;;  %v2405_v34 = vsel %vm316_vm3, %v2387_v26, -inf }
0x1098   :  { %2403 = vmax.xlane.f32.xlu0 %v2402_v13  ;;  %2406 = vmax.xlane.f32.xlu1 %v2405_v34  ;;  %v2378_v35 = vpop.f32.mrb[66].mxu0 }
0x1099   :  { %v2389_v36 = vadd.f32 %v2378_v35, %v2107_v5  ;;  %v6660_v25 = vpop.f32.mrb[67].mxu0  ;;  %v2408_v37 = vsel %vm316_vm3, %v2388_v32, -inf }
0x109b   :  { %v2411_v38 = vsel %vm316_vm3, %v2389_v36, -inf }
0x109c   :  { %2409 = vmax.xlane.f32.xlu0 %v2408_v37  ;;  %2412 = vmax.xlane.f32.xlu1 %v2411_v38 }
0x111b   :  { %v2392_v39 = vpop.xlane.xlu1 %2391 }
0x111c   :  { %v2414_v40 = vsub.f32 %v2382_v6, %v2392_v39 }
0x111d   :  { %v2395_v41 = vpop.xlane.xlu0 %2394 }
0x111e   :  { %v2422_v42 = vmul.f32 1.442695, %v2414_v40  ;;  %v2415_v27 = vsub.f32 %v2383_v11, %v2395_v41 }
0x111f   :  { %v2401_v43 = vpop.xlane.xlu1 %2400 }
0x1120   :  { %7147 = vpow2.f32 %v2422_v42  ;;  %v2424_v44 = vmul.f32 1.442695, %v2415_v27  ;;  %v2417_v47 = vsub.f32 %v2385_v12, %v2401_v43 }
0x1121   :  { %v2398_v48 = vpop.xlane.xlu0 %2397 }
0x1122   :  { %7149 = vpow2.f32 %v2424_v44  ;;  %v2428_v50 = vmul.f32 1.442695, %v2417_v47  ;;  %v2416_v51 = vsub.f32 %v2384_v17, %v2398_v48 }
0x1124   :  { %7151 = vpow2.f32 %v2428_v50  ;;  %v2426_v52 = vmul.f32 1.442695, %v2416_v51 }
0x1125   :  { %v2404_v53 = vpop.xlane.xlu0 %2403  ;;  %v2407_v5 = vpop.xlane.xlu1 %2406 }
0x1126   :  { %7153 = vpow2.f32 %v2426_v52  ;;  %v2418_v54 = vsub.f32 %v2386_v21, %v2404_v53  ;;  %v2419_v6 = vsub.f32 %v2387_v26, %v2407_v5  ;;  %v6106_v21 = vld [vmem:[%s8693_s6 + $0xb] ss:$0 sm:$0xff] }
0x1127   :  { %v2050_v3 = vadd.f32 %v6106_v21, %v7893_v59  ;;  %v2053_v23 = vadd.f32 %v6106_v21, %v7895_v61  ;;  %v2741_v21 = vld [vmem:[%s8692_s5 + $0xdc] sm:$0xf] }
0x1128   :  { %v2430_v55 = vmul.f32 1.442695, %v2418_v54  ;;  %v2432_v10 = vmul.f32 1.442695, %v2419_v6 }
0x1129   :  { %v2410_v7 = vpop.xlane.xlu0 %2409  ;;  %v2413_v8 = vpop.xlane.xlu1 %2412  ;;  %v7957_v24 = vadd.f32 %v2050_v3, %v7807_v4  ;;  %v7960_v26 = vadd.f32 %v2053_v23, %v7809_v22 }
0x112a   :  { %v7911_v56 = vpop.eup %7147  ;;  %7155 = vpow2.f32 %v2430_v55  ;;  %v2420_v9 = vsub.f32 %v2388_v32, %v2410_v7  ;;  %v2421_v11 = vsub.f32 %v2389_v36, %v2413_v8 }
0x112b   :  { %v2438_v45 = vsel %vm316_vm3, %v7911_v56, 0.0  ;;  %7157 = vpow2.f32 %v2432_v10  ;;  %v2061_v30 = vsel %vm58_vm1, %v7960_v26, 0.0  ;;  %v2066_v31 = vmul.f32 %v7957_v24, %v7957_v24 }
0x112c   :  { %v7915_v46 = vpop.eup %7149  ;;  %2439 = vadd.xlane.f32.xlu0 %v2438_v45  ;;  %v2434_v12 = vmul.f32 1.442695, %v2420_v9  ;;  %v2436_v14 = vmul.f32 1.442695, %v2421_v11  ;;  %v2067_v59 = vmul.f32 %v7960_v26, %v7960_v26 }
0x112d   :  { %v2441_v57 = vsel %vm316_vm3, %v7915_v46, 0.0  ;;  %v2068_v4 = vsel %vm58_vm1, %v2066_v31, 0.0  ;;  %v2746_v31 = vsel %vm470_vm4, %v2741_v21, 0 }
0x112e   :  { %v7919_v58 = vpop.eup %7151  ;;  %2442 = vadd.xlane.f32.xlu1 %v2441_v57  ;;  %7159 = vpow2.f32 %v2434_v12  ;;  %v2071_v61 = vsel %vm58_vm1, %v2067_v59, 0.0 }
0x112f   :  { %v2447_v63 = vsel %vm316_vm3, %v7919_v58, 0.0  ;;  %7161 = vpow2.f32 %v2436_v14  ;;  %v2643_v14 = vld [vmem:[%s8692_s5 + $0x80] sm:$0xf] }
0x1130   :  { %v7921_v60 = vpop.eup %7153 }
0x1131   :  { %v2444_v62 = vsel %vm316_vm3, %v7921_v60, 0.0 }
0x1132   :  { %2445 = vadd.xlane.f32.xlu0 %v2444_v62  ;;  %2448 = vadd.xlane.f32.xlu1 %v2447_v63 }
0x1134   :  { %v7927_v1 = vpop.eup %7155 }
0x1135   :  { %v2450_v2 = vsel %vm316_vm3, %v7927_v1, 0.0  ;;  %v7935_v15 = vpop.eup %7157 }
0x1136   :  { %2451 = vadd.xlane.f32.xlu0 %v2450_v2  ;;  %v2453_v17 = vsel %vm316_vm3, %v7935_v15, 0.0 }
0x1138   :  { %v7937_v16 = vpop.eup %7159 }
0x1139   :  { %v7941_v18 = vpop.eup %7161  ;;  %v2456_v19 = vsel %vm316_vm3, %v7937_v16, 0.0 }
0x113a   :  { %v2459_v20 = vsel %vm316_vm3, %v7941_v18, 0.0 }
0x1143   :  { %2595 = vrot.lane.b32.xlu1 %v7856_v49, %s7340_s2 }
0x114c   :  { %2491 = vrot.lane.b32.xlu0 %v7856_v49, %s7341_s21 }
0x1167   :  { %2454 = vadd.xlane.f32.xlu1 %v2453_v17 }
0x116b   :  { %2457 = vadd.xlane.f32.xlu0 %v2456_v19  ;;  %2460 = vadd.xlane.f32.xlu1 %v2459_v20  ;;  %v2648_v19 = vsel %vm470_vm4, %v2643_v14, 0 }
0x117c   :  { %2693 = vrot.lane.b32.xlu1 %v7856_v49, %s7342_s22 }
0x1181   :  { %2791 = vrot.lane.b32.xlu0 %v7856_v49, %s7343_s23  ;;  %v2058_v49 = vsel %vm58_vm1, %v7957_v24, 0.0 }
0x11a0   :  { %2062 = vadd.xlane.f32.xlu0 %v2061_v30  ;;  %2059 = vadd.xlane.f32.xlu1 %v2058_v49 }
0x11a4   :  { %2069 = vadd.xlane.f32.xlu0 %v2068_v4  ;;  %2072 = vadd.xlane.f32.xlu1 %v2071_v61 }
0x11b9   :  { %v2440_v22 = vpop.xlane.xlu0 %2439 }
0x11ba   :  { %v2462_v32 = vadd.f32 1e-30, %v2440_v22 }
0x11bb   :  { %v2443_v33 = vpop.xlane.xlu1 %2442 }
0x11bc   :  { %7163 = vrcp.f32 %v2462_v32  ;;  %v2463_v13 = vadd.f32 1e-30, %v2443_v33 }
0x11be   :  { %7165 = vrcp.f32 %v2463_v13 }
0x11bf   :  { %v2446_v34 = vpop.xlane.xlu0 %2445  ;;  %v2449_v35 = vpop.xlane.xlu1 %2448 }
0x11c0   :  { %v2464_v36 = vadd.f32 1e-30, %v2446_v34  ;;  %v2465_v25 = vadd.f32 1e-30, %v2449_v35 }
0x11c2   :  { %7167 = vrcp.f32 %v2464_v36 }
0x11c3   :  { %7169 = vrcp.f32 %v2465_v25  ;;  %v2452_v37 = vpop.xlane.xlu0 %2451  ;;  %v2596_v47 = vpop.permute.xlu1 %2595 }
0x11c4   :  { %v2466_v52 = vadd.f32 1e-30, %v2452_v37 }
0x11c6   :  { %v7164_v38 = vpop.eup %7163  ;;  %7171 = vrcp.f32 %v2466_v52 }
0x11c7   :  { %v2492_v39 = vpop.permute.xlu0 %2491  ;;  %v2478_v41 = vmul.f32 %v7164_v38, %v7911_v56 }
0x11c8   :  { %v7166_v40 = vpop.eup %7165  ;;  %6662 = vmatpush3.bf16.msra.mxu1 %v2492_v39 }
0x11c9   :  { %v2479_v42 = vmul.f32 %v7166_v40, %v7915_v46  ;;  %6673 = vmatprep.subr.bf16.mxu1 %v7331_v0 }
0x11cb   :  { %v2486_v27 = vpack.c.bf16 %v2479_v42, %v2478_v41  ;;  %v2839_v41 = vld [vmem:[%s8692_s5 + $0x138] sm:$0xf] }
0x11cc   :  { %v7168_v43 = vpop.eup %7167 }
0x11cd   :  { %v7170_v44 = vpop.eup %7169  ;;  %6664 = vmatmul.mubr.msk.bf16.vlgmr.msra.gmra.mrb[72].mxu1 %vm316_vm3, %v2486_v27  ;;  %v2480_v48 = vmul.f32 %v7168_v43, %v7921_v60 }
0x11ce   :  { %6674 = vmatpush3.bf16.msra.mxu1 %v2596_v47  ;;  %6675 = vmatprep.mubr.msk.bf16.mxu1 %vm7332_vm0, %v7331_v0  ;;  %v2481_v50 = vmul.f32 %v7170_v44, %v7919_v58 }
0x11cf   :  { %6685 = vmatprep.subr.bf16.mxu1 %v7331_v0 }
0x11d0   :  { %v2487_v51 = vpack.c.bf16 %v2481_v50, %v2480_v48  ;;  %v7172_v58 = vpop.eup %7171  ;;  %v2844_v48 = vsel %vm470_vm4, %v2839_v41, 0 }
0x11d1   :  { %v2482_v62 = vmul.f32 %v7172_v58, %v7927_v1  ;;  %v2539_v1 = vld [vmem:[%s8692_s5 + $0x24] sm:$0xf] }
0x11d2   :  { %v2544_v11 = vsel %vm470_vm4, %v2539_v1, 0  ;;  %v6124_v1 = vld [vmem:[%s8693_s6 + $0x11] ss:$0 sm:$0xff] }
0x11d3   :  { %6668 = vmatpush3.bf16.msra.mxu0 %v2544_v11 }
0x11d4   :  { %6679 = vmatprep.subr.bf16.mxu0 %v7331_v0 }
0x11d5   :  { %6676 = vmatmul.mubr.msk.bf16.vlgmr.msra.gmra.mrb[76].mxu1 %vm316_vm3, %v2487_v51 }
0x11d6   :  { %6687 = vmatprep.mubr.msk.bf16.mxu1 %vm7332_vm0, %v7331_v0 }
0x11f4   :  { %v2455_v53 = vpop.xlane.xlu1 %2454 }
0x11f5   :  { %v2467_v54 = vadd.f32 1e-30, %v2455_v53 }
0x11f7   :  { %7173 = vrcp.f32 %v2467_v54 }
0x11f8   :  { %v2458_v55 = vpop.xlane.xlu0 %2457  ;;  %v2461_v56 = vpop.xlane.xlu1 %2460 }
0x11f9   :  { %v2468_v45 = vadd.f32 1e-30, %v2458_v55  ;;  %v2469_v46 = vadd.f32 1e-30, %v2461_v56  ;;  %v6112_v56 = vld [vmem:[%s8693_s6 + $0xe] ss:$0 sm:$0xff] }
0x11fb   :  { %7175 = vrcp.f32 %v2468_v45 }
0x11fc   :  { %7177 = vrcp.f32 %v2469_v46  ;;  %v2694_v57 = vpop.permute.xlu1 %2693  ;;  %v2792_v7 = vpop.permute.xlu0 %2791 }
0x11fd   :  { %6686 = vmatpush3.bf16.msra.mxu1 %v2694_v57 }
0x11fe   :  { %6697 = vmatprep.subr.bf16.mxu1 %v7331_v0 }
0x1201   :  { %v7174_v60 = vpop.eup %7173 }
0x1202   :  { %v2483_v63 = vmul.f32 %v7174_v60, %v7935_v15 }
0x1204   :  { %v2488_v2 = vpack.c.bf16 %v2483_v63, %v2482_v62  ;;  %v6113_v62 = vld [vmem:[%s8693_s6 + $0xf] ss:$0 sm:$0xff]  ;;  %v7048_v63 = vld [vmem:[%s8692_s5 + $0xe4] ss:$92 sps:$4 sm:$0xff]  }
0x1205   :  { %v7176_v5 = vpop.eup %7175 }
0x1206   :  { %v7178_v6 = vpop.eup %7177  ;;  %6688 = vmatmul.mubr.msk.bf16.vlgmr.msra.gmra.mrb[80].mxu1 %vm316_vm3, %v2488_v2  ;;  %v2484_v8 = vmul.f32 %v7176_v5, %v7937_v16 }
0x1207   :  { %6698 = vmatpush3.bf16.msra.mxu1 %v2792_v7  ;;  %6699 = vmatprep.mubr.msk.bf16.mxu1 %vm7332_vm0, %v7331_v0  ;;  %v2485_v9 = vmul.f32 %v7178_v6, %v7941_v18 }
0x1208   :  { %6709 = vmatprep.subr.bf16.mxu1 %v7331_v0 }
0x1209   :  { %v2489_v10 = vpack.c.bf16 %v2485_v9, %v2484_v8 }
0x120e   :  { %6700 = vmatmul.mubr.msk.bf16.vlgmr.msra.gmra.mrb[84].mxu1 %vm316_vm3, %v2489_v10 }
0x120f   :  { %6713 = vmatprep.mubr.msk.bf16.mxu1 %vm7332_vm0, %v7331_v0 }
0x122d   :  { %v2063_v59 = vpop.xlane.xlu0 %2062  ;;  %v2060_v4 = vpop.xlane.xlu1 %2059 }
0x122e   :  { %v2064_v22 = vmul.f32 0.03125, %v2060_v4  ;;  %v2065_v33 = vmul.f32 0.03125, %v2063_v59 }
0x1230   :  { %v2076_v35 = vmul.f32 %v2064_v22, %v2064_v22  ;;  %v2077_v36 = vmul.f32 %v2065_v33, %v2065_v33  ;;  %v2081_v51 = vsub.f32 %v7960_v26, %v2065_v33  ;;  %v2080_v52 = vsub.f32 %v7957_v24, %v2064_v22  ;;  %v7047_v24 = vld [vmem:[%s8692_s5 + $0x2c] ss:$92 sps:$4 sm:$0xff]  }
0x1231   :  { %v2070_v61 = vpop.xlane.xlu0 %2069  ;;  %v2073_v32 = vpop.xlane.xlu1 %2072 }
0x1232   :  { %v2074_v13 = vmul.f32 0.03125, %v2070_v61  ;;  %v2075_v34 = vmul.f32 0.03125, %v2073_v32 }
0x1234   :  { %v2078_v25 = vsub.f32 %v2074_v13, %v2076_v35  ;;  %v2079_v37 = vsub.f32 %v2075_v34, %v2077_v36 }
0x1236   :  { %v2082_v38 = vadd.f32 1e-05, %v2078_v25  ;;  %v2083_v39 = vadd.f32 1e-05, %v2079_v37  ;;  %v6137_v37 = vld [vmem:[%s8693_s6 + $0x13] ss:$0 sm:$0xff] }
0x1238   :  { %7179 = vrsqrt.f32 %v2082_v38 }
0x1239   :  { %7181 = vrsqrt.f32 %v2083_v39 }
0x1242   :  { %v7180_v43 = vpop.eup %7179 }
0x1243   :  { %v7182_v50 = vpop.eup %7181  ;;  %v2086_v53 = vmul.f32 %v7180_v43, %v2080_v52 }
0x1244   :  { %v2087_v54 = vmul.f32 %v7182_v50, %v2081_v51 }
0x1245   :  { %v2095_v58 = vmul.f32 %v6112_v56, %v2086_v53 }
0x1246   :  { %v2096_v60 = vmul.f32 %v6112_v56, %v2087_v54 }
0x1247   :  { %v2104_v2 = vadd.f32 %v6113_v62, %v2095_v58 }
0x1248   :  { %v2105_v5 = vadd.f32 %v6113_v62, %v2096_v60 }
0x124a   :  { %v8043_v6 = vpack.c.bf16 %v2105_v5, %v2104_v2  ;;  %v6131_v5 = vld [vmem:[%s8693_s6 + $0x17] ss:$0 sm:$0xff] }
0x12a0   :  { %v2531_v12 = vpop.f32.mrb[72].mxu1 }
0x12a1   :  { %v6665_v15 = vpop.f32.mrb[73].mxu1 }
0x12a2   :  { %v2534_v16 = vpop.f32.mrb[74].mxu1 }
0x12a3   :  { %v2538_v17 = vpack.c.bf16 %v2534_v16, %v2531_v12  ;;  %v6666_v18 = vpop.f32.mrb[75].mxu1 }
0x12a5   :  { %6670 = vmatmul.mubr.msk.bf16.vlgmr.msra.gmra.mrb[68].mxu0 %vm107_vm2, %v2538_v17 }
0x12a6   :  { %6680 = vmatpush3.bf16.msra.mxu0 %v2648_v19  ;;  %6681 = vmatprep.mubr.msk.bf16.mxu0 %vm7332_vm0, %v7331_v0 }
0x12a7   :  { %6691 = vmatprep.subr.bf16.mxu0 %v7331_v0 }
0x12a8   :  { %v2635_v20 = vpop.f32.mrb[76].mxu1 }
0x12a9   :  { %v6677_v3 = vpop.f32.mrb[77].mxu1 }
0x12aa   :  { %v2638_v23 = vpop.f32.mrb[78].mxu1 }
0x12ab   :  { %v2642_v30 = vpack.c.bf16 %v2638_v23, %v2635_v20  ;;  %v6678_v49 = vpop.f32.mrb[79].mxu1 }
0x12ad   :  { %6682 = vmatmul.mubr.msk.bf16.vlgmr.msra.gmra.mrb[72].mxu0 %vm107_vm2, %v2642_v30 }
0x12ae   :  { %6692 = vmatpush3.bf16.msra.mxu0 %v2746_v31  ;;  %6693 = vmatprep.mubr.msk.bf16.mxu0 %vm7332_vm0, %v7331_v0 }
0x12af   :  { %6703 = vmatprep.subr.bf16.mxu0 %v7331_v0 }
0x12d9   :  { %v2733_v40 = vpop.f32.mrb[80].mxu1 }
0x12da   :  { %v6689_v42 = vpop.f32.mrb[81].mxu1 }
0x12db   :  { %v2736_v27 = vpop.f32.mrb[82].mxu1 }
0x12dc   :  { %v2740_v44 = vpack.c.bf16 %v2736_v27, %v2733_v40  ;;  %v6690_v47 = vpop.f32.mrb[83].mxu1 }
0x12dd   :  { %v7050_v47 = vld [vmem:[%s8692_s5 + $0xe0] ss:$92 sps:$4 sm:$0xff]  }
0x12de   :  { %6694 = vmatmul.mubr.msk.bf16.vlgmr.msra.gmra.mrb[76].mxu0 %vm107_vm2, %v2740_v44  ;;  %v7049_v44 = vld [vmem:[%s8692_s5 + $0x28] ss:$92 sps:$4 sm:$0xff]  }
0x12df   :  { %6704 = vmatpush3.bf16.msra.mxu0 %v2844_v48  ;;  %6705 = vmatprep.mubr.msk.bf16.mxu0 %vm7332_vm0, %v7331_v0 }
0x12e0   :  { %6717 = vmatprep.subr.bf16.mxu0 %v7331_v0  ;;  %6710 = vmatpush3.bf16.msra.mxu1 %v7049_v44 }
0x12e1   :  { %v2831_v55 = vpop.f32.mrb[84].mxu1  ;;  %6711 = vmatprep.subr.bf16.mxu1 %v7331_v0 }
0x12e2   :  { %v6701_v45 = vpop.f32.mrb[85].mxu1 }
0x12e3   :  { %v2834_v46 = vpop.f32.mrb[86].mxu1 }
0x12e4   :  { %v2838_v26 = vpack.c.bf16 %v2834_v46, %v2831_v55  ;;  %v6702_v57 = vpop.f32.mrb[87].mxu1  ;;  %6712 = vmatpush3.bf16.msra.mxu1 %v7050_v47 }
0x12e5   :  { %6725 = vmatprep.subr.bf16.mxu1 %v7331_v0 }
0x12e6   :  { %6706 = vmatmul.mubr.msk.bf16.vlgmr.msra.gmra.mrb[80].mxu0 %vm107_vm2, %v2838_v26 }
0x12e7   :  { %6718 = vmatpush3.bf16.msra.mxu0 %v7047_v24  ;;  %6721 = vmatprep.mubr.msk.bf16.mxu0 %vm7332_vm0, %v7331_v0 }
0x12e8   :  { %6719 = vmatprep.subr.bf16.mxu0 %v7331_v0 }
0x12eb   :  { %6720 = vmatpush3.bf16.msra.mxu0 %v7048_v63 }
0x12ec   :  { %6731 = vmatprep.subr.bf16.mxu0 %v7331_v0 }
0x12ee   :  { %6722 = vmatmul.mubr.msk.bf16.vlgmr.msra.gmra.mrb[84].mxu0 %vm58_vm1, %v8043_v6 }
0x12ef   :  { %6733 = vmatprep.mubr.msk.bf16.mxu0 %vm7332_vm0, %v7331_v0 }
0x1378   :  { %v2580_v7 = vpop.f32.mrb[68].mxu0 }
0x1379   :  { %v6671_v8 = vpop.f32.mrb[69].mxu0  ;;  %v2593_v11 = vadd.f32 %v6124_v1, %v2580_v7 }
0x137a   :  { %v2583_v9 = vpop.f32.mrb[70].mxu0 }
0x137b   :  { %v6672_v10 = vpop.f32.mrb[71].mxu0  ;;  %v2594_v14 = vadd.f32 %v6124_v1, %v2583_v9 }
0x1380   :  { %v2684_v12 = vpop.f32.mrb[72].mxu0 }
0x1381   :  { %v2691_v15 = vadd.f32 %v2684_v12, %v2593_v11  ;;  %v6683_v16 = vpop.f32.mrb[73].mxu0  ;;  %v6132_v11 = vld [vmem:[%s8693_s6 + $0x18] ss:$0 sm:$0xff] }
0x1382   :  { %v2687_v17 = vpop.f32.mrb[74].mxu0 }
0x1383   :  { %v2692_v18 = vadd.f32 %v2687_v17, %v2594_v14  ;;  %v6684_v19 = vpop.f32.mrb[75].mxu0 }
0x13b1   :  { %v2782_v20 = vpop.f32.mrb[76].mxu0 }
0x13b2   :  { %v2789_v21 = vadd.f32 %v2782_v20, %v2691_v15  ;;  %v6695_v3 = vpop.f32.mrb[77].mxu0 }
0x13b3   :  { %v2785_v23 = vpop.f32.mrb[78].mxu0 }
0x13b4   :  { %v2790_v30 = vadd.f32 %v2785_v23, %v2692_v18  ;;  %v6696_v49 = vpop.f32.mrb[79].mxu0  ;;  %v6133_v18 = vld [vmem:[%s8693_s6 + $0x12] ss:$0 sm:$0xff] }
0x13b9   :  { %v2880_v31 = vpop.f32.mrb[80].mxu0 }
0x13ba   :  { %v2887_v59 = vadd.f32 %v2880_v31, %v2789_v21  ;;  %v6707_v4 = vpop.f32.mrb[81].mxu0 }
0x13bb   :  { %v2883_v61 = vpop.f32.mrb[82].mxu0 }
0x13bc   :  { %v2889_v22 = vadd.f32 %v2887_v59, %v7825_v28  ;;  %v2888_v32 = vadd.f32 %v2883_v61, %v2790_v30  ;;  %v6708_v33 = vpop.f32.mrb[83].mxu0 }
0x13be   :  { %v2890_v13 = vadd.f32 %v2888_v32, %v7830_v29  ;;  %v2891_v34 = vsel %vm58_vm1, %v2889_v22, 0.0  ;;  %v2899_v35 = vmul.f32 %v2889_v22, %v2889_v22 }
0x13bf   :  { %2892 = vadd.xlane.f32.xlu0 %v2891_v34 }
0x13c0   :  { %v2894_v36 = vsel %vm58_vm1, %v2890_v13, 0.0  ;;  %v2900_v25 = vmul.f32 %v2890_v13, %v2890_v13  ;;  %v2901_v28 = vsel %vm58_vm1, %v2899_v35, 0.0  ;;  %v2109_v35 = vld [vmem:[%s8691_s4 + $0x8] sm:$0xff] }
0x13c1   :  { %2895 = vadd.xlane.f32.xlu1 %v2894_v36  ;;  %v3068_v38 = vpop.f32.mrb[84].mxu0 }
0x13c2   :  { %v6723_v39 = vpop.f32.mrb[85].mxu0  ;;  %v3069_v41 = vadd.f32 %v6137_v37, %v3068_v38  ;;  %v2904_v27 = vsel %vm58_vm1, %v2900_v25, 0.0 }
0x13c3   :  { %2902 = vadd.xlane.f32.xlu0 %v2901_v28  ;;  %v3071_v40 = vpop.f32.mrb[86].mxu0 }
0x13c4   :  { %v3072_v29 = vadd.f32 %v6137_v37, %v3071_v40  ;;  %v6724_v42 = vpop.f32.mrb[87].mxu0 }
0x13c5   :  { %2905 = vadd.xlane.f32.xlu1 %v2904_v27 }
0x13c6   :  { %v8062_v43 = vpack.c.bf16 %v3072_v29, %v3069_v41 }
0x13c8   :  { %v3081_v17 = vsel %vm107_vm2, %v8062_v43, 0 }
0x13d9   :  { %3128 = vrot.lane.b32.xlu0 %v8062_v43, %s7333_s0 }
0x144c   :  { %v2893_v48 = vpop.xlane.xlu0 %2892 }
0x144d   :  { %v2897_v50 = vmul.f32 0.03125, %v2893_v48 }
0x144e   :  { %v2896_v51 = vpop.xlane.xlu1 %2895 }
0x144f   :  { %v2898_v52 = vmul.f32 0.03125, %v2896_v51  ;;  %v2909_v54 = vmul.f32 %v2897_v50, %v2897_v50  ;;  %v2913_v63 = vsub.f32 %v2889_v22, %v2897_v50 }
0x1450   :  { %v2903_v53 = vpop.xlane.xlu0 %2902 }
0x1451   :  { %v2907_v55 = vmul.f32 0.03125, %v2903_v53  ;;  %v2910_v45 = vmul.f32 %v2898_v52, %v2898_v52  ;;  %v2914_v7 = vsub.f32 %v2890_v13, %v2898_v52  ;;  %v2108_v13 = vld [vmem:[%s8691_s4] sm:$0xff] }
0x1452   :  { %v2906_v56 = vpop.xlane.xlu1 %2905 }
0x1453   :  { %v2911_v46 = vsub.f32 %v2907_v55, %v2909_v54  ;;  %v2908_v24 = vmul.f32 0.03125, %v2906_v56 }
0x1454   :  { %v3129_v26 = vpop.permute.xlu0 %3128 }
0x1455   :  { %v2915_v57 = vadd.f32 1e-05, %v2911_v46  ;;  %v2912_v58 = vsub.f32 %v2908_v24, %v2910_v45  ;;  %v3134_v60 = vsel %vm107_vm2, %v3129_v26, 0 }
0x1456   :  { %6732 = vmatpush3.bf16.xpose.msra.mxu0 %v3134_v60 }
0x1457   :  { %7183 = vrsqrt.f32 %v2915_v57  ;;  %v2916_v62 = vadd.f32 1e-05, %v2912_v58  ;;  %6743 = vmatprep.subr.bf16.mxu0 %v7331_v0 }
0x1459   :  { %7185 = vrsqrt.f32 %v2916_v62 }
0x1461   :  { %v7184_v2 = vpop.eup %7183 }
0x1462   :  { %v2919_v8 = vmul.f32 %v7184_v2, %v2913_v63 }
0x1463   :  { %v7186_v9 = vpop.eup %7185 }
0x1464   :  { %v2920_v10 = vmul.f32 %v7186_v9, %v2914_v7  ;;  %v2928_v1 = vmul.f32 %v6131_v5, %v2919_v8 }
0x1466   :  { %v2929_v12 = vmul.f32 %v6131_v5, %v2920_v10  ;;  %v8082_v14 = vadd.f32 %v6132_v11, %v2928_v1 }
0x1468   :  { %v8084_v15 = vadd.f32 %v6132_v11, %v2929_v12 }
0x146a   :  { %v2939_v16 = vpack.c.bf16 %v8084_v15, %v8082_v14 }
0x146c   :  { %6714 = vmatmul.mubr.msk.bf16.vlgmr.msra.gmra.mrb[88].mxu1 %vm58_vm1, %v2939_v16 }
0x146d   :  { %6726 = vmatpush3.bf16.xpose.msra.mxu1 %v3081_v17  ;;  %6727 = vmatprep.mubr.msk.bf16.mxu1 %vm7332_vm0, %v7331_v0 }
0x146e   :  { %6737 = vmatprep.subr.bf16.mxu1 %v7331_v0 }
0x153f   :  { %v3000_v19 = vpop.f32.mrb[88].mxu1 }
0x1540   :  { %v6715_v20 = vpop.f32.mrb[89].mxu1  ;;  %v3001_v3 = vadd.f32 %v6133_v18, %v3000_v19 }
0x1541   :  { %v3003_v21 = vpop.f32.mrb[90].mxu1 }
0x1542   :  { %v3004_v23 = vadd.f32 %v6133_v18, %v3003_v21  ;;  %v6716_v30 = vpop.f32.mrb[91].mxu1 }
0x1544   :  { %v3075_v49 = vpack.c.bf16 %v3004_v23, %v3001_v3 }
0x1546   :  { %3125 = vrot.lane.b32.xlu1 %v3075_v49, %s7333_s0  ;;  %3177 = vrot.lane.b32.xlu0 %v3075_v49, %s7338_s15 }
0x1547   :  { %6728 = vmatmul.mubr.msk.bf16.vlgmr.msra.gmra.mrb[92].mxu1 %vm107_vm2, %v3075_v49 }
0x1548   :  { %6739 = vmatprep.mubr.msk.bf16.mxu1 %vm7332_vm0, %v7331_v0 }
0x154a   :  { %3179 = vrot.lane.b32.xlu1 %v8062_v43, %s7338_s15  ;;  %3228 = vrot.lane.b32.xlu0 %v3075_v49, %s7339_s16 }
0x154e   :  { %3230 = vrot.lane.b32.xlu1 %v8062_v43, %s7339_s16 }
0x15b8   :  { %v3126_v31 = vpop.permute.xlu1 %3125  ;;  %v3178_v32 = vpop.permute.xlu0 %3177 }
0x15b9   :  { %6734 = vmatmul.mubr.msk.bf16.vlgmr.msra.gmra.mrb[88].mxu0 %vm107_vm2, %v3126_v31 }
0x15ba   :  { %6745 = vmatprep.mubr.msk.bf16.mxu0 %vm7332_vm0, %v7331_v0 }
0x15bc   :  { %v3180_v59 = vpop.permute.xlu1 %3179  ;;  %v3229_v33 = vpop.permute.xlu0 %3228 }
0x15bd   :  { %v3185_v4 = vsel %vm107_vm2, %v3180_v59, 0 }
0x15be   :  { %6738 = vmatpush3.bf16.xpose.msra.mxu1 %v3185_v4 }
0x15bf   :  { %6749 = vmatprep.subr.bf16.mxu1 %v7331_v0 }
0x15c0   :  { %v3231_v61 = vpop.permute.xlu1 %3230 }
0x15c1   :  { %v3236_v22 = vsel %vm107_vm2, %v3231_v61, 0 }
0x15c2   :  { %6744 = vmatpush3.bf16.xpose.msra.mxu0 %v3236_v22 }
0x15c3   :  { %6755 = vmatprep.subr.bf16.mxu0 %v7331_v0 }
0x15c5   :  { %6740 = vmatmul.mubr.msk.bf16.vlgmr.msra.gmra.mrb[96].mxu1 %vm107_vm2, %v3178_v32 }
0x15c6   :  { %6751 = vmatprep.mubr.msk.bf16.mxu1 %vm7332_vm0, %v7331_v0 }
0x15c9   :  { %6746 = vmatmul.mubr.msk.bf16.vlgmr.msra.gmra.mrb[92].mxu0 %vm107_vm2, %v3229_v33 }
0x15ca   :  { %6757 = vmatprep.mubr.msk.bf16.mxu0 %vm7332_vm0, %v7331_v0 }
0x161a   :  { %v3117_v34 = vpop.f32.mrb[92].mxu1 }
0x161b   :  { %v3279_v36 = vadd.f32 %v3117_v34, %v2108_v13  ;;  %v6729_v25 = vpop.f32.mrb[93].mxu1 }
0x161c   :  { %v3120_v37 = vpop.f32.mrb[94].mxu1 }
0x161d   :  { %v3280_v38 = vadd.f32 %v3120_v37, %v2109_v35  ;;  %v6730_v39 = vpop.f32.mrb[95].mxu1  ;;  %v3287_v28 = vsel %vm316_vm3, %v3279_v36, -inf }
0x161e   :  { %3288 = vmax.xlane.f32.xlu1 %v3287_v28 }
0x161f   :  { %v3290_v40 = vsel %vm316_vm3, %v3280_v38, -inf }
0x1620   :  { %3291 = vmax.xlane.f32.xlu0 %v3290_v40 }
0x168c   :  { %v3170_v41 = vpop.f32.mrb[88].mxu0 }
0x168d   :  { %v3281_v29 = vadd.f32 %v3170_v41, %v2108_v13  ;;  %v6735_v42 = vpop.f32.mrb[89].mxu0 }
0x168e   :  { %v3173_v27 = vpop.f32.mrb[90].mxu0 }
0x168f   :  { %v3282_v44 = vadd.f32 %v3173_v27, %v2109_v35  ;;  %v6736_v47 = vpop.f32.mrb[91].mxu0  ;;  %v3293_v48 = vsel %vm316_vm3, %v3281_v29, -inf }
0x1690   :  { %3294 = vmax.xlane.f32.xlu0 %v3293_v48 }
0x1691   :  { %v3296_v50 = vsel %vm316_vm3, %v3282_v44, -inf }
0x1692   :  { %3297 = vmax.xlane.f32.xlu1 %v3296_v50 }
0x1698   :  { %v3221_v51 = vpop.f32.mrb[96].mxu1 }
0x1699   :  { %v3283_v52 = vadd.f32 %v3221_v51, %v2108_v13  ;;  %v6741_v53 = vpop.f32.mrb[97].mxu1 }
0x169a   :  { %v3224_v54 = vpop.f32.mrb[98].mxu1 }
0x169b   :  { %v3284_v55 = vadd.f32 %v3224_v54, %v2109_v35  ;;  %v6742_v56 = vpop.f32.mrb[99].mxu1  ;;  %v3299_v45 = vsel %vm316_vm3, %v3283_v52, -inf }
0x169c   :  { %3300 = vmax.xlane.f32.xlu0 %v3299_v45  ;;  %v3272_v46 = vpop.f32.mrb[92].mxu0 }
0x169d   :  { %v8131_v24 = vadd.f32 %v3272_v46, %v2108_v13  ;;  %v6747_v26 = vpop.f32.mrb[93].mxu0  ;;  %v3302_v57 = vsel %vm316_vm3, %v3284_v55, -inf }
0x169e   :  { %3303 = vmax.xlane.f32.xlu1 %v3302_v57  ;;  %v3275_v58 = vpop.f32.mrb[94].mxu0 }
0x169f   :  { %v3286_v60 = vadd.f32 %v3275_v58, %v2109_v35  ;;  %v6748_v62 = vpop.f32.mrb[95].mxu0  ;;  %v3305_v63 = vsel %vm316_vm3, %v8131_v24, -inf }
0x16a0   :  { %3306 = vmax.xlane.f32.xlu0 %v3305_v63 }
0x16a1   :  { %v3308_v2 = vsel %vm316_vm3, %v3286_v60, -inf }
0x16a2   :  { %3309 = vmax.xlane.f32.xlu1 %v3308_v2 }
0x16ab   :  { %v3289_v5 = vpop.xlane.xlu1 %3288 }
0x16ac   :  { %v3311_v7 = vsub.f32 %v3279_v36, %v3289_v5 }
0x16ad   :  { %v3292_v8 = vpop.xlane.xlu0 %3291 }
0x16ae   :  { %v3319_v9 = vmul.f32 1.442695, %v3311_v7  ;;  %v3312_v10 = vsub.f32 %v3280_v38, %v3292_v8 }
0x16b0   :  { %7187 = vpow2.f32 %v3319_v9  ;;  %v3321_v1 = vmul.f32 1.442695, %v3312_v10 }
0x16b2   :  { %7189 = vpow2.f32 %v3321_v1 }
0x16ba   :  { %v8137_v11 = vpop.eup %7187 }
0x16bb   :  { %v3335_v12 = vsel %vm316_vm3, %v8137_v11, 0.0 }
0x16bc   :  { %v8141_v16 = vpop.eup %7189  ;;  %3336 = vadd.xlane.f32.xlu0 %v3335_v12 }
0x16bd   :  { %v3338_v17 = vsel %vm316_vm3, %v8141_v16, 0.0 }
0x16be   :  { %3339 = vadd.xlane.f32.xlu1 %v3338_v17 }
0x16cf   :  { %3492 = vrot.lane.b32.xlu1 %v8062_v43, %s7336_s13 }
0x171d   :  { %v3295_v18 = vpop.xlane.xlu0 %3294 }
0x171e   :  { %v3313_v19 = vsub.f32 %v3281_v29, %v3295_v18 }
0x171f   :  { %v3298_v20 = vpop.xlane.xlu1 %3297 }
0x1720   :  { %v3323_v21 = vmul.f32 1.442695, %v3313_v19  ;;  %v3314_v3 = vsub.f32 %v3282_v44, %v3298_v20 }
0x1722   :  { %7191 = vpow2.f32 %v3323_v21  ;;  %v3325_v23 = vmul.f32 1.442695, %v3314_v3 }
0x1724   :  { %7193 = vpow2.f32 %v3325_v23 }
0x1729   :  { %v3301_v30 = vpop.xlane.xlu0 %3300 }
0x172a   :  { %v3315_v49 = vsub.f32 %v3283_v52, %v3301_v30 }
0x172b   :  { %v3304_v31 = vpop.xlane.xlu1 %3303 }
0x172c   :  { %v8147_v59 = vpop.eup %7191  ;;  %v3327_v4 = vmul.f32 1.442695, %v3315_v49  ;;  %v3316_v61 = vsub.f32 %v3284_v55, %v3304_v31 }
0x172d   :  { %v3341_v22 = vsel %vm316_vm3, %v8147_v59, 0.0  ;;  %v3307_v41 = vpop.xlane.xlu0 %3306 }
0x172e   :  { %v7194_v32 = vpop.eup %7193  ;;  %7195 = vpow2.f32 %v3327_v4  ;;  %v3329_v33 = vmul.f32 1.442695, %v3316_v61  ;;  %3342 = vadd.xlane.f32.xlu0 %v3341_v22  ;;  %v3317_v29 = vsub.f32 %v8131_v24, %v3307_v41  ;;  %v3436_v4 = vld [vmem:[%s8692_s5 + $0x30] sm:$0xf] }
0x172f   :  { %v3310_v13 = vpop.xlane.xlu1 %3309  ;;  %v3344_v34 = vsel %vm316_vm3, %v7194_v32, 0.0  ;;  %v3441_v61 = vsel %vm470_vm4, %v3436_v4, 0 }
0x1730   :  { %7197 = vpow2.f32 %v3329_v33  ;;  %v3318_v35 = vsub.f32 %v3286_v60, %v3310_v13  ;;  %3345 = vadd.xlane.f32.xlu1 %v3344_v34  ;;  %v3331_v42 = vmul.f32 1.442695, %v3317_v29  ;;  %6756 = vmatpush3.bf16.msra.mxu0 %v3441_v61  ;;  %v7053_v61 = vld [vmem:[%s8692_s5 + $0x38] ss:$92 sps:$4 sm:$0xff]  }
0x1731   :  { %6767 = vmatprep.subr.bf16.mxu0 %v7331_v0 }
0x1732   :  { %v3333_v36 = vmul.f32 1.442695, %v3318_v35 }
0x1734   :  { %7199 = vpow2.f32 %v3333_v36 }
0x1735   :  { %7201 = vpow2.f32 %v3331_v42  ;;  %v3736_v42 = vld [vmem:[%s8692_s5 + $0x144] sm:$0xf] }
0x1738   :  { %v8152_v25 = vpop.eup %7195 }
0x1739   :  { %v3347_v37 = vsel %vm316_vm3, %v8152_v25, 0.0 }
0x173a   :  { %v7198_v38 = vpop.eup %7197  ;;  %3348 = vadd.xlane.f32.xlu0 %v3347_v37  ;;  %v3638_v37 = vld [vmem:[%s8692_s5 + $0xe8] sm:$0xf] }
0x173b   :  { %v3350_v39 = vsel %vm316_vm3, %v7198_v38, 0.0  ;;  %v3643_v41 = vsel %vm470_vm4, %v3638_v37, 0 }
0x173c   :  { %3351 = vadd.xlane.f32.xlu1 %v3350_v39 }
0x173e   :  { %v8157_v28 = vpop.eup %7199 }
0x173f   :  { %v3356_v40 = vsel %vm316_vm3, %v8157_v28, 0.0  ;;  %v8166_v27 = vpop.eup %7201 }
0x1740   :  { %3357 = vadd.xlane.f32.xlu1 %v3356_v40  ;;  %v3353_v44 = vsel %vm316_vm3, %v8166_v27, 0.0 }
0x1749   :  { %v3337_v48 = vpop.xlane.xlu0 %3336 }
0x174a   :  { %v3359_v52 = vadd.f32 1e-30, %v3337_v48 }
0x174b   :  { %v3340_v47 = vpop.xlane.xlu1 %3339 }
0x174c   :  { %v3360_v50 = vadd.f32 1e-30, %v3340_v47 }
0x174e   :  { %7203 = vrcp.f32 %v3360_v50  ;;  %v3741_v50 = vsel %vm470_vm4, %v3736_v42, 0 }
0x174f   :  { %v3493_v51 = vpop.permute.xlu1 %3492  ;;  %7205 = vrcp.f32 %v3359_v52 }
0x1750   :  { %3388 = vrot.lane.b32.xlu0 %v8062_v43, %s7334_s11 }
0x1751   :  { %3590 = vrot.lane.b32.xlu1 %v8062_v43, %s7335_s12 }
0x1758   :  { %v7204_v45 = vpop.eup %7203 }
0x1759   :  { %v7206_v24 = vpop.eup %7205  ;;  %v3376_v26 = vmul.f32 %v7204_v45, %v8141_v16 }
0x175a   :  { %v3375_v60 = vmul.f32 %v7206_v24, %v8137_v11 }
0x175c   :  { %v3383_v63 = vpack.c.bf16 %v3376_v26, %v3375_v60  ;;  %v6147_v26 = vld [vmem:[%s8693_s6 + $0x14] ss:$0 sm:$0xff] }
0x176f   :  { %3354 = vadd.xlane.f32.xlu0 %v3353_v44 }
0x1785   :  { %3688 = vrot.lane.b32.xlu0 %v8062_v43, %s7337_s14 }
0x17bb   :  { %v3343_v54 = vpop.xlane.xlu0 %3342 }
0x17bc   :  { %v3361_v56 = vadd.f32 1e-30, %v3343_v54 }
0x17bd   :  { %v3346_v53 = vpop.xlane.xlu1 %3345 }
0x17be   :  { %v3362_v55 = vadd.f32 1e-30, %v3346_v53 }
0x17c0   :  { %7207 = vrcp.f32 %v3362_v55 }
0x17c1   :  { %7209 = vrcp.f32 %v3361_v56 }
0x17c7   :  { %v3349_v46 = vpop.xlane.xlu0 %3348 }
0x17c8   :  { %v3363_v43 = vadd.f32 1e-30, %v3349_v46 }
0x17c9   :  { %v3352_v57 = vpop.xlane.xlu1 %3351 }
0x17ca   :  { %v3364_v58 = vadd.f32 1e-30, %v3352_v57  ;;  %v7208_v2 = vpop.eup %7207 }
0x17cb   :  { %v3389_v62 = vpop.permute.xlu0 %3388  ;;  %v7210_v5 = vpop.eup %7209  ;;  %v3378_v7 = vmul.f32 %v7208_v2, %v7194_v32  ;;  %v3540_v32 = vld [vmem:[%s8692_s5 + $0x8c] sm:$0xf] }
0x17cc   :  { %7211 = vrcp.f32 %v3364_v58  ;;  %6750 = vmatpush3.bf16.msra.mxu1 %v3389_v62  ;;  %v3377_v9 = vmul.f32 %v7210_v5, %v8147_v59  ;;  %v3545_v36 = vsel %vm470_vm4, %v3540_v32, 0 }
0x17cd   :  { %6761 = vmatprep.subr.bf16.mxu1 %v7331_v0  ;;  %7213 = vrcp.f32 %v3363_v43  ;;  %v3358_v8 = vpop.xlane.xlu1 %3357 }
0x17ce   :  { %v3384_v10 = vpack.c.bf16 %v3378_v7, %v3377_v9  ;;  %v3366_v19 = vadd.f32 1e-30, %v3358_v8 }
0x17cf   :  { %6752 = vmatmul.mubr.msk.bf16.vlgmr.msra.gmra.mrb[100].mxu1 %vm316_vm3, %v3383_v63 }
0x17d0   :  { %6762 = vmatpush3.bf16.msra.mxu1 %v3493_v51  ;;  %6763 = vmatprep.mubr.msk.bf16.mxu1 %vm7332_vm0, %v7331_v0  ;;  %7215 = vrcp.f32 %v3366_v19 }
0x17d1   :  { %6773 = vmatprep.subr.bf16.mxu1 %v7331_v0  ;;  %v3591_v11 = vpop.permute.xlu1 %3590 }
0x17d6   :  { %v7212_v1 = vpop.eup %7211 }
0x17d7   :  { %6764 = vmatmul.mubr.msk.bf16.vlgmr.msra.gmra.mrb[104].mxu1 %vm316_vm3, %v3384_v10  ;;  %v7214_v12 = vpop.eup %7213  ;;  %v3380_v16 = vmul.f32 %v7212_v1, %v7198_v38 }
0x17d8   :  { %6774 = vmatpush3.bf16.msra.mxu1 %v3591_v11  ;;  %6775 = vmatprep.mubr.msk.bf16.mxu1 %vm7332_vm0, %v7331_v0  ;;  %v3379_v17 = vmul.f32 %v7214_v12, %v8152_v25 }
0x17d9   :  { %6785 = vmatprep.subr.bf16.mxu1 %v7331_v0 }
0x17da   :  { %v3385_v18 = vpack.c.bf16 %v3380_v16, %v3379_v17  ;;  %v7216_v23 = vpop.eup %7215 }
0x17db   :  { %v3382_v49 = vmul.f32 %v7216_v23, %v8157_v28 }
0x17df   :  { %6776 = vmatmul.mubr.msk.bf16.vlgmr.msra.gmra.mrb[108].mxu1 %vm316_vm3, %v3385_v18 }
0x17e0   :  { %6787 = vmatprep.mubr.msk.bf16.mxu1 %vm7332_vm0, %v7331_v0 }
0x17fc   :  { %v3355_v20 = vpop.xlane.xlu0 %3354 }
0x17fd   :  { %v3365_v21 = vadd.f32 1e-30, %v3355_v20 }
0x17ff   :  { %7217 = vrcp.f32 %v3365_v21 }
0x1800   :  { %v3689_v3 = vpop.permute.xlu0 %3688 }
0x1801   :  { %6786 = vmatpush3.bf16.msra.mxu1 %v3689_v3 }
0x1802   :  { %6797 = vmatprep.subr.bf16.mxu1 %v7331_v0 }
0x1809   :  { %v7218_v30 = vpop.eup %7217 }
0x180a   :  { %v3381_v31 = vmul.f32 %v7218_v30, %v8166_v27 }
0x180c   :  { %v3386_v59 = vpack.c.bf16 %v3382_v49, %v3381_v31 }
0x180e   :  { %6788 = vmatmul.mubr.msk.bf16.vlgmr.msra.gmra.mrb[112].mxu1 %vm316_vm3, %v3386_v59 }
0x180f   :  { %6801 = vmatprep.mubr.msk.bf16.mxu1 %vm7332_vm0, %v7331_v0 }
0x18a2   :  { %v3428_v22 = vpop.f32.mrb[100].mxu1 }
0x18a3   :  { %v6753_v33 = vpop.f32.mrb[101].mxu1 }
0x18a4   :  { %v3431_v13 = vpop.f32.mrb[102].mxu1 }
0x18a5   :  { %v3435_v34 = vpack.c.bf16 %v3431_v13, %v3428_v22  ;;  %v6754_v35 = vpop.f32.mrb[103].mxu1  ;;  %v7054_v22 = vld [vmem:[%s8692_s5 + $0xf0] ss:$92 sps:$4 sm:$0xff]  }
0x18a7   :  { %6758 = vmatmul.mubr.msk.bf16.vlgmr.msra.gmra.mrb[96].mxu0 %vm107_vm2, %v3435_v34 }
0x18a8   :  { %6768 = vmatpush3.bf16.msra.mxu0 %v3545_v36  ;;  %6769 = vmatprep.mubr.msk.bf16.mxu0 %vm7332_vm0, %v7331_v0 }
0x18a9   :  { %6779 = vmatprep.subr.bf16.mxu0 %v7331_v0 }
0x18aa   :  { %v3532_v25 = vpop.f32.mrb[104].mxu1 }
0x18ab   :  { %v6765_v38 = vpop.f32.mrb[105].mxu1 }
0x18ac   :  { %v3535_v39 = vpop.f32.mrb[106].mxu1 }
0x18ad   :  { %v3539_v28 = vpack.c.bf16 %v3535_v39, %v3532_v25  ;;  %v6766_v40 = vpop.f32.mrb[107].mxu1 }
0x18af   :  { %6770 = vmatmul.mubr.msk.bf16.vlgmr.msra.gmra.mrb[100].mxu0 %vm107_vm2, %v3539_v28 }
0x18b0   :  { %6780 = vmatpush3.bf16.msra.mxu0 %v3643_v41  ;;  %6781 = vmatprep.mubr.msk.bf16.mxu0 %vm7332_vm0, %v7331_v0 }
0x18b1   :  { %6791 = vmatprep.subr.bf16.mxu0 %v7331_v0 }
0x18b2   :  { %v3630_v29 = vpop.f32.mrb[108].mxu1 }
0x18b3   :  { %v6777_v27 = vpop.f32.mrb[109].mxu1 }
0x18b4   :  { %v3633_v44 = vpop.f32.mrb[110].mxu1 }
0x18b5   :  { %v3637_v47 = vpack.c.bf16 %v3633_v44, %v3630_v29  ;;  %v6778_v48 = vpop.f32.mrb[111].mxu1  ;;  %v6154_v44 = vld [vmem:[%s8693_s6 + $0x19] ss:$0 sm:$0xff] }
0x18b7   :  { %6782 = vmatmul.mubr.msk.bf16.vlgmr.msra.gmra.mrb[104].mxu0 %vm107_vm2, %v3637_v47 }
0x18b8   :  { %6792 = vmatpush3.bf16.msra.mxu0 %v3741_v50  ;;  %6793 = vmatprep.mubr.msk.bf16.mxu0 %vm7332_vm0, %v7331_v0 }
0x18b9   :  { %6805 = vmatprep.subr.bf16.mxu0 %v7331_v0 }
0x18e1   :  { %v3728_v51 = vpop.f32.mrb[112].mxu1 }
0x18e2   :  { %v6789_v52 = vpop.f32.mrb[113].mxu1 }
0x18e3   :  { %v3731_v53 = vpop.f32.mrb[114].mxu1 }
0x18e4   :  { %v3735_v54 = vpack.c.bf16 %v3731_v53, %v3728_v51  ;;  %v6790_v55 = vpop.f32.mrb[115].mxu1  ;;  %v6155_v53 = vld [vmem:[%s8693_s6 + $0x1a] ss:$0 sm:$0xff] }
0x18e6   :  { %6794 = vmatmul.mubr.msk.bf16.vlgmr.msra.gmra.mrb[108].mxu0 %vm107_vm2, %v3735_v54 }
0x18e7   :  { %6813 = vmatprep.mubr.msk.bf16.mxu0 %vm7332_vm0, %v7331_v0  ;;  %6806 = vmatpush3.bf16.msra.mxu0 %v7053_v61 }
0x18e8   :  { %6807 = vmatprep.subr.bf16.mxu0 %v7331_v0 }
0x18eb   :  { %6808 = vmatpush3.bf16.msra.mxu0 %v7054_v22 }
0x18ec   :  { %6809 = vmatprep.subr.bf16.mxu0 %v7331_v0 }
0x197a   :  { %v3477_v56 = vpop.f32.mrb[96].mxu0 }
0x197b   :  { %v6759_v45 = vpop.f32.mrb[97].mxu0  ;;  %v3490_v57 = vadd.f32 %v6147_v26, %v3477_v56 }
0x197c   :  { %v3480_v46 = vpop.f32.mrb[98].mxu0 }
0x197d   :  { %v6760_v24 = vpop.f32.mrb[99].mxu0  ;;  %v3491_v58 = vadd.f32 %v6147_v26, %v3480_v46  ;;  %v7055_v46 = vld [vmem:[%s8692_s5 + $0x1a8] ss:$92 sps:$4 sm:$0xff]   ;;  %v6156_v26 = vld [vmem:[%s8693_s6 + $0x15] ss:$0 sm:$0xff] }
0x197e   :  { %6810 = vmatpush3.bf16.msra.mxu0 %v7055_v46  ;;  %v7056_v24 = vld [vmem:[%s8692_s5 + $0x260] ss:$92 sps:$4 sm:$0xff]  }
0x197f   :  { %6811 = vmatprep.subr.bf16.mxu0 %v7331_v0 }
0x1982   :  { %v3581_v43 = vpop.f32.mrb[100].mxu0  ;;  %6812 = vmatpush3.bf16.msra.mxu0 %v7056_v24 }
0x1983   :  { %v3588_v60 = vadd.f32 %v3581_v43, %v3490_v57  ;;  %v6771_v62 = vpop.f32.mrb[101].mxu0  ;;  %6831 = vmatprep.subr.bf16.mxu0 %v7331_v0 }
0x1984   :  { %v3584_v63 = vpop.f32.mrb[102].mxu0 }
0x1985   :  { %v3589_v2 = vadd.f32 %v3584_v63, %v3491_v58  ;;  %v6772_v5 = vpop.f32.mrb[103].mxu0 }
0x198a   :  { %v3679_v7 = vpop.f32.mrb[104].mxu0 }
0x198b   :  { %v3686_v8 = vadd.f32 %v3679_v7, %v3588_v60  ;;  %v6783_v9 = vpop.f32.mrb[105].mxu0 }
0x198c   :  { %v3682_v10 = vpop.f32.mrb[106].mxu0 }
0x198d   :  { %v3687_v1 = vadd.f32 %v3682_v10, %v3589_v2  ;;  %v6784_v11 = vpop.f32.mrb[107].mxu0 }
0x19b9   :  { %v3777_v12 = vpop.f32.mrb[108].mxu0 }
0x19ba   :  { %v3784_v16 = vadd.f32 %v3777_v12, %v3686_v8  ;;  %v6795_v17 = vpop.f32.mrb[109].mxu0  ;;  %v6160_v8 = vld [vmem:[%s8693_s6 + $0x16] ss:$0 sm:$0xff] }
0x19bb   :  { %v3780_v18 = vpop.f32.mrb[110].mxu0 }
0x19bc   :  { %v3786_v19 = vadd.f32 %v3784_v16, %v8082_v14  ;;  %v3785_v20 = vadd.f32 %v3780_v18, %v3687_v1  ;;  %v6796_v21 = vpop.f32.mrb[111].mxu0  ;;  %v7051_v14 = vld [vmem:[%s8692_s5 + $0x34] ss:$92 sps:$4 sm:$0xff]  }
0x19bd   :  { %6798 = vmatpush3.bf16.msra.mxu1 %v7051_v14 }
0x19be   :  { %v3787_v3 = vadd.f32 %v3785_v20, %v8084_v15  ;;  %v3788_v23 = vsel %vm58_vm1, %v3786_v19, 0.0  ;;  %v3796_v31 = vmul.f32 %v3786_v19, %v3786_v19  ;;  %v7052_v15 = vld [vmem:[%s8692_s5 + $0xec] ss:$92 sps:$4 sm:$0xff]   ;;  %6799 = vmatprep.subr.bf16.mxu1 %v7331_v0 }
0x19bf   :  { %3789 = vadd.xlane.f32.xlu1 %v3788_v23 }
0x19c0   :  { %v3791_v30 = vsel %vm58_vm1, %v3787_v3, 0.0  ;;  %v3797_v49 = vmul.f32 %v3787_v3, %v3787_v3  ;;  %v3798_v4 = vsel %vm58_vm1, %v3796_v31, 0.0  ;;  %v7058_v31 = vld [vmem:[%s8692_s5 + $0xf4] ss:$92 sps:$4 sm:$0xff]  }
0x19c1   :  { %3792 = vadd.xlane.f32.xlu0 %v3791_v30  ;;  %6800 = vmatpush3.bf16.msra.mxu1 %v7052_v15 }
0x19c2   :  { %v3801_v59 = vsel %vm58_vm1, %v3797_v49, 0.0  ;;  %6817 = vmatprep.subr.bf16.mxu1 %v7331_v0  ;;  %v7057_v49 = vld [vmem:[%s8692_s5 + $0x3c] ss:$92 sps:$4 sm:$0xff]  }
0x19c3   :  { %3802 = vadd.xlane.f32.xlu1 %v3801_v59 }
0x19c5   :  { %3799 = vadd.xlane.f32.xlu0 %v3798_v4 }
0x1a4c   :  { %v3790_v32 = vpop.xlane.xlu1 %3789 }
0x1a4d   :  { %v3794_v13 = vmul.f32 0.03125, %v3790_v32 }
0x1a4e   :  { %v3793_v33 = vpop.xlane.xlu0 %3792 }
0x1a4f   :  { %v3795_v34 = vmul.f32 0.03125, %v3793_v33  ;;  %v3806_v38 = vmul.f32 %v3794_v13, %v3794_v13  ;;  %v3810_v47 = vsub.f32 %v3786_v19, %v3794_v13 }
0x1a50   :  { %v3803_v35 = vpop.xlane.xlu1 %3802 }
0x1a51   :  { %v3807_v36 = vmul.f32 %v3795_v34, %v3795_v34  ;;  %v3805_v25 = vmul.f32 0.03125, %v3803_v35  ;;  %v3811_v42 = vsub.f32 %v3787_v3, %v3795_v34 }
0x1a52   :  { %v3800_v37 = vpop.xlane.xlu0 %3799 }
0x1a53   :  { %v3809_v39 = vsub.f32 %v3805_v25, %v3807_v36  ;;  %v3804_v28 = vmul.f32 0.03125, %v3800_v37 }
0x1a55   :  { %v3813_v40 = vadd.f32 1e-05, %v3809_v39  ;;  %v3808_v41 = vsub.f32 %v3804_v28, %v3806_v38  ;;  %v6166_v28 = vld [vmem:[%s8693_s6 + $0x1b] ss:$0 sm:$0xff] }
0x1a57   :  { %7219 = vrsqrt.f32 %v3813_v40  ;;  %v3812_v29 = vadd.f32 1e-05, %v3808_v41 }
0x1a59   :  { %7221 = vrsqrt.f32 %v3812_v29 }
0x1a61   :  { %v7220_v27 = vpop.eup %7219 }
0x1a62   :  { %v3817_v48 = vmul.f32 %v7220_v27, %v3811_v42 }
0x1a63   :  { %v7222_v50 = vpop.eup %7221 }
0x1a64   :  { %v3816_v51 = vmul.f32 %v7222_v50, %v3810_v47  ;;  %v3826_v52 = vmul.f32 %v6154_v44, %v3817_v48 }
0x1a66   :  { %v3825_v54 = vmul.f32 %v6154_v44, %v3816_v51  ;;  %v3835_v56 = vadd.f32 %v6155_v53, %v3826_v52  ;;  %v6167_v44 = vld [vmem:[%s8693_s6 + $0x1c] ss:$0 sm:$0xff]  ;;  %v6168_v52 = vld [vmem:[%s8693_s6 + $0x1d] ss:$0 sm:$0xff] }
0x1a68   :  { %v3834_v55 = vadd.f32 %v6155_v53, %v3825_v54 }
0x1a6a   :  { %v3836_v45 = vpack.c.bf16 %v3835_v56, %v3834_v55 }
0x1a6c   :  { %6802 = vmatmul.mubr.msk.bf16.vlgmr.msra.gmra.mrb[116].mxu1 %vm58_vm1, %v3836_v45 }
0x1a6d   :  { %6821 = vmatprep.mubr.msk.bf16.mxu1 %vm7332_vm0, %v7331_v0  ;;  %6818 = vmatpush3.bf16.msra.mxu1 %v7057_v49 }
0x1a6e   :  { %6819 = vmatprep.subr.bf16.mxu1 %v7331_v0 }
0x1a71   :  { %6820 = vmatpush3.bf16.msra.mxu1 %v7058_v31 }
0x1a72   :  { %6825 = vmatprep.subr.bf16.mxu1 %v7331_v0 }
0x1b3f   :  { %v3897_v57 = vpop.f32.mrb[116].mxu1 }
0x1b40   :  { %v3898_v43 = vadd.f32 %v6156_v26, %v3897_v57  ;;  %v6803_v58 = vpop.f32.mrb[117].mxu1 }
0x1b41   :  { %v3900_v60 = vpop.f32.mrb[118].mxu1 }
0x1b42   :  { %v3901_v62 = vadd.f32 %v6156_v26, %v3900_v60  ;;  %v6804_v63 = vpop.f32.mrb[119].mxu1  ;;  %v3904_v2 = vmax.f32 %v3898_v43, 0.0 }
0x1b44   :  { %v3905_v5 = vmax.f32 %v3901_v62, 0.0 }
0x1b46   :  { %v3906_v7 = vpack.c.bf16 %v3905_v5, %v3904_v2 }
0x1b48   :  { %6814 = vmatmul.mubr.msk.bf16.vlgmr.msra.gmra.mrb[112].mxu0 %vm978_vm5, %v3906_v7 }
0x1b49   :  { %6833 = vmatprep.mubr.msk.bf16.mxu0 %vm7332_vm0, %v7331_v0 }
0x1c1b   :  { %v3983_v9 = vpop.f32.mrb[112].mxu0 }
0x1c1c   :  { %v3984_v10 = vadd.f32 %v6160_v8, %v3983_v9  ;;  %v6815_v1 = vpop.f32.mrb[113].mxu0 }
0x1c1d   :  { %v3986_v11 = vpop.f32.mrb[114].mxu0  ;;  %v7303_v1 = vld [vmem:[%s8690_s3] sm:$0xff] }
0x1c1e   :  { %v3990_v12 = vadd.f32 %v3984_v10, %v3834_v55  ;;  %v3987_v16 = vadd.f32 %v6160_v8, %v3986_v11  ;;  %v6816_v17 = vpop.f32.mrb[115].mxu0 }
0x1c20   :  { %v3991_v18 = vadd.f32 %v3987_v16, %v3835_v56  ;;  %v3992_v19 = vsel %vm58_vm1, %v3990_v12, 0.0  ;;  %v4000_v20 = vmul.f32 %v3990_v12, %v3990_v12 }
0x1c21   :  { %3993 = vadd.xlane.f32.xlu0 %v3992_v19 }
0x1c22   :  { %v3995_v21 = vsel %vm58_vm1, %v3991_v18, 0.0  ;;  %v4001_v3 = vmul.f32 %v3991_v18, %v3991_v18  ;;  %v4002_v23 = vsel %vm58_vm1, %v4000_v20, 0.0  ;;  %v7304_v20 = vld [vmem:[%s8690_s3 + $0x8] sm:$0xff] }
0x1c23   :  { %3996 = vadd.xlane.f32.xlu1 %v3995_v21 }
0x1c24   :  { %v4005_v30 = vsel %vm58_vm1, %v4001_v3, 0.0 }
0x1c25   :  { %4003 = vadd.xlane.f32.xlu0 %v4002_v23 }
0x1c27   :  { %4006 = vadd.xlane.f32.xlu1 %v4005_v30 }
0x1cae   :  { %v3994_v59 = vpop.xlane.xlu0 %3993 }
0x1caf   :  { %v3998_v4 = vmul.f32 0.03125, %v3994_v59 }
0x1cb0   :  { %v3997_v14 = vpop.xlane.xlu1 %3996 }
0x1cb1   :  { %v3999_v15 = vmul.f32 0.03125, %v3997_v14  ;;  %v4010_v22 = vmul.f32 %v3998_v4, %v3998_v4  ;;  %v4014_v38 = vsub.f32 %v3990_v12, %v3998_v4 }
0x1cb2   :  { %v4004_v61 = vpop.xlane.xlu0 %4003 }
0x1cb3   :  { %v4008_v32 = vmul.f32 0.03125, %v4004_v61  ;;  %v4011_v13 = vmul.f32 %v3999_v15, %v3999_v15  ;;  %v4015_v40 = vsub.f32 %v3991_v18, %v3999_v15 }
0x1cb4   :  { %v4007_v33 = vpop.xlane.xlu1 %4006 }
0x1cb5   :  { %v4012_v34 = vsub.f32 %v4008_v32, %v4010_v22  ;;  %v4009_v35 = vmul.f32 0.03125, %v4007_v33 }
0x1cb7   :  { %v4016_v36 = vadd.f32 1e-05, %v4012_v34  ;;  %v4013_v25 = vsub.f32 %v4009_v35, %v4011_v13 }
0x1cb9   :  { %7223 = vrsqrt.f32 %v4016_v36  ;;  %v4017_v37 = vadd.f32 1e-05, %v4013_v25 }
0x1cbb   :  { %7225 = vrsqrt.f32 %v4017_v37 }
0x1cc3   :  { %v7224_v39 = vpop.eup %7223 }
0x1cc4   :  { %v4020_v41 = vmul.f32 %v7224_v39, %v4014_v38 }
0x1cc5   :  { %v7226_v29 = vpop.eup %7225 }
0x1cc6   :  { %v4021_v42 = vmul.f32 %v7226_v29, %v4015_v40  ;;  %v4029_v27 = vmul.f32 %v6166_v28, %v4020_v41 }
0x1cc8   :  { %v4030_v47 = vmul.f32 %v6166_v28, %v4021_v42  ;;  %v8295_v48 = vadd.f32 %v6167_v44, %v4029_v27 }
0x1cca   :  { %v8297_v50 = vadd.f32 %v6167_v44, %v4030_v47 }
0x1ccc   :  { %v4040_v51 = vpack.c.bf16 %v8297_v50, %v8295_v48 }
0x1cce   :  { %6822 = vmatmul.mubr.msk.bf16.vlgmr.msra.gmra.mrb[120].mxu1 %vm58_vm1, %v4040_v51 }
0x1ccf   :  { %6827 = vmatprep.mubr.msk.bf16.mxu1 %vm7332_vm0, %v7331_v0 }
0x1da1   :  { %v4101_v53 = vpop.f32.mrb[120].mxu1 }
0x1da2   :  { %v6823_v54 = vpop.f32.mrb[121].mxu1  ;;  %v4102_v56 = vadd.f32 %v6168_v52, %v4101_v53 }
0x1da3   :  { %v4104_v55 = vpop.f32.mrb[122].mxu1 }
0x1da4   :  { %v4105_v45 = vadd.f32 %v6168_v52, %v4104_v55  ;;  %v6824_v46 = vpop.f32.mrb[123].mxu1 }
0x1da6   :  { %v8307_v24 = vpack.c.bf16 %v4105_v45, %v4102_v56 }
0x1da8   :  { %4161 = vrot.lane.b32.xlu1 %v8307_v24, %s7336_s13  ;;  %4110 = vrot.lane.b32.xlu0 %v8307_v24, %s7334_s11 }
0x1dac   :  { %4159 = vrot.lane.b32.xlu1 %v8307_v24, %s7333_s0  ;;  %4212 = vrot.lane.b32.xlu0 %v8307_v24, %s7335_s12 }
0x1db0   :  { %4210 = vrot.lane.b32.xlu1 %v8307_v24, %s7338_s15  ;;  %4263 = vrot.lane.b32.xlu0 %v8307_v24, %s7337_s14 }
0x1db4   :  { %4261 = vrot.lane.b32.xlu1 %v8307_v24, %s7339_s16 }
0x1e1a   :  { %v4162_v26 = vpop.permute.xlu1 %4161  ;;  %v4111_v57 = vpop.permute.xlu0 %4110 }
0x1e1b   :  { %v4167_v43 = vsel %vm107_vm2, %v4162_v26, 0  ;;  %v4116_v58 = vsel %vm107_vm2, %v4111_v57, 0 }
0x1e1c   :  { %6826 = vmatpush3.bf16.xpose.msra.mxu1 %v4116_v58  ;;  %6832 = vmatpush3.bf16.xpose.msra.mxu0 %v4167_v43 }
0x1e1d   :  { %6837 = vmatprep.subr.bf16.mxu1 %v7331_v0  ;;  %6843 = vmatprep.subr.bf16.mxu0 %v7331_v0 }
0x1e1e   :  { %v4160_v60 = vpop.permute.xlu1 %4159  ;;  %v4213_v62 = vpop.permute.xlu0 %4212 }
0x1e1f   :  { %v4218_v2 = vsel %vm107_vm2, %v4213_v62, 0 }
0x1e22   :  { %v4264_v63 = vpop.permute.xlu0 %4263  ;;  %v4211_v7 = vpop.permute.xlu1 %4210 }
0x1e23   :  { %v4269_v5 = vsel %vm107_vm2, %v4264_v63, 0  ;;  %6828 = vmatmul.mubr.msk.bf16.vlgmr.msra.gmra.mrb[124].mxu1 %vm107_vm2, %v8307_v24  ;;  %6834 = vmatmul.mubr.msk.bf16.vlgmr.msra.gmra.mrb[116].mxu0 %vm107_vm2, %v4160_v60 }
0x1e24   :  { %6838 = vmatpush3.bf16.xpose.msra.mxu1 %v4218_v2  ;;  %6844 = vmatpush3.bf16.xpose.msra.mxu0 %v4269_v5 }
0x1e25   :  { %6839 = vmatprep.mubr.msk.bf16.mxu1 %vm7332_vm0, %v7331_v0  ;;  %6845 = vmatprep.mubr.msk.bf16.mxu0 %vm7332_vm0, %v7331_v0 }
0x1e26   :  { %6849 = vmatprep.subr.bf16.mxu1 %v7331_v0  ;;  %6855 = vmatprep.subr.bf16.mxu0 %v7331_v0  ;;  %v4262_v8 = vpop.permute.xlu1 %4261 }
0x1e2b   :  { %6840 = vmatmul.mubr.msk.bf16.vlgmr.msra.gmra.mrb[128].mxu1 %vm107_vm2, %v4211_v7  ;;  %6846 = vmatmul.mubr.msk.bf16.vlgmr.msra.gmra.mrb[120].mxu0 %vm107_vm2, %v4262_v8 }
0x1e2c   :  { %6851 = vmatprep.mubr.msk.bf16.mxu1 %vm7332_vm0, %v7331_v0  ;;  %6857 = vmatprep.mubr.msk.bf16.mxu0 %vm7332_vm0, %v7331_v0 }
0x1ef6   :  { %v4152_v9 = vpop.f32.mrb[124].mxu1  ;;  %v4203_v10 = vpop.f32.mrb[116].mxu0 }
0x1ef7   :  { %v4312_v11 = vadd.f32 %v7303_v1, %v4152_v9  ;;  %v6829_v12 = vpop.f32.mrb[125].mxu1  ;;  %v6835_v16 = vpop.f32.mrb[117].mxu0  ;;  %v4314_v19 = vadd.f32 %v7303_v1, %v4203_v10 }
0x1ef8   :  { %v4155_v17 = vpop.f32.mrb[126].mxu1  ;;  %v4206_v18 = vpop.f32.mrb[118].mxu0 }
0x1ef9   :  { %v4313_v21 = vadd.f32 %v7304_v20, %v4155_v17  ;;  %v6830_v3 = vpop.f32.mrb[127].mxu1  ;;  %v6836_v23 = vpop.f32.mrb[119].mxu0  ;;  %v4320_v30 = vsel %vm316_vm3, %v4312_v11, -inf  ;;  %v4315_v31 = vadd.f32 %v7304_v20, %v4206_v18  ;;  %v4326_v59 = vsel %vm316_vm3, %v4314_v19, -inf }
0x1efa   :  { %4321 = vmax.xlane.f32.xlu0 %v4320_v30 }
0x1efb   :  { %v4323_v49 = vsel %vm316_vm3, %v4313_v21, -inf  ;;  %v4329_v37 = vsel %vm316_vm3, %v4315_v31, -inf }
0x1efc   :  { %4324 = vmax.xlane.f32.xlu1 %v4323_v49 }
0x1efe   :  { %v4254_v4 = vpop.f32.mrb[128].mxu1  ;;  %4327 = vmax.xlane.f32.xlu0 %v4326_v59  ;;  %v4305_v14 = vpop.f32.mrb[120].mxu0 }
0x1eff   :  { %v4316_v15 = vadd.f32 %v7303_v1, %v4254_v4  ;;  %v6841_v61 = vpop.f32.mrb[129].mxu1  ;;  %v6847_v22 = vpop.f32.mrb[121].mxu0  ;;  %v4318_v13 = vadd.f32 %v7303_v1, %v4305_v14 }
0x1f00   :  { %v4257_v32 = vpop.f32.mrb[130].mxu1  ;;  %v4308_v33 = vpop.f32.mrb[122].mxu0 }
0x1f01   :  { %v4317_v34 = vadd.f32 %v7304_v20, %v4257_v32  ;;  %v6842_v35 = vpop.f32.mrb[131].mxu1  ;;  %v6848_v36 = vpop.f32.mrb[123].mxu0  ;;  %v4332_v25 = vsel %vm316_vm3, %v4316_v15, -inf  ;;  %v4319_v38 = vadd.f32 %v7304_v20, %v4308_v33  ;;  %v4338_v28 = vsel %vm316_vm3, %v4318_v13, -inf }
0x1f02   :  { %4333 = vmax.xlane.f32.xlu1 %v4332_v25  ;;  %4330 = vmax.xlane.f32.xlu0 %v4329_v37 }
0x1f03   :  { %v4335_v39 = vsel %vm316_vm3, %v4317_v34, -inf  ;;  %v4341_v40 = vsel %vm316_vm3, %v4319_v38, -inf }
0x1f06   :  { %4336 = vmax.xlane.f32.xlu0 %v4335_v39  ;;  %4339 = vmax.xlane.f32.xlu1 %v4338_v28 }
0x1f0a   :  { %4342 = vmax.xlane.f32.xlu0 %v4341_v40 }
0x1f17   :  { %4421 = vrot.lane.b32.xlu1 %v8307_v24, %s7341_s21 }
0x1f87   :  { %v4322_v41 = vpop.xlane.xlu0 %4321 }
0x1f88   :  { %v4344_v29 = vsub.f32 %v4312_v11, %v4322_v41 }
0x1f89   :  { %v4325_v42 = vpop.xlane.xlu1 %4324 }
0x1f8a   :  { %v4352_v27 = vmul.f32 1.442695, %v4344_v29  ;;  %v4345_v44 = vsub.f32 %v4313_v21, %v4325_v42 }
0x1f8b   :  { %v4328_v47 = vpop.xlane.xlu0 %4327 }
0x1f8c   :  { %7227 = vpow2.f32 %v4352_v27  ;;  %v4354_v51 = vmul.f32 1.442695, %v4345_v44  ;;  %v4346_v52 = vsub.f32 %v4314_v19, %v4328_v47 }
0x1f8e   :  { %7229 = vpow2.f32 %v4354_v51  ;;  %v4356_v53 = vmul.f32 1.442695, %v4346_v52 }
0x1f8f   :  { %v4334_v54 = vpop.xlane.xlu1 %4333  ;;  %v4331_v55 = vpop.xlane.xlu0 %4330 }
0x1f90   :  { %7231 = vpow2.f32 %v4356_v53  ;;  %v4348_v56 = vsub.f32 %v4316_v15, %v4334_v54  ;;  %v4347_v45 = vsub.f32 %v4315_v31, %v4331_v55 }
0x1f92   :  { %v4360_v46 = vmul.f32 1.442695, %v4348_v56  ;;  %v4358_v26 = vmul.f32 1.442695, %v4347_v45 }
0x1f93   :  { %v4337_v57 = vpop.xlane.xlu0 %4336  ;;  %v4340_v43 = vpop.xlane.xlu1 %4339 }
0x1f94   :  { %7233 = vpow2.f32 %v4360_v46  ;;  %v4349_v58 = vsub.f32 %v4317_v34, %v4337_v57  ;;  %v4350_v60 = vsub.f32 %v4318_v13, %v4340_v43 }
0x1f95   :  { %7235 = vpow2.f32 %v4358_v26 }
0x1f96   :  { %v7228_v62 = vpop.eup %7227  ;;  %v4362_v63 = vmul.f32 1.442695, %v4349_v58  ;;  %v4364_v2 = vmul.f32 1.442695, %v4350_v60 }
0x1f97   :  { %v4422_v5 = vpop.permute.xlu1 %4421  ;;  %v4343_v7 = vpop.xlane.xlu0 %4342  ;;  %v4368_v8 = vsel %vm316_vm3, %v7228_v62, 0.0 }
0x1f98   :  { %v7230_v9 = vpop.eup %7229  ;;  %7237 = vpow2.f32 %v4362_v63  ;;  %v4351_v10 = vsub.f32 %v4319_v38, %v4343_v7  ;;  %4369 = vadd.xlane.f32.xlu1 %v4368_v8  ;;  %6850 = vmatpush3.bf16.msra.mxu1 %v4422_v5  ;;  %v4469_v63 = vld [vmem:[%s8692_s5 + $0x40] sm:$0xf]  ;;  %v4573_v7 = vld [vmem:[%s8692_s5 + $0x9c] sm:$0xf] }
0x1f99   :  { %7239 = vpow2.f32 %v4364_v2  ;;  %v4371_v1 = vsel %vm316_vm3, %v7230_v9, 0.0  ;;  %6861 = vmatprep.subr.bf16.mxu1 %v7331_v0  ;;  %v4474_v2 = vsel %vm470_vm4, %v4469_v63, 0 }
0x1f9a   :  { %v7232_v11 = vpop.eup %7231  ;;  %v4366_v12 = vmul.f32 1.442695, %v4351_v10  ;;  %4372 = vadd.xlane.f32.xlu0 %v4371_v1  ;;  %6856 = vmatpush3.bf16.msra.mxu0 %v4474_v2 }
0x1f9b   :  { %v4374_v16 = vsel %vm316_vm3, %v7232_v11, 0.0  ;;  %6867 = vmatprep.subr.bf16.mxu0 %v7331_v0 }
0x1f9c   :  { %7241 = vpow2.f32 %v4366_v12  ;;  %4375 = vadd.xlane.f32.xlu1 %v4374_v16  ;;  %v4671_v16 = vld [vmem:[%s8692_s5 + $0xf8] sm:$0xf] }
0x1f9e   :  { %v8364_v17 = vpop.eup %7233 }
0x1f9f   :  { %v7236_v18 = vpop.eup %7235  ;;  %v4380_v19 = vsel %vm316_vm3, %v8364_v17, 0.0 }
0x1fa0   :  { %4381 = vadd.xlane.f32.xlu1 %v4380_v19  ;;  %v4377_v20 = vsel %vm316_vm3, %v7236_v18, 0.0 }
0x1fa1   :  { %4378 = vadd.xlane.f32.xlu0 %v4377_v20 }
0x1fa2   :  { %v7238_v21 = vpop.eup %7237 }
0x1fa3   :  { %v8369_v3 = vpop.eup %7239  ;;  %v4383_v23 = vsel %vm316_vm3, %v7238_v21, 0.0 }
0x1fa4   :  { %v4386_v30 = vsel %vm316_vm3, %v8369_v3, 0.0 }
0x1fa5   :  { %4387 = vadd.xlane.f32.xlu1 %v4386_v30  ;;  %4384 = vadd.xlane.f32.xlu0 %v4383_v23  ;;  %v4769_v23 = vld [vmem:[%s8692_s5 + $0x154] sm:$0xf] }
0x1fa6   :  { %v7242_v49 = vpop.eup %7241 }
0x1fa7   :  { %v4389_v31 = vsel %vm316_vm3, %v7242_v49, 0.0 }
0x1fa9   :  { %4390 = vadd.xlane.f32.xlu0 %v4389_v31 }
0x1fb6   :  { %4623 = vrot.lane.b32.xlu1 %v8307_v24, %s7342_s22 }
0x1fba   :  { %4721 = vrot.lane.b32.xlu1 %v8307_v24, %s7343_s23 }
0x1fbf   :  { %4525 = vrot.lane.b32.xlu0 %v8307_v24, %s7340_s2 }
0x2025   :  { %v4370_v59 = vpop.xlane.xlu1 %4369 }
0x2026   :  { %v4392_v4 = vadd.f32 1e-30, %v4370_v59 }
0x2027   :  { %v4373_v14 = vpop.xlane.xlu0 %4372 }
0x2028   :  { %7243 = vrcp.f32 %v4392_v4  ;;  %v4393_v15 = vadd.f32 1e-30, %v4373_v14  ;;  %v4774_v4 = vsel %vm470_vm4, %v4769_v23, 0 }
0x2029   :  { %v4376_v61 = vpop.xlane.xlu1 %4375 }
0x202a   :  { %7245 = vrcp.f32 %v4393_v15  ;;  %v4394_v22 = vadd.f32 1e-30, %v4376_v61 }
0x202c   :  { %7247 = vrcp.f32 %v4394_v22  ;;  %v7059_v22 = vld [vmem:[%s8692_s5 + $0x48] ss:$92 sps:$4 sm:$0xff]  }
0x202d   :  { %v4382_v13 = vpop.xlane.xlu1 %4381 }
0x202e   :  { %v4379_v32 = vpop.xlane.xlu0 %4378  ;;  %v4396_v37 = vadd.f32 1e-30, %v4382_v13  ;;  %v7060_v13 = vld [vmem:[%s8692_s5 + $0x100] ss:$92 sps:$4 sm:$0xff]  }
0x202f   :  { %v4395_v33 = vadd.f32 1e-30, %v4379_v32 }
0x2031   :  { %7249 = vrcp.f32 %v4395_v33 }
0x2032   :  { %v7244_v34 = vpop.eup %7243  ;;  %v4385_v35 = vpop.xlane.xlu0 %4384 }
0x2033   :  { %v4397_v36 = vadd.f32 1e-30, %v4385_v35  ;;  %v4408_v38 = vmul.f32 %v7244_v34, %v7228_v62  ;;  %v4388_v40 = vpop.xlane.xlu1 %4387 }
0x2034   :  { %v7246_v25 = vpop.eup %7245  ;;  %v4398_v47 = vadd.f32 1e-30, %v4388_v40 }
0x2035   :  { %v4409_v24 = vmul.f32 %v7246_v25, %v7230_v9  ;;  %7251 = vrcp.f32 %v4397_v36 }
0x2036   :  { %v4391_v39 = vpop.xlane.xlu0 %4390  ;;  %7253 = vrcp.f32 %v4396_v37  ;;  %v7248_v41 = vpop.eup %7247  ;;  %v6178_v37 = vld [vmem:[%s8693_s6 + $0x1e] ss:$0 sm:$0xff] }
0x2037   :  { %v4416_v28 = vpack.c.bf16 %v4409_v24, %v4408_v38  ;;  %v4399_v29 = vadd.f32 1e-30, %v4391_v39  ;;  %v4410_v51 = vmul.f32 %v7248_v41, %v7232_v11  ;;  %v4624_v54 = vpop.permute.xlu1 %4623  ;;  %v4578_v11 = vsel %vm470_vm4, %v4573_v7, 0 }
0x2039   :  { %6852 = vmatmul.mubr.msk.bf16.vlgmr.msra.gmra.mrb[132].mxu1 %vm316_vm3, %v4416_v28  ;;  %7255 = vrcp.f32 %v4399_v29 }
0x203a   :  { %v4526_v42 = vpop.permute.xlu0 %4525  ;;  %6863 = vmatprep.mubr.msk.bf16.mxu1 %vm7332_vm0, %v7331_v0  ;;  %7257 = vrcp.f32 %v4398_v47 }
0x203b   :  { %v7250_v27 = vpop.eup %7249  ;;  %6862 = vmatpush3.bf16.msra.mxu1 %v4526_v42  ;;  %v4722_v57 = vpop.permute.xlu1 %4721 }
0x203c   :  { %v4411_v44 = vmul.f32 %v7250_v27, %v7236_v18  ;;  %6873 = vmatprep.subr.bf16.mxu1 %v7331_v0 }
0x203e   :  { %v4417_v52 = vpack.c.bf16 %v4411_v44, %v4410_v51 }
0x203f   :  { %v7252_v53 = vpop.eup %7251 }
0x2040   :  { %v7254_v55 = vpop.eup %7253  ;;  %v4413_v56 = vmul.f32 %v7252_v53, %v7238_v21  ;;  %v4676_v21 = vsel %vm470_vm4, %v4671_v16, 0 }
0x2041   :  { %6864 = vmatmul.mubr.msk.bf16.vlgmr.msra.gmra.mrb[136].mxu1 %vm316_vm3, %v4417_v52  ;;  %v4412_v45 = vmul.f32 %v7254_v55, %v8364_v17 }
0x2042   :  { %6874 = vmatpush3.bf16.msra.mxu1 %v4624_v54  ;;  %6875 = vmatprep.mubr.msk.bf16.mxu1 %vm7332_vm0, %v7331_v0 }
0x2043   :  { %6885 = vmatprep.subr.bf16.mxu1 %v7331_v0  ;;  %v4418_v46 = vpack.c.bf16 %v4413_v56, %v4412_v45  ;;  %v7256_v26 = vpop.eup %7255 }
0x2044   :  { %v7258_v43 = vpop.eup %7257  ;;  %v4415_v58 = vmul.f32 %v7256_v26, %v7242_v49 }
0x2045   :  { %v4414_v60 = vmul.f32 %v7258_v43, %v8369_v3 }
0x2047   :  { %v4419_v62 = vpack.c.bf16 %v4415_v58, %v4414_v60 }
0x2049   :  { %6876 = vmatmul.mubr.msk.bf16.vlgmr.msra.gmra.mrb[140].mxu1 %vm316_vm3, %v4418_v46 }
0x204a   :  { %6886 = vmatpush3.bf16.msra.mxu1 %v4722_v57  ;;  %6887 = vmatprep.mubr.msk.bf16.mxu1 %vm7332_vm0, %v7331_v0 }
0x204b   :  { %6897 = vmatprep.subr.bf16.mxu1 %v7331_v0 }
0x2051   :  { %6888 = vmatmul.mubr.msk.bf16.vlgmr.msra.gmra.mrb[144].mxu1 %vm316_vm3, %v4419_v62  ;;  %v6191_v62 = vld [vmem:[%s8693_s6 + $0x20] ss:$0 sm:$0xff] }
0x2052   :  { %6901 = vmatprep.mubr.msk.bf16.mxu1 %vm7332_vm0, %v7331_v0 }
0x210c   :  { %v4461_v5 = vpop.f32.mrb[132].mxu1 }
0x210d   :  { %v6853_v8 = vpop.f32.mrb[133].mxu1 }
0x210e   :  { %v4464_v9 = vpop.f32.mrb[134].mxu1 }
0x210f   :  { %v4468_v10 = vpack.c.bf16 %v4464_v9, %v4461_v5  ;;  %v6854_v1 = vpop.f32.mrb[135].mxu1 }
0x2111   :  { %6858 = vmatmul.mubr.msk.bf16.vlgmr.msra.gmra.mrb[124].mxu0 %vm107_vm2, %v4468_v10 }
0x2112   :  { %6868 = vmatpush3.bf16.msra.mxu0 %v4578_v11  ;;  %6869 = vmatprep.mubr.msk.bf16.mxu0 %vm7332_vm0, %v7331_v0  ;;  %v7061_v11 = vld [vmem:[%s8692_s5 + $0x44] ss:$92 sps:$4 sm:$0xff]  }
0x2113   :  { %6879 = vmatprep.subr.bf16.mxu0 %v7331_v0  ;;  %6898 = vmatpush3.bf16.msra.mxu1 %v7061_v11 }
0x2114   :  { %v4565_v12 = vpop.f32.mrb[136].mxu1  ;;  %6899 = vmatprep.subr.bf16.mxu1 %v7331_v0 }
0x2115   :  { %v6865_v17 = vpop.f32.mrb[137].mxu1 }
0x2116   :  { %v4568_v18 = vpop.f32.mrb[138].mxu1 }
0x2117   :  { %v4572_v19 = vpack.c.bf16 %v4568_v18, %v4565_v12  ;;  %v6866_v20 = vpop.f32.mrb[139].mxu1  ;;  %v7062_v12 = vld [vmem:[%s8692_s5 + $0xfc] ss:$92 sps:$4 sm:$0xff]  }
0x2118   :  { %6900 = vmatpush3.bf16.msra.mxu1 %v7062_v12 }
0x2119   :  { %6870 = vmatmul.mubr.msk.bf16.vlgmr.msra.gmra.mrb[128].mxu0 %vm107_vm2, %v4572_v19  ;;  %6913 = vmatprep.subr.bf16.mxu1 %v7331_v0 }
0x211a   :  { %6880 = vmatpush3.bf16.msra.mxu0 %v4676_v21  ;;  %6881 = vmatprep.mubr.msk.bf16.mxu0 %vm7332_vm0, %v7331_v0 }
0x211b   :  { %6891 = vmatprep.subr.bf16.mxu0 %v7331_v0 }
0x211c   :  { %v4663_v3 = vpop.f32.mrb[140].mxu1 }
0x211d   :  { %v6877_v30 = vpop.f32.mrb[141].mxu1 }
0x211e   :  { %v4666_v49 = vpop.f32.mrb[142].mxu1 }
0x211f   :  { %v4670_v31 = vpack.c.bf16 %v4666_v49, %v4663_v3  ;;  %v6878_v59 = vpop.f32.mrb[143].mxu1 }
0x2121   :  { %6882 = vmatmul.mubr.msk.bf16.vlgmr.msra.gmra.mrb[132].mxu0 %vm107_vm2, %v4670_v31 }
0x2122   :  { %6892 = vmatpush3.bf16.msra.mxu0 %v4774_v4  ;;  %6893 = vmatprep.mubr.msk.bf16.mxu0 %vm7332_vm0, %v7331_v0 }
0x2123   :  { %6905 = vmatprep.subr.bf16.mxu0 %v7331_v0 }
0x2124   :  { %v4761_v14 = vpop.f32.mrb[144].mxu1 }
0x2125   :  { %v6889_v15 = vpop.f32.mrb[145].mxu1 }
0x2126   :  { %v4764_v61 = vpop.f32.mrb[146].mxu1 }
0x2127   :  { %v4768_v32 = vpack.c.bf16 %v4764_v61, %v4761_v14  ;;  %v6890_v33 = vpop.f32.mrb[147].mxu1 }
0x2129   :  { %6894 = vmatmul.mubr.msk.bf16.vlgmr.msra.gmra.mrb[136].mxu0 %vm107_vm2, %v4768_v32 }
0x212a   :  { %6906 = vmatpush3.bf16.msra.mxu0 %v7059_v22  ;;  %6909 = vmatprep.mubr.msk.bf16.mxu0 %vm7332_vm0, %v7331_v0 }
0x212b   :  { %6907 = vmatprep.subr.bf16.mxu0 %v7331_v0 }
0x212e   :  { %6908 = vmatpush3.bf16.msra.mxu0 %v7060_v13  ;;  %v6185_v13 = vld [vmem:[%s8693_s6 + $0x24] ss:$0 sm:$0xff] }
0x212f   :  { %6919 = vmatprep.subr.bf16.mxu0 %v7331_v0 }
0x2131   :  { %6910 = vmatmul.mubr.msk.bf16.vlgmr.msra.gmra.mrb[140].mxu0 %vm58_vm1, %v8043_v6 }
0x2132   :  { %6921 = vmatprep.mubr.msk.bf16.mxu0 %vm7332_vm0, %v7331_v0 }
0x21e4   :  { %v4510_v34 = vpop.f32.mrb[124].mxu0 }
0x21e5   :  { %v6859_v35 = vpop.f32.mrb[125].mxu0  ;;  %v4523_v38 = vadd.f32 %v6178_v37, %v4510_v34 }
0x21e6   :  { %v4513_v36 = vpop.f32.mrb[126].mxu0 }
0x21e7   :  { %v6860_v25 = vpop.f32.mrb[127].mxu0  ;;  %v4524_v39 = vadd.f32 %v6178_v37, %v4513_v36  ;;  %v6186_v37 = vld [vmem:[%s8693_s6 + $0x25] ss:$0 sm:$0xff] }
0x21ec   :  { %v4614_v24 = vpop.f32.mrb[128].mxu0 }
0x21ed   :  { %v4621_v28 = vadd.f32 %v4614_v24, %v4523_v38  ;;  %v6871_v40 = vpop.f32.mrb[129].mxu0 }
0x21ee   :  { %v4617_v41 = vpop.f32.mrb[130].mxu0 }
0x21ef   :  { %v4622_v29 = vadd.f32 %v4617_v41, %v4524_v39  ;;  %v6872_v42 = vpop.f32.mrb[131].mxu0  ;;  %v6187_v41 = vld [vmem:[%s8693_s6 + $0x1f] ss:$0 sm:$0xff] }
0x21f4   :  { %v4712_v6 = vpop.f32.mrb[132].mxu0 }
0x21f5   :  { %v4719_v27 = vadd.f32 %v4712_v6, %v4621_v28  ;;  %v6883_v44 = vpop.f32.mrb[133].mxu0 }
0x21f6   :  { %v4715_v47 = vpop.f32.mrb[134].mxu0 }
0x21f7   :  { %v4720_v51 = vadd.f32 %v4715_v47, %v4622_v29  ;;  %v6884_v52 = vpop.f32.mrb[135].mxu0 }
0x21fc   :  { %v4810_v53 = vpop.f32.mrb[136].mxu0 }
0x21fd   :  { %v4817_v54 = vadd.f32 %v4810_v53, %v4719_v27  ;;  %v6895_v55 = vpop.f32.mrb[137].mxu0 }
0x21fe   :  { %v4813_v56 = vpop.f32.mrb[138].mxu0 }
0x21ff   :  { %v4819_v45 = vadd.f32 %v4817_v54, %v8295_v48  ;;  %v4818_v46 = vadd.f32 %v4813_v56, %v4720_v51  ;;  %v6896_v26 = vpop.f32.mrb[139].mxu0 }
0x2201   :  { %v4820_v57 = vadd.f32 %v4818_v46, %v8297_v50  ;;  %v4821_v43 = vsel %vm58_vm1, %v4819_v45, 0.0  ;;  %v4829_v58 = vmul.f32 %v4819_v45, %v4819_v45 }
0x2202   :  { %4822 = vadd.xlane.f32.xlu0 %v4821_v43 }
0x2203   :  { %v4824_v60 = vsel %vm58_vm1, %v4820_v57, 0.0  ;;  %v4831_v5 = vsel %vm58_vm1, %v4829_v58, 0.0  ;;  %v4830_v48 = vmul.f32 %v4820_v57, %v4820_v57 }
0x2204   :  { %4825 = vadd.xlane.f32.xlu1 %v4824_v60  ;;  %v4994_v63 = vpop.f32.mrb[140].mxu0 }
0x2205   :  { %v6911_v2 = vpop.f32.mrb[141].mxu0  ;;  %v4995_v8 = vadd.f32 %v6191_v62, %v4994_v63  ;;  %v4834_v1 = vsel %vm58_vm1, %v4830_v48, 0.0 }
0x2206   :  { %4832 = vadd.xlane.f32.xlu0 %v4831_v5  ;;  %v4997_v7 = vpop.f32.mrb[142].mxu0 }
0x2207   :  { %v4998_v50 = vadd.f32 %v6191_v62, %v4997_v7  ;;  %v6912_v9 = vpop.f32.mrb[143].mxu0  ;;  %v7306_v62 = vld [vmem:[%s8691_s4 + $0x8] sm:$0xff] }
0x2209   :  { %v8453_v10 = vpack.c.bf16 %v4998_v50, %v4995_v8 }
0x220a   :  { %4835 = vadd.xlane.f32.xlu0 %v4834_v1 }
0x220b   :  { %v5007_v40 = vsel %vm107_vm2, %v8453_v10, 0 }
0x2215   :  { %5054 = vrot.lane.b32.xlu1 %v8453_v10, %s7333_s0 }
0x2219   :  { %5105 = vrot.lane.b32.xlu1 %v8453_v10, %s7338_s15 }
0x228f   :  { %v4823_v16 = vpop.xlane.xlu0 %4822 }
0x2290   :  { %v4827_v17 = vmul.f32 0.03125, %v4823_v16 }
0x2291   :  { %v4826_v18 = vpop.xlane.xlu1 %4825 }
0x2292   :  { %v4839_v20 = vmul.f32 %v4827_v17, %v4827_v17  ;;  %v4828_v21 = vmul.f32 0.03125, %v4826_v18  ;;  %v4843_v22 = vsub.f32 %v4819_v45, %v4827_v17 }
0x2293   :  { %v4833_v19 = vpop.xlane.xlu0 %4832 }
0x2294   :  { %v4837_v3 = vmul.f32 0.03125, %v4833_v19  ;;  %v4840_v59 = vmul.f32 %v4828_v21, %v4828_v21  ;;  %v4844_v34 = vsub.f32 %v4820_v57, %v4828_v21  ;;  %v7305_v57 = vld [vmem:[%s8691_s4] sm:$0xff] }
0x2295   :  { %v5055_v23 = vpop.permute.xlu1 %5054 }
0x2296   :  { %v4841_v30 = vsub.f32 %v4837_v3, %v4839_v20  ;;  %v5060_v49 = vsel %vm107_vm2, %v5055_v23, 0 }
0x2297   :  { %v4836_v31 = vpop.xlane.xlu0 %4835  ;;  %6920 = vmatpush3.bf16.xpose.msra.mxu0 %v5060_v49 }
0x2298   :  { %v4845_v4 = vadd.f32 1e-05, %v4841_v30  ;;  %v4838_v14 = vmul.f32 0.03125, %v4836_v31  ;;  %6931 = vmatprep.subr.bf16.mxu0 %v7331_v0 }
0x2299   :  { %v5106_v51 = vpop.permute.xlu1 %5105 }
0x229a   :  { %7259 = vrsqrt.f32 %v4845_v4  ;;  %v4842_v15 = vsub.f32 %v4838_v14, %v4840_v59  ;;  %v5111_v53 = vsel %vm107_vm2, %v5106_v51, 0 }
0x229c   :  { %v4846_v61 = vadd.f32 1e-05, %v4842_v15 }
0x229e   :  { %7261 = vrsqrt.f32 %v4846_v61 }
0x22a4   :  { %v7260_v32 = vpop.eup %7259 }
0x22a5   :  { %v4849_v33 = vmul.f32 %v7260_v32, %v4843_v22 }
0x22a7   :  { %v4858_v25 = vmul.f32 %v6185_v13, %v4849_v33 }
0x22a8   :  { %v7262_v35 = vpop.eup %7261 }
0x22a9   :  { %v4850_v36 = vmul.f32 %v7262_v35, %v4844_v34  ;;  %v8476_v24 = vadd.f32 %v6186_v37, %v4858_v25 }
0x22ab   :  { %v4859_v38 = vmul.f32 %v6185_v13, %v4850_v36 }
0x22ad   :  { %v8478_v39 = vadd.f32 %v6186_v37, %v4859_v38 }
0x22af   :  { %v4869_v28 = vpack.c.bf16 %v8478_v39, %v8476_v24 }
0x22b1   :  { %6902 = vmatmul.mubr.msk.bf16.vlgmr.msra.gmra.mrb[148].mxu1 %vm58_vm1, %v4869_v28 }
0x22b2   :  { %6914 = vmatpush3.bf16.xpose.msra.mxu1 %v5007_v40  ;;  %6915 = vmatprep.mubr.msk.bf16.mxu1 %vm7332_vm0, %v7331_v0 }
0x22b3   :  { %6925 = vmatprep.subr.bf16.mxu1 %v7331_v0 }
0x2384   :  { %v4930_v29 = vpop.f32.mrb[148].mxu1 }
0x2385   :  { %v6903_v42 = vpop.f32.mrb[149].mxu1  ;;  %v4931_v27 = vadd.f32 %v6187_v41, %v4930_v29 }
0x2386   :  { %v4933_v6 = vpop.f32.mrb[150].mxu1 }
0x2387   :  { %v4934_v44 = vadd.f32 %v6187_v41, %v4933_v6  ;;  %v6904_v47 = vpop.f32.mrb[151].mxu1 }
0x2389   :  { %v5001_v52 = vpack.c.bf16 %v4934_v44, %v4931_v27 }
0x238b   :  { %5051 = vrot.lane.b32.xlu0 %v5001_v52, %s7333_s0  ;;  %5103 = vrot.lane.b32.xlu1 %v5001_v52, %s7338_s15 }
0x238c   :  { %6916 = vmatmul.mubr.msk.bf16.vlgmr.msra.gmra.mrb[152].mxu1 %vm107_vm2, %v5001_v52 }
0x238d   :  { %6926 = vmatpush3.bf16.xpose.msra.mxu1 %v5111_v53  ;;  %6927 = vmatprep.mubr.msk.bf16.mxu1 %vm7332_vm0, %v7331_v0 }
0x238e   :  { %6937 = vmatprep.subr.bf16.mxu1 %v7331_v0 }
0x238f   :  { %5156 = vrot.lane.b32.xlu0 %v8453_v10, %s7339_s16  ;;  %5154 = vrot.lane.b32.xlu1 %v5001_v52, %s7339_s16 }
0x23fd   :  { %v5052_v54 = vpop.permute.xlu0 %5051  ;;  %v5104_v55 = vpop.permute.xlu1 %5103 }
0x23fe   :  { %6922 = vmatmul.mubr.msk.bf16.vlgmr.msra.gmra.mrb[144].mxu0 %vm107_vm2, %v5052_v54  ;;  %6928 = vmatmul.mubr.msk.bf16.vlgmr.msra.gmra.mrb[156].mxu1 %vm107_vm2, %v5104_v55 }
0x23ff   :  { %6933 = vmatprep.mubr.msk.bf16.mxu0 %vm7332_vm0, %v7331_v0  ;;  %6939 = vmatprep.mubr.msk.bf16.mxu1 %vm7332_vm0, %v7331_v0 }
0x2401   :  { %v5157_v56 = vpop.permute.xlu0 %5156  ;;  %v5155_v46 = vpop.permute.xlu1 %5154 }
0x2402   :  { %v5162_v45 = vsel %vm107_vm2, %v5157_v56, 0 }
0x2403   :  { %6932 = vmatpush3.bf16.xpose.msra.mxu0 %v5162_v45 }
0x2404   :  { %6943 = vmatprep.subr.bf16.mxu0 %v7331_v0 }
0x240a   :  { %6934 = vmatmul.mubr.msk.bf16.vlgmr.msra.gmra.mrb[148].mxu0 %vm107_vm2, %v5155_v46 }
0x240b   :  { %6945 = vmatprep.mubr.msk.bf16.mxu0 %vm7332_vm0, %v7331_v0 }
0x245f   :  { %v5043_v26 = vpop.f32.mrb[152].mxu1 }
0x2460   :  { %v5205_v43 = vadd.f32 %v7305_v57, %v5043_v26  ;;  %v6917_v58 = vpop.f32.mrb[153].mxu1 }
0x2461   :  { %v5046_v60 = vpop.f32.mrb[154].mxu1 }
0x2462   :  { %v5206_v63 = vadd.f32 %v7306_v62, %v5046_v60  ;;  %v6918_v2 = vpop.f32.mrb[155].mxu1  ;;  %v5213_v5 = vsel %vm316_vm3, %v5205_v43, -inf }
0x2463   :  { %5214 = vmax.xlane.f32.xlu0 %v5213_v5 }
0x2464   :  { %v5216_v48 = vsel %vm316_vm3, %v5206_v63, -inf }
0x2465   :  { %5217 = vmax.xlane.f32.xlu1 %v5216_v48 }
0x24d1   :  { %v5096_v7 = vpop.f32.mrb[144].mxu0  ;;  %v5147_v8 = vpop.f32.mrb[156].mxu1 }
0x24d2   :  { %v5207_v50 = vadd.f32 %v7305_v57, %v5096_v7  ;;  %v5209_v9 = vadd.f32 %v7305_v57, %v5147_v8  ;;  %v6923_v1 = vpop.f32.mrb[145].mxu0  ;;  %v6929_v11 = vpop.f32.mrb[157].mxu1 }
0x24d3   :  { %v5099_v12 = vpop.f32.mrb[146].mxu0  ;;  %v5150_v16 = vpop.f32.mrb[158].mxu1 }
0x24d4   :  { %v5208_v17 = vadd.f32 %v7306_v62, %v5099_v12  ;;  %v6924_v18 = vpop.f32.mrb[147].mxu0  ;;  %v6930_v19 = vpop.f32.mrb[159].mxu1  ;;  %v5225_v20 = vsel %vm316_vm3, %v5209_v9, -inf  ;;  %v5219_v21 = vsel %vm316_vm3, %v5207_v50, -inf  ;;  %v5210_v3 = vadd.f32 %v7306_v62, %v5150_v16 }
0x24d5   :  { %5226 = vmax.xlane.f32.xlu1 %v5225_v20  ;;  %5220 = vmax.xlane.f32.xlu0 %v5219_v21 }
0x24d6   :  { %v5222_v23 = vsel %vm316_vm3, %v5208_v17, -inf  ;;  %v5228_v30 = vsel %vm316_vm3, %v5210_v3, -inf }
0x24d9   :  { %5223 = vmax.xlane.f32.xlu0 %v5222_v23 }
0x24dd   :  { %5229 = vmax.xlane.f32.xlu0 %v5228_v30  ;;  %v5198_v49 = vpop.f32.mrb[148].mxu0 }
0x24de   :  { %v5211_v31 = vadd.f32 %v7305_v57, %v5198_v49  ;;  %v6935_v59 = vpop.f32.mrb[149].mxu0 }
0x24df   :  { %v5201_v4 = vpop.f32.mrb[150].mxu0 }
0x24e0   :  { %v5212_v14 = vadd.f32 %v7306_v62, %v5201_v4  ;;  %v6936_v15 = vpop.f32.mrb[151].mxu0  ;;  %v5231_v61 = vsel %vm316_vm3, %v5211_v31, -inf }
0x24e1   :  { %5232 = vmax.xlane.f32.xlu1 %v5231_v61  ;;  %v5362_v15 = vld [vmem:[%s8692_s5 + $0x4c] sm:$0xf] }
0x24e2   :  { %v5234_v22 = vsel %vm316_vm3, %v5212_v14, -inf  ;;  %v5367_v61 = vsel %vm470_vm4, %v5362_v15, 0 }
0x24e3   :  { %5235 = vmax.xlane.f32.xlu0 %v5234_v22  ;;  %6944 = vmatpush3.bf16.msra.mxu0 %v5367_v61 }
0x24e4   :  { %6955 = vmatprep.subr.bf16.mxu0 %v7331_v0 }
0x24f0   :  { %v5215_v34 = vpop.xlane.xlu0 %5214 }
0x24f1   :  { %v5237_v35 = vsub.f32 %v5205_v43, %v5215_v34 }
0x24f2   :  { %v5218_v32 = vpop.xlane.xlu1 %5217  ;;  %5314 = vrot.lane.b32.xlu1 %v8453_v10, %s7334_s11 }
0x24f3   :  { %v5238_v33 = vsub.f32 %v5206_v63, %v5218_v32  ;;  %v5245_v37 = vmul.f32 1.442695, %v5237_v35 }
0x24f5   :  { %v5247_v13 = vmul.f32 1.442695, %v5238_v33 }
0x24f7   :  { %7263 = vpow2.f32 %v5247_v13 }
0x24f8   :  { %7265 = vpow2.f32 %v5245_v37 }
0x2501   :  { %v8528_v36 = vpop.eup %7263 }
0x2502   :  { %v5264_v25 = vsel %vm316_vm3, %v8528_v36, 0.0  ;;  %v7266_v38 = vpop.eup %7265 }
0x2503   :  { %5265 = vadd.xlane.f32.xlu0 %v5264_v25  ;;  %v5261_v28 = vsel %vm316_vm3, %v7266_v38, 0.0 }
0x2516   :  { %5262 = vadd.xlane.f32.xlu1 %v5261_v28 }
0x2562   :  { %v5227_v40 = vpop.xlane.xlu1 %5226  ;;  %v5221_v41 = vpop.xlane.xlu0 %5220 }
0x2563   :  { %v5241_v29 = vsub.f32 %v5209_v9, %v5227_v40  ;;  %v5239_v42 = vsub.f32 %v5207_v50, %v5221_v41 }
0x2565   :  { %v5249_v6 = vmul.f32 1.442695, %v5239_v42  ;;  %v5253_v27 = vmul.f32 1.442695, %v5241_v29 }
0x2566   :  { %v5224_v44 = vpop.xlane.xlu0 %5223 }
0x2567   :  { %v5240_v47 = vsub.f32 %v5208_v17, %v5224_v44  ;;  %7267 = vpow2.f32 %v5249_v6 }
0x2568   :  { %7269 = vpow2.f32 %v5253_v27 }
0x2569   :  { %v5251_v51 = vmul.f32 1.442695, %v5240_v47 }
0x256a   :  { %v5230_v52 = vpop.xlane.xlu0 %5229 }
0x256b   :  { %7271 = vpow2.f32 %v5251_v51  ;;  %v5242_v53 = vsub.f32 %v5210_v3, %v5230_v52 }
0x256d   :  { %v5255_v54 = vmul.f32 1.442695, %v5242_v53 }
0x256e   :  { %v5233_v55 = vpop.xlane.xlu1 %5232 }
0x256f   :  { %7273 = vpow2.f32 %v5255_v54  ;;  %v5243_v56 = vsub.f32 %v5211_v31, %v5233_v55  ;;  %v5466_v55 = vld [vmem:[%s8692_s5 + $0xa8] sm:$0xf] }
0x2570   :  { %v5236_v45 = vpop.xlane.xlu0 %5235 }
0x2571   :  { %v5257_v46 = vmul.f32 1.442695, %v5243_v56  ;;  %v5244_v26 = vsub.f32 %v5212_v14, %v5236_v45  ;;  %v7268_v57 = vpop.eup %7267 }
0x2572   :  { %v5315_v43 = vpop.permute.xlu1 %5314  ;;  %v5267_v60 = vsel %vm316_vm3, %v7268_v57, 0.0  ;;  %v8534_v62 = vpop.eup %7269 }
0x2573   :  { %7275 = vpow2.f32 %v5257_v46  ;;  %v5259_v58 = vmul.f32 1.442695, %v5244_v26  ;;  %6938 = vmatpush3.bf16.msra.mxu1 %v5315_v43  ;;  %5268 = vadd.xlane.f32.xlu1 %v5267_v60  ;;  %v5273_v5 = vsel %vm316_vm3, %v8534_v62, 0.0 }
0x2574   :  { %6949 = vmatprep.subr.bf16.mxu1 %v7331_v0 }
0x2575   :  { %v7272_v63 = vpop.eup %7271  ;;  %7277 = vpow2.f32 %v5259_v58  ;;  %v5564_v58 = vld [vmem:[%s8692_s5 + $0x104] sm:$0xf] }
0x2576   :  { %v5270_v2 = vsel %vm316_vm3, %v7272_v63, 0.0 }
0x2577   :  { %5271 = vadd.xlane.f32.xlu0 %v5270_v2  ;;  %5274 = vadd.xlane.f32.xlu1 %v5273_v5  ;;  %v5569_v5 = vsel %vm470_vm4, %v5564_v58, 0 }
0x2579   :  { %v7274_v48 = vpop.eup %7273 }
0x257a   :  { %v5276_v7 = vsel %vm316_vm3, %v7274_v48, 0.0 }
0x257b   :  { %5277 = vadd.xlane.f32.xlu0 %v5276_v7  ;;  %v5662_v7 = vld [vmem:[%s8692_s5 + $0x160] sm:$0xf] }
0x257d   :  { %v8541_v8 = vpop.eup %7275 }
0x257e   :  { %v5279_v50 = vsel %vm316_vm3, %v8541_v8, 0.0 }
0x257f   :  { %v8545_v9 = vpop.eup %7277  ;;  %5280 = vadd.xlane.f32.xlu1 %v5279_v50 }
0x2580   :  { %v5282_v1 = vsel %vm316_vm3, %v8545_v9, 0.0 }
0x2581   :  { %5283 = vadd.xlane.f32.xlu0 %v5282_v1 }
0x2590   :  { %5516 = vrot.lane.b32.xlu1 %v8453_v10, %s7335_s12  ;;  %v5266_v11 = vpop.xlane.xlu0 %5265 }
0x2591   :  { %v5286_v12 = vadd.f32 1e-30, %v5266_v11  ;;  %v5667_v11 = vsel %vm470_vm4, %v5662_v7, 0 }
0x2593   :  { %7279 = vrcp.f32 %v5286_v12 }
0x2594   :  { %5614 = vrot.lane.b32.xlu1 %v8453_v10, %s7337_s14 }
0x2597   :  { %5418 = vrot.lane.b32.xlu0 %v8453_v10, %s7336_s13 }
0x259d   :  { %v7280_v18 = vpop.eup %7279 }
0x259e   :  { %v5302_v20 = vmul.f32 %v7280_v18, %v8528_v36 }
0x25a3   :  { %v5263_v16 = vpop.xlane.xlu1 %5262 }
0x25a4   :  { %v5285_v17 = vadd.f32 1e-30, %v5263_v16 }
0x25a6   :  { %7281 = vrcp.f32 %v5285_v17 }
0x25b0   :  { %v7282_v19 = vpop.eup %7281 }
0x25b1   :  { %v5301_v21 = vmul.f32 %v7282_v19, %v7266_v38 }
0x25b3   :  { %v5309_v3 = vpack.c.bf16 %v5302_v20, %v5301_v21 }
0x25b5   :  { %6940 = vmatmul.mubr.msk.bf16.vlgmr.msra.gmra.mrb[160].mxu1 %vm316_vm3, %v5309_v3 }
0x25b6   :  { %6951 = vmatprep.mubr.msk.bf16.mxu1 %vm7332_vm0, %v7331_v0 }
0x2600   :  { %v5269_v23 = vpop.xlane.xlu1 %5268 }
0x2601   :  { %v5287_v30 = vadd.f32 1e-30, %v5269_v23 }
0x2603   :  { %7283 = vrcp.f32 %v5287_v30  ;;  %v6201_v30 = vld [vmem:[%s8693_s6 + $0x21] ss:$0 sm:$0xff] }
0x2604   :  { %v5272_v10 = vpop.xlane.xlu0 %5271  ;;  %v5275_v31 = vpop.xlane.xlu1 %5274 }
0x2605   :  { %v5288_v49 = vadd.f32 1e-30, %v5272_v10  ;;  %v5289_v4 = vadd.f32 1e-30, %v5275_v31 }
0x2607   :  { %7285 = vrcp.f32 %v5288_v49 }
0x2608   :  { %v5278_v59 = vpop.xlane.xlu0 %5277 }
0x2609   :  { %v5290_v14 = vadd.f32 1e-30, %v5278_v59 }
0x260b   :  { %7287 = vrcp.f32 %v5290_v14 }
0x260c   :  { %7289 = vrcp.f32 %v5289_v4  ;;  %v5281_v22 = vpop.xlane.xlu1 %5280 }
0x260d   :  { %v7284_v33 = vpop.eup %7283  ;;  %v5291_v35 = vadd.f32 1e-30, %v5281_v22 }
0x260e   :  { %v5284_v32 = vpop.xlane.xlu0 %5283  ;;  %v5303_v36 = vmul.f32 %v7284_v33, %v7268_v57  ;;  %v5471_v57 = vsel %vm470_vm4, %v5466_v55, 0 }
0x260f   :  { %v5292_v13 = vadd.f32 1e-30, %v5284_v32 }
0x2610   :  { %v5517_v40 = vpop.permute.xlu1 %5516 }
0x2611   :  { %v7286_v34 = vpop.eup %7285  ;;  %7291 = vrcp.f32 %v5292_v13 }
0x2612   :  { %v5304_v25 = vmul.f32 %v7286_v34, %v7272_v63  ;;  %v5419_v37 = vpop.permute.xlu0 %5418  ;;  %7293 = vrcp.f32 %v5291_v35 }
0x2613   :  { %6950 = vmatpush3.bf16.msra.mxu1 %v5419_v37 }
0x2614   :  { %v5310_v38 = vpack.c.bf16 %v5304_v25, %v5303_v36  ;;  %6961 = vmatprep.subr.bf16.mxu1 %v7331_v0  ;;  %v5615_v44 = vpop.permute.xlu1 %5614 }
0x2615   :  { %v7288_v28 = vpop.eup %7287 }
0x2616   :  { %6952 = vmatmul.mubr.msk.bf16.vlgmr.msra.gmra.mrb[164].mxu1 %vm316_vm3, %v5310_v38  ;;  %v7290_v41 = vpop.eup %7289  ;;  %v5306_v29 = vmul.f32 %v7288_v28, %v7274_v48 }
0x2617   :  { %6962 = vmatpush3.bf16.msra.mxu1 %v5517_v40  ;;  %6963 = vmatprep.mubr.msk.bf16.mxu1 %vm7332_vm0, %v7331_v0  ;;  %v5305_v42 = vmul.f32 %v7290_v41, %v8534_v62 }
0x2618   :  { %6973 = vmatprep.subr.bf16.mxu1 %v7331_v0 }
0x2619   :  { %v5311_v6 = vpack.c.bf16 %v5306_v29, %v5305_v42 }
0x261b   :  { %v7292_v27 = vpop.eup %7291 }
0x261c   :  { %v7294_v47 = vpop.eup %7293  ;;  %v5308_v51 = vmul.f32 %v7292_v27, %v8545_v9 }
0x261d   :  { %v5307_v52 = vmul.f32 %v7294_v47, %v8541_v8 }
0x261e   :  { %6964 = vmatmul.mubr.msk.bf16.vlgmr.msra.gmra.mrb[168].mxu1 %vm316_vm3, %v5311_v6 }
0x261f   :  { %6974 = vmatpush3.bf16.msra.mxu1 %v5615_v44  ;;  %6975 = vmatprep.mubr.msk.bf16.mxu1 %vm7332_vm0, %v7331_v0  ;;  %v5312_v53 = vpack.c.bf16 %v5308_v51, %v5307_v52  ;;  %v7065_v52 = vld [vmem:[%s8692_s5 + $0x54] ss:$92 sps:$4 sm:$0xff]  }
0x2620   :  { %6985 = vmatprep.subr.bf16.mxu1 %v7331_v0 }
0x2626   :  { %6976 = vmatmul.mubr.msk.bf16.vlgmr.msra.gmra.mrb[172].mxu1 %vm316_vm3, %v5312_v53  ;;  %v7066_v53 = vld [vmem:[%s8692_s5 + $0x10c] ss:$92 sps:$4 sm:$0xff]  }
0x2627   :  { %6989 = vmatprep.mubr.msk.bf16.mxu1 %vm7332_vm0, %v7331_v0 }
0x2688   :  { %v5354_v54 = vpop.f32.mrb[160].mxu1 }
0x2689   :  { %v6941_v56 = vpop.f32.mrb[161].mxu1 }
0x268a   :  { %v5357_v45 = vpop.f32.mrb[162].mxu1 }
0x268b   :  { %v5361_v46 = vpack.c.bf16 %v5357_v45, %v5354_v54  ;;  %v6942_v26 = vpop.f32.mrb[163].mxu1 }
0x268d   :  { %6946 = vmatmul.mubr.msk.bf16.vlgmr.msra.gmra.mrb[152].mxu0 %vm107_vm2, %v5361_v46 }
0x268e   :  { %6956 = vmatpush3.bf16.msra.mxu0 %v5471_v57  ;;  %6957 = vmatprep.mubr.msk.bf16.mxu0 %vm7332_vm0, %v7331_v0 }
0x268f   :  { %6967 = vmatprep.subr.bf16.mxu0 %v7331_v0 }
0x26e9   :  { %v5458_v43 = vpop.f32.mrb[164].mxu1 }
0x26ea   :  { %v6953_v60 = vpop.f32.mrb[165].mxu1 }
0x26eb   :  { %v5461_v62 = vpop.f32.mrb[166].mxu1 }
0x26ec   :  { %v5465_v63 = vpack.c.bf16 %v5461_v62, %v5458_v43  ;;  %v6954_v2 = vpop.f32.mrb[167].mxu1 }
0x26ee   :  { %6958 = vmatmul.mubr.msk.bf16.vlgmr.msra.gmra.mrb[156].mxu0 %vm107_vm2, %v5465_v63 }
0x26ef   :  { %6968 = vmatpush3.bf16.msra.mxu0 %v5569_v5  ;;  %6969 = vmatprep.mubr.msk.bf16.mxu0 %vm7332_vm0, %v7331_v0 }
0x26f0   :  { %6979 = vmatprep.subr.bf16.mxu0 %v7331_v0 }
0x26f1   :  { %v5556_v48 = vpop.f32.mrb[168].mxu1 }
0x26f2   :  { %v6965_v8 = vpop.f32.mrb[169].mxu1 }
0x26f3   :  { %v5559_v50 = vpop.f32.mrb[170].mxu1 }
0x26f4   :  { %v5563_v9 = vpack.c.bf16 %v5559_v50, %v5556_v48  ;;  %v6966_v1 = vpop.f32.mrb[171].mxu1  ;;  %v6208_v50 = vld [vmem:[%s8693_s6 + $0x26] ss:$0 sm:$0xff] }
0x26f6   :  { %6970 = vmatmul.mubr.msk.bf16.vlgmr.msra.gmra.mrb[160].mxu0 %vm107_vm2, %v5563_v9 }
0x26f7   :  { %6980 = vmatpush3.bf16.msra.mxu0 %v5667_v11  ;;  %6981 = vmatprep.mubr.msk.bf16.mxu0 %vm7332_vm0, %v7331_v0 }
0x26f8   :  { %6993 = vmatprep.subr.bf16.mxu0 %v7331_v0 }
0x26f9   :  { %v5654_v12 = vpop.f32.mrb[172].mxu1 }
0x26fa   :  { %v6977_v16 = vpop.f32.mrb[173].mxu1 }
0x26fb   :  { %v5657_v17 = vpop.f32.mrb[174].mxu1  ;;  %v6209_v16 = vld [vmem:[%s8693_s6 + $0x27] ss:$0 sm:$0xff] }
0x26fc   :  { %v5661_v18 = vpack.c.bf16 %v5657_v17, %v5654_v12  ;;  %v6978_v19 = vpop.f32.mrb[175].mxu1 }
0x26fe   :  { %6982 = vmatmul.mubr.msk.bf16.vlgmr.msra.gmra.mrb[164].mxu0 %vm107_vm2, %v5661_v18 }
0x26ff   :  { %7001 = vmatprep.mubr.msk.bf16.mxu0 %vm7332_vm0, %v7331_v0  ;;  %6994 = vmatpush3.bf16.msra.mxu0 %v7065_v52 }
0x2700   :  { %6995 = vmatprep.subr.bf16.mxu0 %v7331_v0 }
0x2703   :  { %6996 = vmatpush3.bf16.msra.mxu0 %v7066_v53 }
0x2704   :  { %6997 = vmatprep.subr.bf16.mxu0 %v7331_v0 }
0x2760   :  { %v5403_v20 = vpop.f32.mrb[152].mxu0 }
0x2761   :  { %v6947_v21 = vpop.f32.mrb[153].mxu0  ;;  %v5416_v10 = vadd.f32 %v6201_v30, %v5403_v20 }
0x2762   :  { %v5406_v3 = vpop.f32.mrb[154].mxu0  ;;  %v7067_v21 = vld [vmem:[%s8692_s5 + $0x1c4] ss:$92 sps:$4 sm:$0xff]  }
0x2763   :  { %v6948_v23 = vpop.f32.mrb[155].mxu0  ;;  %v5417_v31 = vadd.f32 %v6201_v30, %v5406_v3  ;;  %6998 = vmatpush3.bf16.msra.mxu0 %v7067_v21  ;;  %v7068_v3 = vld [vmem:[%s8692_s5 + $0x27c] ss:$92 sps:$4 sm:$0xff]  }
0x2764   :  { %6999 = vmatprep.subr.bf16.mxu0 %v7331_v0  ;;  %v6210_v23 = vld [vmem:[%s8693_s6 + $0x22] ss:$0 sm:$0xff] }
0x2767   :  { %7000 = vmatpush3.bf16.msra.mxu0 %v7068_v3 }
0x27c1   :  { %v5507_v49 = vpop.f32.mrb[156].mxu0 }
0x27c2   :  { %v5514_v59 = vadd.f32 %v5507_v49, %v5416_v10  ;;  %v6959_v4 = vpop.f32.mrb[157].mxu0 }
0x27c3   :  { %v5510_v14 = vpop.f32.mrb[158].mxu0 }
0x27c4   :  { %v5515_v15 = vadd.f32 %v5510_v14, %v5417_v31  ;;  %v6960_v61 = vpop.f32.mrb[159].mxu0 }
0x27c9   :  { %v5605_v22 = vpop.f32.mrb[160].mxu0 }
0x27ca   :  { %v5612_v32 = vadd.f32 %v5605_v22, %v5514_v59  ;;  %v6971_v33 = vpop.f32.mrb[161].mxu0  ;;  %v6214_v22 = vld [vmem:[%s8693_s6 + $0x23] ss:$0 sm:$0xff] }
0x27cb   :  { %v5608_v13 = vpop.f32.mrb[162].mxu0 }
0x27cc   :  { %v5613_v34 = vadd.f32 %v5608_v13, %v5515_v15  ;;  %v6972_v35 = vpop.f32.mrb[163].mxu0 }
0x27d1   :  { %v5703_v36 = vpop.f32.mrb[164].mxu0 }
0x27d2   :  { %v5710_v25 = vadd.f32 %v5703_v36, %v5612_v32  ;;  %v6983_v37 = vpop.f32.mrb[165].mxu0 }
0x27d3   :  { %v5706_v38 = vpop.f32.mrb[166].mxu0 }
0x27d4   :  { %v5712_v28 = vadd.f32 %v5710_v25, %v8476_v24  ;;  %v5711_v40 = vadd.f32 %v5706_v38, %v5613_v34  ;;  %v6984_v41 = vpop.f32.mrb[167].mxu0  ;;  %v7063_v24 = vld [vmem:[%s8692_s5 + $0x50] ss:$92 sps:$4 sm:$0xff]  }
0x27d5   :  { %6986 = vmatpush3.bf16.msra.mxu1 %v7063_v24 }
0x27d6   :  { %v5713_v29 = vadd.f32 %v5711_v40, %v8478_v39  ;;  %v5714_v42 = vsel %vm58_vm1, %v5712_v28, 0.0  ;;  %v5722_v6 = vmul.f32 %v5712_v28, %v5712_v28  ;;  %v7064_v39 = vld [vmem:[%s8692_s5 + $0x108] ss:$92 sps:$4 sm:$0xff]   ;;  %6987 = vmatprep.subr.bf16.mxu1 %v7331_v0 }
0x27d7   :  { %5715 = vadd.xlane.f32.xlu0 %v5714_v42 }
0x27d8   :  { %v5717_v27 = vsel %vm58_vm1, %v5713_v29, 0.0  ;;  %v5724_v44 = vsel %vm58_vm1, %v5722_v6, 0.0  ;;  %v5723_v47 = vmul.f32 %v5713_v29, %v5713_v29  ;;  %v7069_v6 = vld [vmem:[%s8692_s5 + $0x58] ss:$92 sps:$4 sm:$0xff]  }
0x27d9   :  { %5718 = vadd.xlane.f32.xlu1 %v5717_v27  ;;  %6988 = vmatpush3.bf16.msra.mxu1 %v7064_v39  ;;  %v7070_v27 = vld [vmem:[%s8692_s5 + $0x110] ss:$92 sps:$4 sm:$0xff]  }
0x27da   :  { %v5727_v51 = vsel %vm58_vm1, %v5723_v47, 0.0  ;;  %7005 = vmatprep.subr.bf16.mxu1 %v7331_v0 }
0x27db   :  { %5725 = vadd.xlane.f32.xlu0 %v5724_v44 }
0x27df   :  { %5728 = vadd.xlane.f32.xlu0 %v5727_v51 }
0x2864   :  { %v5716_v54 = vpop.xlane.xlu0 %5715 }
0x2865   :  { %v5720_v55 = vmul.f32 0.03125, %v5716_v54 }
0x2866   :  { %v5719_v56 = vpop.xlane.xlu1 %5718 }
0x2867   :  { %v5732_v46 = vmul.f32 %v5720_v55, %v5720_v55  ;;  %v5721_v26 = vmul.f32 0.03125, %v5719_v56  ;;  %v5736_v48 = vsub.f32 %v5712_v28, %v5720_v55 }
0x2868   :  { %v5726_v45 = vpop.xlane.xlu0 %5725 }
0x2869   :  { %v5730_v57 = vmul.f32 0.03125, %v5726_v45  ;;  %v5733_v60 = vmul.f32 %v5721_v26, %v5721_v26  ;;  %v5737_v9 = vsub.f32 %v5713_v29, %v5721_v26 }
0x286b   :  { %v5734_v43 = vsub.f32 %v5730_v57, %v5732_v46 }
0x286c   :  { %v5729_v58 = vpop.xlane.xlu0 %5728 }
0x286d   :  { %v5738_v62 = vadd.f32 1e-05, %v5734_v43  ;;  %v5731_v63 = vmul.f32 0.03125, %v5729_v58 }
0x286f   :  { %7295 = vrsqrt.f32 %v5738_v62  ;;  %v5735_v2 = vsub.f32 %v5731_v63, %v5733_v60 }
0x2871   :  { %v5739_v5 = vadd.f32 1e-05, %v5735_v2 }
0x2873   :  { %7297 = vrsqrt.f32 %v5739_v5 }
0x2879   :  { %v7296_v7 = vpop.eup %7295 }
0x287a   :  { %v5742_v8 = vmul.f32 %v7296_v7, %v5736_v48  ;;  %v6221_v48 = vld [vmem:[%s8693_s6 + $0x29] ss:$0 sm:$0xff] }
0x287c   :  { %v5751_v12 = vmul.f32 %v6208_v50, %v5742_v8 }
0x287d   :  { %v7298_v1 = vpop.eup %7297 }
0x287e   :  { %v5743_v11 = vmul.f32 %v7298_v1, %v5737_v9  ;;  %v5760_v18 = vadd.f32 %v6209_v16, %v5751_v12  ;;  %v6222_v1 = vld [vmem:[%s8693_s6 + $0x2a] ss:$0 sm:$0xff] }
0x2880   :  { %v5752_v17 = vmul.f32 %v6208_v50, %v5743_v11 }
0x2882   :  { %v5761_v19 = vadd.f32 %v6209_v16, %v5752_v17 }
0x2884   :  { %v5762_v20 = vpack.c.bf16 %v5761_v19, %v5760_v18 }
0x2886   :  { %6990 = vmatmul.mubr.msk.bf16.vlgmr.msra.gmra.mrb[176].mxu1 %vm58_vm1, %v5762_v20 }
0x2887   :  { %7009 = vmatprep.mubr.msk.bf16.mxu1 %vm7332_vm0, %v7331_v0  ;;  %7006 = vmatpush3.bf16.msra.mxu1 %v7069_v6 }
0x2888   :  { %7007 = vmatprep.subr.bf16.mxu1 %v7331_v0  ;;  %v6220_v0 = vld [vmem:[%s8693_s6 + $0x28] ss:$0 sm:$0xff] }
0x288b   :  { %7008 = vmatpush3.bf16.msra.mxu1 %v7070_v27 }
0x2959   :  { %v5823_v30 = vpop.f32.mrb[176].mxu1 }
0x295a   :  { %v5824_v10 = vadd.f32 %v6210_v23, %v5823_v30  ;;  %v6991_v49 = vpop.f32.mrb[177].mxu1 }
0x295b   :  { %v5826_v31 = vpop.f32.mrb[178].mxu1 }
0x295c   :  { %v5827_v59 = vadd.f32 %v6210_v23, %v5826_v31  ;;  %v6992_v4 = vpop.f32.mrb[179].mxu1  ;;  %v5830_v14 = vmax.f32 %v5824_v10, 0.0 }
0x295e   :  { %v5831_v15 = vmax.f32 %v5827_v59, 0.0 }
0x2960   :  { %v5832_v61 = vpack.c.bf16 %v5831_v15, %v5830_v14 }
0x2962   :  { %7002 = vmatmul.mubr.msk.bf16.vlgmr.msra.gmra.mrb[168].mxu0 %vm978_vm5, %v5832_v61 }
0x2a35   :  { %v5909_v32 = vpop.f32.mrb[168].mxu0 }
0x2a36   :  { %v5910_v33 = vadd.f32 %v6214_v22, %v5909_v32  ;;  %v7003_v13 = vpop.f32.mrb[169].mxu0 }
0x2a37   :  { %v5912_v34 = vpop.f32.mrb[170].mxu0 }
0x2a38   :  { %v5916_v35 = vadd.f32 %v5910_v33, %v5760_v18  ;;  %v5913_v36 = vadd.f32 %v6214_v22, %v5912_v34  ;;  %v7004_v25 = vpop.f32.mrb[171].mxu0 }
0x2a3a   :  { %v5917_v37 = vadd.f32 %v5913_v36, %v5761_v19  ;;  %v5918_v38 = vsel %vm58_vm1, %v5916_v35, 0.0  ;;  %v5926_v28 = vmul.f32 %v5916_v35, %v5916_v35 }
0x2a3b   :  { %5919 = vadd.xlane.f32.xlu1 %v5918_v38 }
0x2a3c   :  { %v5921_v40 = vsel %vm58_vm1, %v5917_v37, 0.0  ;;  %v5927_v41 = vmul.f32 %v5917_v37, %v5917_v37  ;;  %v5928_v29 = vsel %vm58_vm1, %v5926_v28, 0.0 }
0x2a3d   :  { %5922 = vadd.xlane.f32.xlu0 %v5921_v40 }
0x2a3e   :  { %v5931_v42 = vsel %vm58_vm1, %v5927_v41, 0.0 }
0x2a3f   :  { %5929 = vadd.xlane.f32.xlu1 %v5928_v29 }
0x2a41   :  { %5932 = vadd.xlane.f32.xlu0 %v5931_v42 }
0x2ac8   :  { %v5920_v44 = vpop.xlane.xlu1 %5919 }
0x2ac9   :  { %v5924_v47 = vmul.f32 0.03125, %v5920_v44 }
0x2aca   :  { %v5923_v51 = vpop.xlane.xlu0 %5922 }
0x2acb   :  { %v5925_v24 = vmul.f32 0.03125, %v5923_v51  ;;  %v5936_v52 = vmul.f32 %v5924_v47, %v5924_v47  ;;  %v5940_v43 = vsub.f32 %v5916_v35, %v5924_v47 }
0x2acc   :  { %v5930_v39 = vpop.xlane.xlu1 %5929 }
0x2acd   :  { %v5934_v53 = vmul.f32 0.03125, %v5930_v39  ;;  %v5937_v55 = vmul.f32 %v5925_v24, %v5925_v24  ;;  %v5941_v60 = vsub.f32 %v5917_v37, %v5925_v24 }
0x2ace   :  { %v5933_v54 = vpop.xlane.xlu0 %5932 }
0x2acf   :  { %v5938_v56 = vsub.f32 %v5934_v53, %v5936_v52  ;;  %v5935_v45 = vmul.f32 0.03125, %v5933_v54 }
0x2ad1   :  { %v5942_v46 = vadd.f32 1e-05, %v5938_v56  ;;  %v5939_v26 = vsub.f32 %v5935_v45, %v5937_v55 }
0x2ad3   :  { %7299 = vrsqrt.f32 %v5942_v46  ;;  %v5943_v57 = vadd.f32 1e-05, %v5939_v26 }
0x2ad5   :  { %7301 = vrsqrt.f32 %v5943_v57 }
0x2add   :  { %v7300_v58 = vpop.eup %7299 }
0x2ade   :  { %v5946_v62 = vmul.f32 %v7300_v58, %v5940_v43 }
0x2adf   :  { %v7302_v63 = vpop.eup %7301 }
0x2ae0   :  { %v5955_v2 = vmul.f32 %v6220_v0, %v5946_v62  ;;  %v5947_v5 = vmul.f32 %v7302_v63, %v5941_v60 }
0x2ae2   :  { %v5956_v7 = vmul.f32 %v6220_v0, %v5947_v5  ;;  %v5964_v8 = vadd.f32 %v6221_v48, %v5955_v2 }
0x2ae4   :  { %v5965_v50 = vadd.f32 %v6221_v48, %v5956_v7 }
0x2ae6   :  { %v5966_v9 = vpack.c.bf16 %v5965_v50, %v5964_v8 }
0x2ae8   :  { %7010 = vmatmul.mubr.msk.bf16.vlgmr.msra.gmra.mrb[180].mxu1 %vm58_vm1, %v5966_v9 }
0x2bbb   :  { %v6027_v11 = vpop.f32.mrb[180].mxu1 }
0x2bbc   :  { %v6028_v12 = vadd.f32 %v6222_v1, %v6027_v11  ;;  %v7011_v16 = vpop.f32.mrb[181].mxu1 }
0x2bbd   :  { %v6030_v17 = vpop.f32.mrb[182].mxu1 }
0x2bbe   :  { %6034 = vst [vmem:[#allocation2] sm:$0xff] %v6028_v12  ;;  %v6031_v18 = vadd.f32 %v6222_v1, %v6030_v17  ;;  %v7012_v19 = vpop.f32.mrb[183].mxu1 }
0x2bc0   :  { %6035 = vst [vmem:[#allocation2 + $0x8] sm:$0xff] %v6031_v18 }
0x2bc1   :  { %7318 = shalt.err (!%p7315_p4)
}
0x2bc2   :  { %s7319_s20 = scalar_lea.hbm %s8694_s7, 256 }
0x2bc3   :  { %p7320_p5 = scmp.ne.s32.totalorder %s8694_s7, %s7319_s20  ;;  %p7323_p6 = scmp.lt.u32.totalorder %s7319_s20, %s8694_s7 }
0x2bc5   :  { %p7325_p7 = pnand %p7323_p6, %p7320_p5 }
0x2bc7   :  { %7328 = shalt.err (!%p7325_p7)
}
0x2bc8   :  { %s7345_s21 = smov 128   ;;  %s7346_s22 = smov 8  }
0x2bc9   :  { %6047 = dma.vmem_to_hbm [thread:$0]  %s6042_s17, 256, %s8694_s7, [#allocation3], %s7345_s21, %s7345_s21, %s7346_s22  }
0x2bca   :  { %7329 = dma.done.wait [#allocation3], 256  }
0x2bcb   :  { %7330 = vsyncadd [#allocation3], 4294967040 }
0x2bcc   :  { %6051 = vsyncpa [#allocation3], 1 }

</bundles_post_ra>
